<compile_context>
chip_gen: v7x
topology: tpu7x:2x2x1
jax: 0.10.0
libtpu: 0.0.40
codegen_flags: <defaults>
</compile_context>

<pallas_src>
import functools

import jax
import jax.numpy as jnp
from jax.experimental import pallas as pl
from jax.experimental.pallas import tpu as pltpu

_LN_EPS = 1e-5
_VMEM_LIMIT = 32 * 1024 * 1024  # v7x-safe


def _ru(x, m):
    return (x + m - 1) // m * m


def _pick_tile(dim, prefs):
    """Largest preferred tile that divides dim, else the full dim (single tile)."""
    for p in prefs:
        if dim % p == 0:
            return p
    return dim


def _layernorm_f32(xf, gamma, beta):
    mu = jnp.mean(xf, axis=-1, keepdims=True)
    var = jnp.mean(jnp.square(xf - mu), axis=-1, keepdims=True)
    return (xf - mu) * jax.lax.rsqrt(var + _LN_EPS) * gamma + beta


# --------------------------------------------------------------------------
# Kernel 1: general tiled matmul + bias (patch embedding, classifier head)
# --------------------------------------------------------------------------

def _matmul_bias_kernel(x_ref, w_ref, b_ref, o_ref, acc_ref):
    k_id = pl.program_id(2)

    @pl.when(k_id == 0)
    def _():
        acc_ref[...] = jnp.zeros_like(acc_ref)

    acc_ref[...] += jnp.dot(x_ref[...], w_ref[...],
                            preferred_element_type=jnp.float32)

    @pl.when(k_id == pl.num_programs(2) - 1)
    def _():
        o_ref[...] = (acc_ref[...] + b_ref[...].astype(jnp.float32)).astype(o_ref.dtype)


def matmul_bias(x, w, b, *, out_dtype=jnp.bfloat16):
    """out = x @ w + b.  x: (M, K) bf16, w: (K, N) bf16, b: (1, N) f32."""
    M, K = x.shape
    K2, N = w.shape
    assert K2 == K and M % 8 == 0

    tm = _pick_tile(M, (512, 256, 128, 64, 32, 16, 8))
    tn = _pick_tile(N, (256, 128))
    tk = _pick_tile(K, (512, 256, 128))
    assert M % tm == 0 and N % tn == 0 and K % tk == 0

    return pl.pallas_call(
        _matmul_bias_kernel,
        out_shape=jax.ShapeDtypeStruct((M, N), out_dtype),
        grid_spec=pltpu.PrefetchScalarGridSpec(
            num_scalar_prefetch=0,
            grid=(M // tm, N // tn, K // tk),
            in_specs=[
                pl.BlockSpec((tm, tk), lambda i, j, k: (i, k)),
                pl.BlockSpec((tk, tn), lambda i, j, k: (k, j)),
                pl.BlockSpec((1, tn), lambda i, j, k: (0, j)),
            ],
            out_specs=pl.BlockSpec((tm, tn), lambda i, j, k: (i, j)),
            scratch_shapes=[pltpu.VMEM((tm, tn), jnp.float32)],
        ),
        compiler_params=pltpu.CompilerParams(
            dimension_semantics=("parallel", "parallel", "arbitrary"),
            vmem_limit_bytes=_VMEM_LIMIT,
        ),
    )(x, w, b)


# --------------------------------------------------------------------------
# Kernel 2: fused attention residual block (per batch element)
#   out = x + to_out( MHA( LayerNorm(x) @ W_qkv ) )
# --------------------------------------------------------------------------

def _attn_block_kernel(x_ref, g_ref, be_ref, wqkv_ref, wo_ref, bo_ref, o_ref,
                       *, heads, scale, n_valid):
    x = x_ref[0]                                        # (Np, D) bf16
    xf = x.astype(jnp.float32)
    Np, D = xf.shape
    hd = D // heads

    # PreNorm
    xn = _layernorm_f32(xf, g_ref[...].astype(jnp.float32),
                        be_ref[...].astype(jnp.float32)).astype(jnp.bfloat16)

    # QKV projection (to_qkv has no bias), f32 accumulation on the MXU.
    qkv = jnp.dot(xn, wqkv_ref[...], preferred_element_type=jnp.float32)  # (Np, 3D)
    q = qkv[:, :D]
    k = qkv[:, D:2 * D]
    v = qkv[:, 2 * D:]

    need_mask = n_valid < Np
    if need_mask:
        col = jax.lax.broadcasted_iota(jnp.int32, (Np, Np), 1)
        key_mask = col < n_valid

    # Per-head masked softmax attention; heads concatenated back to lane-dense D.
    head_outs = []
    for h in range(heads):
        qh = q[:, h * hd:(h + 1) * hd].astype(jnp.bfloat16)
        kh = k[:, h * hd:(h + 1) * hd].astype(jnp.bfloat16)
        vh = v[:, h * hd:(h + 1) * hd].astype(jnp.bfloat16)
        s = jax.lax.dot_general(qh, kh, (((1,), (1,)), ((), ())),
                                preferred_element_type=jnp.float32) * scale
        if need_mask:
            s = jnp.where(key_mask, s, -1e30)
        m = jnp.max(s, axis=-1, keepdims=True)
        p = jnp.exp(s - m)
        p = p * pl.reciprocal(jnp.sum(p, axis=-1, keepdims=True), approx=True)
        head_outs.append(jnp.dot(p.astype(jnp.bfloat16), vh,
                                 preferred_element_type=jnp.float32))
    attn = jnp.concatenate(head_outs, axis=-1)          # (Np, D) f32

    # Output projection + residual.
    out = (jnp.dot(attn.astype(jnp.bfloat16), wo_ref[...],
                   preferred_element_type=jnp.float32)
           + bo_ref[...].astype(jnp.float32) + xf)
    o_ref[0] = out.astype(o_ref.dtype)


def attention_block(x, lp, *, heads, scale, n_valid):
    """x: (B, Np, D) bf16 -> (B, Np, D) bf16."""
    B, Np, D = x.shape
    kernel = functools.partial(_attn_block_kernel, heads=heads, scale=scale,
                               n_valid=n_valid)
    return pl.pallas_call(
        kernel,
        out_shape=jax.ShapeDtypeStruct((B, Np, D), jnp.bfloat16),
        grid_spec=pltpu.PrefetchScalarGridSpec(
            num_scalar_prefetch=0,
            grid=(B,),
            in_specs=[
                pl.BlockSpec((1, Np, D), lambda b: (b, 0, 0)),   # x
                pl.BlockSpec((1, D), lambda b: (0, 0)),          # ln1 gamma
                pl.BlockSpec((1, D), lambda b: (0, 0)),          # ln1 beta
                pl.BlockSpec((D, 3 * D), lambda b: (0, 0)),      # w_qkv (resident)
                pl.BlockSpec((D, D), lambda b: (0, 0)),          # w_o   (resident)
                pl.BlockSpec((1, D), lambda b: (0, 0)),          # b_o
            ],
            out_specs=pl.BlockSpec((1, Np, D), lambda b: (b, 0, 0)),
        ),
        compiler_params=pltpu.CompilerParams(
            dimension_semantics=("parallel",),
            vmem_limit_bytes=_VMEM_LIMIT,
        ),
    )(x, lp['ln1_g'], lp['ln1_b'], lp['w_qkv'], lp['w_o'], lp['b_o'])


# --------------------------------------------------------------------------
# Kernel 3: fused feed-forward residual block (per row tile)
#   out = x + W2 @ gelu( LayerNorm(x) @ W1 + b1 ) + b2
# --------------------------------------------------------------------------

def _ff_block_kernel(x_ref, g_ref, be_ref, w1_ref, b1_ref, w2_ref, b2_ref, o_ref):
    x = x_ref[...]                                      # (tm, D) bf16
    xf = x.astype(jnp.float32)
    xn = _layernorm_f32(xf, g_ref[...].astype(jnp.float32),
                        be_ref[...].astype(jnp.float32)).astype(jnp.bfloat16)
    h = (jnp.dot(xn, w1_ref[...], preferred_element_type=jnp.float32)
         + b1_ref[...].astype(jnp.float32))
    h = jax.nn.gelu(h, approximate=True)
    out = (jnp.dot(h.astype(jnp.bfloat16), w2_ref[...],
                   preferred_element_type=jnp.float32)
           + b2_ref[...].astype(jnp.float32) + xf)
    o_ref[...] = out.astype(o_ref.dtype)


def ff_block(x2d, lp):
    """x2d: (M, D) bf16 -> (M, D) bf16."""
    M, D = x2d.shape
    Dh = lp['w_ff1'].shape[1]
    tm = _pick_tile(M, (512, 256, 128, 64, 32, 16, 8))
    assert M % tm == 0
    return pl.pallas_call(
        _ff_block_kernel,
        out_shape=jax.ShapeDtypeStruct((M, D), jnp.bfloat16),
        grid_spec=pltpu.PrefetchScalarGridSpec(
            num_scalar_prefetch=0,
            grid=(M // tm,),
            in_specs=[
                pl.BlockSpec((tm, D), lambda i: (i, 0)),   # x
                pl.BlockSpec((1, D), lambda i: (0, 0)),    # ln2 gamma
                pl.BlockSpec((1, D), lambda i: (0, 0)),    # ln2 beta
                pl.BlockSpec((D, Dh), lambda i: (0, 0)),   # w_ff1 (resident)
                pl.BlockSpec((1, Dh), lambda i: (0, 0)),   # b_ff1
                pl.BlockSpec((Dh, D), lambda i: (0, 0)),   # w_ff2 (resident)
                pl.BlockSpec((1, D), lambda i: (0, 0)),    # b_ff2
            ],
            out_specs=pl.BlockSpec((tm, D), lambda i: (i, 0)),
        ),
        compiler_params=pltpu.CompilerParams(
            dimension_semantics=("parallel",),
            vmem_limit_bytes=_VMEM_LIMIT,
        ),
    )(x2d, lp['ln2_g'], lp['ln2_b'], lp['w_ff1'], lp['b_ff1'],
      lp['w_ff2'], lp['b_ff2'])


# --------------------------------------------------------------------------
# Parameters (pre-padded / pre-cast to bf16 once)
# --------------------------------------------------------------------------

def init_params(key, *, n_channels, dim, depth, heads, mlp_dim, n_classes):
    assert dim % heads == 0 and dim % 128 == 0
    mlp_pad = _ru(mlp_dim, 128)
    cin_pad = _ru(n_channels, 128)
    cls_pad = _ru(n_classes, 128)
    keys = iter(jax.random.split(key, 8 + 8 * depth))

    def nk():
        return next(keys)

    def rnd(shape, std):
        return jax.random.normal(nk(), shape, jnp.float32) * std

    # patch_to_embedding, padded on the input-channel axis (extra rows are zero)
    w_emb = jnp.zeros((cin_pad, dim), jnp.float32).at[:n_channels, :].set(
        rnd((n_channels, dim), n_channels ** -0.5))
    b_emb = 0.01 * rnd((1, dim), 1.0)

    def layer_params():
        p = {
            'ln1_g': jnp.ones((1, dim), jnp.float32),
            'ln1_b': jnp.zeros((1, dim), jnp.float32),
            'ln2_g': jnp.ones((1, dim), jnp.float32),
            'ln2_b': jnp.zeros((1, dim), jnp.float32),
            'w_qkv': rnd((dim, 3 * dim), dim ** -0.5).astype(jnp.bfloat16),
            'w_o': rnd((dim, dim), dim ** -0.5).astype(jnp.bfloat16),
            'b_o': 0.01 * rnd((1, dim), 1.0),
        }
        # FeedForward, hidden dim zero-padded to lane width
        # (gelu(0) == 0 and padded w_ff2 rows are zero, so padding is exact).
        w1 = jnp.zeros((dim, mlp_pad), jnp.float32).at[:, :mlp_dim].set(
            rnd((dim, mlp_dim), dim ** -0.5))
        b1 = jnp.zeros((1, mlp_pad), jnp.float32).at[:, :mlp_dim].set(
            0.01 * rnd((1, mlp_dim), 1.0))
        w2 = jnp.zeros((mlp_pad, dim), jnp.float32).at[:mlp_dim, :].set(
            rnd((mlp_dim, dim), mlp_dim ** -0.5))
        b2 = 0.01 * rnd((1, dim), 1.0)
        p['w_ff1'] = w1.astype(jnp.bfloat16)
        p['b_ff1'] = b1
        p['w_ff2'] = w2.astype(jnp.bfloat16)
        p['b_ff2'] = b2
        return p

    w_cls = jnp.zeros((dim, cls_pad), jnp.float32).at[:, :n_classes].set(
        rnd((dim, n_classes), dim ** -0.5))
    b_cls = jnp.zeros((1, cls_pad), jnp.float32).at[:, :n_classes].set(
        0.01 * rnd((1, n_classes), 1.0))

    return {
        'w_emb': w_emb.astype(jnp.bfloat16),
        'b_emb': b_emb,
        'c_token': jax.random.normal(nk(), (dim,), jnp.float32),
        'layers': [layer_params() for _ in range(depth)],
        'w_cls': w_cls.astype(jnp.bfloat16),
        'b_cls': b_cls,
    }


# --------------------------------------------------------------------------
# Forward pass
# --------------------------------------------------------------------------

def transformer_forward(params, x, *, heads, n_classes, backbone=True):
    """x: (B, n_channels, len_sw) f32 -> (None, feats) or (logits, feats)."""
    B, C, L = x.shape
    D = params['c_token'].shape[0]

    # x = x.permute(0, 2, 1): tokens = time steps, features = channels
    xt = jnp.transpose(x, (0, 2, 1))                      # (B, L, C)
    n_tok = L + 1                                         # class token + data tokens
    Np = _ru(n_tok, 8)                                    # sublane-aligned token count
    Cp = params['w_emb'].shape[0]

    # token slab: slot 0 reserved for the class token, padded slots stay zero
    tok = jnp.zeros((B, Np, Cp), jnp.float32).at[:, 1:1 + L, :C].set(xt)

    # patch_to_embedding (padded rows get only the bias; masked inside attention)
    emb = matmul_bias(tok.reshape(B * Np, Cp).astype(jnp.bfloat16),
                      params['w_emb'], params['b_emb'])
    xbnd = emb.reshape(B, Np, D).at[:, 0, :].set(
        params['c_token'].astype(jnp.bfloat16))           # (B, Np, D) bf16

    scale = float(D) ** -0.5          # reference Attention uses scale = dim ** -0.5

    for lp in params['layers']:
        # x = x + Attention(LayerNorm(x))   -- one fused kernel
        xbnd = attention_block(xbnd, lp, heads=heads, scale=scale, n_valid=n_tok)
        # x = x + FeedForward(LayerNorm(x)) -- one fused kernel
        xbnd = ff_block(xbnd.reshape(B * Np, D), lp).reshape(B, Np, D)

    feats = xbnd[:, 0, :].astype(jnp.float32)             # class token -> (B, D)

    if backbone:
        return None, feats

    Bp = _ru(B, 8)
    fpad = jnp.pad(feats, ((0, Bp - B), (0, 0))).astype(jnp.bfloat16)
    logits = matmul_bias(fpad, params['w_cls'], params['b_cls'],
                         out_dtype=jnp.float32)[:B, :n_classes]
    return logits, feats


if __name__ == "__main__":
    # Small HAR-style configuration: 9 channels, short window, dim=128, depth=4, heads=4.
    B, n_channels, len_sw, n_classes = 2, 9, 8, 6
    dim, depth, heads, mlp_dim = 128, 4, 4, 64

    key = jax.random.PRNGKey(0)
    kx, kp = jax.random.split(key)
    x = jax.random.normal(kx, (B, n_channels, len_sw), dtype=jnp.float32)
    params = init_params(kp, n_channels=n_channels, dim=dim, depth=depth,
                         heads=heads, mlp_dim=mlp_dim, n_classes=n_classes)

    fwd_backbone = jax.jit(functools.partial(
        transformer_forward, heads=heads, n_classes=n_classes, backbone=True))
    fwd_classify = jax.jit(functools.partial(
        transformer_forward, heads=heads, n_classes=n_classes, backbone=False))

    # backbone=True (module default): returns (None, feats)
    none_out, feats = fwd_backbone(params, x)
    feats = jax.block_until_ready(feats)
    assert none_out is None
    assert feats.shape == (B, dim), feats.shape
    assert bool(jnp.all(jnp.isfinite(feats)))

    # backbone=False: returns (logits, feats)
    logits, feats2 = fwd_classify(params, x)
    logits = jax.block_until_ready(logits)
    assert logits.shape == (B, n_classes), logits.shape
    assert bool(jnp.all(jnp.isfinite(logits)))

    print("KERNEL_OK")
</pallas_src>

<mosaic_0001>
module attributes {stable_mosaic.version = 11 : i64} {
  func.func @_matmul_bias_kernel(%arg0: i32, %arg1: i32, %arg2: i32, %arg3: memref<32x128xbf16, #tpu.memory_space<vmem>>, %arg4: memref<128x128xbf16, #tpu.memory_space<vmem>>, %arg5: memref<1x128xf32, #tpu.memory_space<vmem>>, %arg6: memref<32x128xbf16, #tpu.memory_space<vmem>>, %arg7: memref<32x128xf32, #tpu.memory_space<vmem>>) attributes {dimension_semantics = [#tpu.dimension_semantics<parallel>, #tpu.dimension_semantics<parallel>, #tpu.dimension_semantics<arbitrary>], iteration_bounds = array<i64: 1, 1, 1>, scalar_prefetch = 0 : i64, scratch_operands = 1 : i64, tpu.core_type = #tpu.core_type<tc>, window_params = [{transform_indices = @transform_0, window_bounds = array<i64: 32, 128>}, {transform_indices = @transform_1, window_bounds = array<i64: 128, 128>}, {transform_indices = @transform_2, window_bounds = array<i64: 1, 128>}, {transform_indices = @transform_3, window_bounds = array<i64: 32, 128>}]} {
    %c0_i32 = arith.constant 0 : i32
    %0 = arith.cmpi eq, %arg2, %c0_i32 : i32
    %1 = arith.extui %0 : i1 to i32
    %c0_i32_0 = arith.constant 0 : i32
    %2 = arith.cmpi ne, %1, %c0_i32_0 : i32
    scf.if %2 {
      %cst_10 = arith.constant 0.000000e+00 : f32
      %12 = vector.broadcast %cst_10 : f32 to vector<32x128xf32>
      %c0_11 = arith.constant 0 : index
      %c0_12 = arith.constant 0 : index
      %13 = vector.load %arg7[%c0_11, %c0_12] : memref<32x128xf32, #tpu.memory_space<vmem>>, vector<32x128xf32>
      tpu.vector_store %arg7[%c0_11, %c0_12], %12 {strides = array<i32>} : memref<32x128xf32, #tpu.memory_space<vmem>>, vector<32x128xf32>,
    } else {
    }
    %c0 = arith.constant 0 : index
    %c0_1 = arith.constant 0 : index
    %3 = vector.load %arg7[%c0, %c0_1] : memref<32x128xf32, #tpu.memory_space<vmem>>, vector<32x128xf32>
    %c0_2 = arith.constant 0 : index
    %c0_3 = arith.constant 0 : index
    %4 = vector.load %arg3[%c0_2, %c0_3] : memref<32x128xbf16, #tpu.memory_space<vmem>>, vector<32x128xbf16>
    %c0_4 = arith.constant 0 : index
    %c0_5 = arith.constant 0 : index
    %5 = vector.load %arg4[%c0_4, %c0_5] : memref<128x128xbf16, #tpu.memory_space<vmem>>, vector<128x128xbf16>
    %cst = arith.constant dense<0.000000e+00> : vector<32x128xf32>
    %6 = tpu.matmul %4, %5, %cst {dimension_numbers = #tpu.dot_dimension_numbers<[1], [0], [0], [1], [0, 0, 1, 1], [], []>} : vector<32x128xbf16>, vector<128x128xbf16>, vector<32x128xf32> -> vector<32x128xf32>
    %7 = arith.addf %3, %6 : vector<32x128xf32>
    %c0_6 = arith.constant 0 : index
    %c0_7 = arith.constant 0 : index
    %8 = vector.load %arg7[%c0_6, %c0_7] : memref<32x128xf32, #tpu.memory_space<vmem>>, vector<32x128xf32>
    tpu.vector_store %arg7[%c0_6, %c0_7], %7 {strides = array<i32>} : memref<32x128xf32, #tpu.memory_space<vmem>>, vector<32x128xf32>,
    %c0_i32_8 = arith.constant 0 : i32
    %9 = arith.cmpi eq, %arg2, %c0_i32_8 : i32
    %10 = arith.extui %9 : i1 to i32
    %c0_i32_9 = arith.constant 0 : i32
    %11 = arith.cmpi ne, %10, %c0_i32_9 : i32
    scf.if %11 {
      %c0_10 = arith.constant 0 : index
      %c0_11 = arith.constant 0 : index
      %12 = vector.load %arg7[%c0_10, %c0_11] : memref<32x128xf32, #tpu.memory_space<vmem>>, vector<32x128xf32>
      %c0_12 = arith.constant 0 : index
      %c0_13 = arith.constant 0 : index
      %13 = vector.load %arg5[%c0_12, %c0_13] : memref<1x128xf32, #tpu.memory_space<vmem>>, vector<1x128xf32>
      %14 = vector.broadcast %13 : vector<1x128xf32> to vector<32x128xf32>
      %15 = arith.addf %12, %14 : vector<32x128xf32>
      %16 = arith.truncf %15 : vector<32x128xf32> to vector<32x128xbf16>
      %c0_14 = arith.constant 0 : index
      %c0_15 = arith.constant 0 : index
      %17 = vector.load %arg6[%c0_14, %c0_15] : memref<32x128xbf16, #tpu.memory_space<vmem>>, vector<32x128xbf16>
      tpu.vector_store %arg6[%c0_14, %c0_15], %16 {strides = array<i32>} : memref<32x128xbf16, #tpu.memory_space<vmem>>, vector<32x128xbf16>,
    } else {
    }
    return
  }
  func.func @transform_0(%arg0: i32, %arg1: i32, %arg2: i32) -> (i32, i32) {
    %c0_i32 = arith.constant 0 : i32
    return %arg0, %arg2 : i32, i32
  }
  func.func @transform_1(%arg0: i32, %arg1: i32, %arg2: i32) -> (i32, i32) {
    %c0_i32 = arith.constant 0 : i32
    return %arg2, %arg1 : i32, i32
  }
  func.func @transform_2(%arg0: i32, %arg1: i32, %arg2: i32) -> (i32, i32) {
    %c0_i32 = arith.constant 0 : i32
    %c0_i32_0 = arith.constant 0 : i32
    return %c0_i32, %arg1 : i32, i32
  }
  func.func @transform_3(%arg0: i32, %arg1: i32, %arg2: i32) -> (i32, i32) {
    %c0_i32 = arith.constant 0 : i32
    return %arg0, %arg1 : i32, i32
  }
}

module attributes {stable_mosaic.version = 11 : i64} {
  func.func @_attn_block_kernel(%arg0: i32, %arg1: memref<1x16x128xbf16, #tpu.memory_space<vmem>>, %arg2: memref<1x128xf32, #tpu.memory_space<vmem>>, %arg3: memref<1x128xf32, #tpu.memory_space<vmem>>, %arg4: memref<128x384xbf16, #tpu.memory_space<vmem>>, %arg5: memref<128x128xbf16, #tpu.memory_space<vmem>>, %arg6: memref<1x128xf32, #tpu.memory_space<vmem>>, %arg7: memref<1x16x128xbf16, #tpu.memory_space<vmem>>) attributes {dimension_semantics = [#tpu.dimension_semantics<parallel>], iteration_bounds = array<i64: 2>, scalar_prefetch = 0 : i64, scratch_operands = 0 : i64, tpu.core_type = #tpu.core_type<tc>, window_params = [{transform_indices = @transform_0, window_bounds = array<i64: 1, 16, 128>}, {pipeline_mode = #tpu.pipeline_mode<synchronous>, transform_indices = @transform_1, window_bounds = array<i64: 1, 128>}, {pipeline_mode = #tpu.pipeline_mode<synchronous>, transform_indices = @transform_2, window_bounds = array<i64: 1, 128>}, {pipeline_mode = #tpu.pipeline_mode<synchronous>, transform_indices = @transform_3, window_bounds = array<i64: 128, 384>}, {pipeline_mode = #tpu.pipeline_mode<synchronous>, transform_indices = @transform_4, window_bounds = array<i64: 128, 128>}, {pipeline_mode = #tpu.pipeline_mode<synchronous>, transform_indices = @transform_5, window_bounds = array<i64: 1, 128>}, {transform_indices = @transform_6, window_bounds = array<i64: 1, 16, 128>}]} {
    %c0 = arith.constant 0 : index
    %c0_0 = arith.constant 0 : index
    %c0_1 = arith.constant 0 : index
    %0 = vector.load %arg1[%c0, %c0_0, %c0_1] : memref<1x16x128xbf16, #tpu.memory_space<vmem>>, vector<1x16x128xbf16>
    %1 = vector.shape_cast %0 : vector<1x16x128xbf16> to vector<16x128xbf16>
    %2 = arith.extf %1 : vector<16x128xbf16> to vector<16x128xf32>
    %c0_2 = arith.constant 0 : index
    %c0_3 = arith.constant 0 : index
    %3 = vector.load %arg2[%c0_2, %c0_3] : memref<1x128xf32, #tpu.memory_space<vmem>>, vector<1x128xf32>
    %c0_4 = arith.constant 0 : index
    %c0_5 = arith.constant 0 : index
    %4 = vector.load %arg3[%c0_4, %c0_5] : memref<1x128xf32, #tpu.memory_space<vmem>>, vector<1x128xf32>
    %cst = arith.constant dense<0.000000e+00> : vector<16xf32>
    %5 = vector.multi_reduction <add>, %2, %cst [1] : vector<16x128xf32> to vector<16xf32>
    %6 = vector.shape_cast %5 : vector<16xf32> to vector<16x1xf32>
    %cst_6 = arith.constant 1.280000e+02 : f32
    %7 = vector.broadcast %cst_6 : f32 to vector<16x1xf32>
    %8 = arith.divf %6, %7 : vector<16x1xf32>
    %9 = vector.broadcast %8 : vector<16x1xf32> to vector<16x128xf32>
    %10 = arith.subf %2, %9 : vector<16x128xf32>
    %11 = arith.mulf %10, %10 : vector<16x128xf32>
    %cst_7 = arith.constant dense<0.000000e+00> : vector<16xf32>
    %12 = vector.multi_reduction <add>, %11, %cst_7 [1] : vector<16x128xf32> to vector<16xf32>
    %13 = vector.shape_cast %12 : vector<16xf32> to vector<16x1xf32>
    %cst_8 = arith.constant 1.280000e+02 : f32
    %14 = vector.broadcast %cst_8 : f32 to vector<16x1xf32>
    %15 = arith.divf %13, %14 : vector<16x1xf32>
    %16 = vector.broadcast %8 : vector<16x1xf32> to vector<16x128xf32>
    %17 = arith.subf %2, %16 : vector<16x128xf32>
    %cst_9 = arith.constant 9.99999974E-6 : f32
    %18 = vector.broadcast %cst_9 : f32 to vector<16x1xf32>
    %19 = arith.addf %15, %18 : vector<16x1xf32>
    %20 = math.rsqrt %19 : vector<16x1xf32>
    %21 = vector.broadcast %20 : vector<16x1xf32> to vector<16x128xf32>
    %22 = arith.mulf %17, %21 : vector<16x128xf32>
    %23 = vector.broadcast %3 : vector<1x128xf32> to vector<16x128xf32>
    %24 = arith.mulf %22, %23 : vector<16x128xf32>
    %25 = vector.broadcast %4 : vector<1x128xf32> to vector<16x128xf32>
    %26 = arith.addf %24, %25 : vector<16x128xf32>
    %27 = arith.truncf %26 : vector<16x128xf32> to vector<16x128xbf16>
    %c0_10 = arith.constant 0 : index
    %c0_11 = arith.constant 0 : index
    %28 = vector.load %arg4[%c0_10, %c0_11] : memref<128x384xbf16, #tpu.memory_space<vmem>>, vector<128x384xbf16>
    %cst_12 = arith.constant dense<0.000000e+00> : vector<16x384xf32>
    %29 = tpu.matmul %27, %28, %cst_12 {dimension_numbers = #tpu.dot_dimension_numbers<[1], [0], [0], [1], [0, 0, 1, 1], [], []>} : vector<16x128xbf16>, vector<128x384xbf16>, vector<16x384xf32> -> vector<16x384xf32>
    %30 = vector.extract_strided_slice %29 {offsets = [0, 0], sizes = [16, 128], strides = [1, 1]} : vector<16x384xf32> to vector<16x128xf32>
    %31 = vector.extract_strided_slice %29 {offsets = [0, 128], sizes = [16, 128], strides = [1, 1]} : vector<16x384xf32> to vector<16x128xf32>
    %32 = vector.extract_strided_slice %29 {offsets = [0, 256], sizes = [16, 128], strides = [1, 1]} : vector<16x384xf32> to vector<16x128xf32>
    %33 = tpu.iota {dimensions = array<i32: 1>} : vector<16x16xi32>
    %c9_i32 = arith.constant 9 : i32
    %34 = vector.broadcast %c9_i32 : i32 to vector<16x16xi32>
    %35 = arith.cmpi slt, %33, %34 : vector<16x16xi32>
    %36 = vector.extract_strided_slice %30 {offsets = [0, 0], sizes = [16, 32], strides = [1, 1]} : vector<16x128xf32> to vector<16x32xf32>
    %37 = arith.truncf %36 : vector<16x32xf32> to vector<16x32xbf16>
    %38 = vector.extract_strided_slice %31 {offsets = [0, 0], sizes = [16, 32], strides = [1, 1]} : vector<16x128xf32> to vector<16x32xf32>
    %39 = arith.truncf %38 : vector<16x32xf32> to vector<16x32xbf16>
    %40 = vector.extract_strided_slice %32 {offsets = [0, 0], sizes = [16, 32], strides = [1, 1]} : vector<16x128xf32> to vector<16x32xf32>
    %41 = arith.truncf %40 : vector<16x32xf32> to vector<16x32xbf16>
    %cst_13 = arith.constant dense<0.000000e+00> : vector<16x16xf32>
    %42 = tpu.matmul %37, %39, %cst_13 {dimension_numbers = #tpu.dot_dimension_numbers<[1], [1], [0], [0], [0, 0, 1, 0], [], []>} : vector<16x32xbf16>, vector<16x32xbf16>, vector<16x16xf32> -> vector<16x16xf32>
    %cst_14 = arith.constant 0.0883883461 : f32
    %43 = vector.broadcast %cst_14 : f32 to vector<16x16xf32>
    %44 = arith.mulf %42, %43 : vector<16x16xf32>
    %cst_15 = arith.constant -1.000000e+30 : f32
    %45 = vector.broadcast %cst_15 : f32 to vector<16x16xf32>
    %46 = arith.select %35, %44, %45 : vector<16x16xi1>, vector<16x16xf32>
    %cst_16 = arith.constant dense<0xFF800000> : vector<16xf32>
    %47 = vector.multi_reduction <maximumf>, %46, %cst_16 [1] : vector<16x16xf32> to vector<16xf32>
    %48 = vector.shape_cast %47 : vector<16xf32> to vector<16x1xf32>
    %49 = vector.broadcast %48 : vector<16x1xf32> to vector<16x16xf32>
    %50 = arith.subf %46, %49 : vector<16x16xf32>
    %51 = math.exp %50 : vector<16x16xf32>
    %cst_17 = arith.constant dense<0.000000e+00> : vector<16xf32>
    %52 = vector.multi_reduction <add>, %51, %cst_17 [1] : vector<16x16xf32> to vector<16xf32>
    %53 = vector.shape_cast %52 : vector<16xf32> to vector<16x1xf32>
    %54 = tpu.reciprocal %53 {approx = true} : vector<16x1xf32> -> vector<16x1xf32>
    %55 = vector.broadcast %54 : vector<16x1xf32> to vector<16x16xf32>
    %56 = arith.mulf %51, %55 : vector<16x16xf32>
    %57 = arith.truncf %56 : vector<16x16xf32> to vector<16x16xbf16>
    %cst_18 = arith.constant dense<0.000000e+00> : vector<16x32xf32>
    %58 = tpu.matmul %57, %41, %cst_18 {dimension_numbers = #tpu.dot_dimension_numbers<[1], [0], [0], [1], [0, 0, 1, 1], [], []>} : vector<16x16xbf16>, vector<16x32xbf16>, vector<16x32xf32> -> vector<16x32xf32>
    %59 = vector.extract_strided_slice %30 {offsets = [0, 32], sizes = [16, 32], strides = [1, 1]} : vector<16x128xf32> to vector<16x32xf32>
    %60 = arith.truncf %59 : vector<16x32xf32> to vector<16x32xbf16>
    %61 = vector.extract_strided_slice %31 {offsets = [0, 32], sizes = [16, 32], strides = [1, 1]} : vector<16x128xf32> to vector<16x32xf32>
    %62 = arith.truncf %61 : vector<16x32xf32> to vector<16x32xbf16>
    %63 = vector.extract_strided_slice %32 {offsets = [0, 32], sizes = [16, 32], strides = [1, 1]} : vector<16x128xf32> to vector<16x32xf32>
    %64 = arith.truncf %63 : vector<16x32xf32> to vector<16x32xbf16>
    %cst_19 = arith.constant dense<0.000000e+00> : vector<16x16xf32>
    %65 = tpu.matmul %60, %62, %cst_19 {dimension_numbers = #tpu.dot_dimension_numbers<[1], [1], [0], [0], [0, 0, 1, 0], [], []>} : vector<16x32xbf16>, vector<16x32xbf16>, vector<16x16xf32> -> vector<16x16xf32>
    %cst_20 = arith.constant 0.0883883461 : f32
    %66 = vector.broadcast %cst_20 : f32 to vector<16x16xf32>
    %67 = arith.mulf %65, %66 : vector<16x16xf32>
    %cst_21 = arith.constant -1.000000e+30 : f32
    %68 = vector.broadcast %cst_21 : f32 to vector<16x16xf32>
    %69 = arith.select %35, %67, %68 : vector<16x16xi1>, vector<16x16xf32>
    %cst_22 = arith.constant dense<0xFF800000> : vector<16xf32>
    %70 = vector.multi_reduction <maximumf>, %69, %cst_22 [1] : vector<16x16xf32> to vector<16xf32>
    %71 = vector.shape_cast %70 : vector<16xf32> to vector<16x1xf32>
    %72 = vector.broadcast %71 : vector<16x1xf32> to vector<16x16xf32>
    %73 = arith.subf %69, %72 : vector<16x16xf32>
    %74 = math.exp %73 : vector<16x16xf32>
    %cst_23 = arith.constant dense<0.000000e+00> : vector<16xf32>
    %75 = vector.multi_reduction <add>, %74, %cst_23 [1] : vector<16x16xf32> to vector<16xf32>
    %76 = vector.shape_cast %75 : vector<16xf32> to vector<16x1xf32>
    %77 = tpu.reciprocal %76 {approx = true} : vector<16x1xf32> -> vector<16x1xf32>
    %78 = vector.broadcast %77 : vector<16x1xf32> to vector<16x16xf32>
    %79 = arith.mulf %74, %78 : vector<16x16xf32>
    %80 = arith.truncf %79 : vector<16x16xf32> to vector<16x16xbf16>
    %cst_24 = arith.constant dense<0.000000e+00> : vector<16x32xf32>
    %81 = tpu.matmul %80, %64, %cst_24 {dimension_numbers = #tpu.dot_dimension_numbers<[1], [0], [0], [1], [0, 0, 1, 1], [], []>} : vector<16x16xbf16>, vector<16x32xbf16>, vector<16x32xf32> -> vector<16x32xf32>
    %82 = vector.extract_strided_slice %30 {offsets = [0, 64], sizes = [16, 32], strides = [1, 1]} : vector<16x128xf32> to vector<16x32xf32>
    %83 = arith.truncf %82 : vector<16x32xf32> to vector<16x32xbf16>
    %84 = vector.extract_strided_slice %31 {offsets = [0, 64], sizes = [16, 32], strides = [1, 1]} : vector<16x128xf32> to vector<16x32xf32>
    %85 = arith.truncf %84 : vector<16x32xf32> to vector<16x32xbf16>
    %86 = vector.extract_strided_slice %32 {offsets = [0, 64], sizes = [16, 32], strides = [1, 1]} : vector<16x128xf32> to vector<16x32xf32>
    %87 = arith.truncf %86 : vector<16x32xf32> to vector<16x32xbf16>
    %cst_25 = arith.constant dense<0.000000e+00> : vector<16x16xf32>
    %88 = tpu.matmul %83, %85, %cst_25 {dimension_numbers = #tpu.dot_dimension_numbers<[1], [1], [0], [0], [0, 0, 1, 0], [], []>} : vector<16x32xbf16>, vector<16x32xbf16>, vector<16x16xf32> -> vector<16x16xf32>
    %cst_26 = arith.constant 0.0883883461 : f32
    %89 = vector.broadcast %cst_26 : f32 to vector<16x16xf32>
    %90 = arith.mulf %88, %89 : vector<16x16xf32>
    %cst_27 = arith.constant -1.000000e+30 : f32
    %91 = vector.broadcast %cst_27 : f32 to vector<16x16xf32>
    %92 = arith.select %35, %90, %91 : vector<16x16xi1>, vector<16x16xf32>
    %cst_28 = arith.constant dense<0xFF800000> : vector<16xf32>
    %93 = vector.multi_reduction <maximumf>, %92, %cst_28 [1] : vector<16x16xf32> to vector<16xf32>
    %94 = vector.shape_cast %93 : vector<16xf32> to vector<16x1xf32>
    %95 = vector.broadcast %94 : vector<16x1xf32> to vector<16x16xf32>
    %96 = arith.subf %92, %95 : vector<16x16xf32>
    %97 = math.exp %96 : vector<16x16xf32>
    %cst_29 = arith.constant dense<0.000000e+00> : vector<16xf32>
    %98 = vector.multi_reduction <add>, %97, %cst_29 [1] : vector<16x16xf32> to vector<16xf32>
    %99 = vector.shape_cast %98 : vector<16xf32> to vector<16x1xf32>
    %100 = tpu.reciprocal %99 {approx = true} : vector<16x1xf32> -> vector<16x1xf32>
    %101 = vector.broadcast %100 : vector<16x1xf32> to vector<16x16xf32>
    %102 = arith.mulf %97, %101 : vector<16x16xf32>
    %103 = arith.truncf %102 : vector<16x16xf32> to vector<16x16xbf16>
    %cst_30 = arith.constant dense<0.000000e+00> : vector<16x32xf32>
    %104 = tpu.matmul %103, %87, %cst_30 {dimension_numbers = #tpu.dot_dimension_numbers<[1], [0], [0], [1], [0, 0, 1, 1], [], []>} : vector<16x16xbf16>, vector<16x32xbf16>, vector<16x32xf32> -> vector<16x32xf32>
    %105 = vector.extract_strided_slice %30 {offsets = [0, 96], sizes = [16, 32], strides = [1, 1]} : vector<16x128xf32> to vector<16x32xf32>
    %106 = arith.truncf %105 : vector<16x32xf32> to vector<16x32xbf16>
    %107 = vector.extract_strided_slice %31 {offsets = [0, 96], sizes = [16, 32], strides = [1, 1]} : vector<16x128xf32> to vector<16x32xf32>
    %108 = arith.truncf %107 : vector<16x32xf32> to vector<16x32xbf16>
    %109 = vector.extract_strided_slice %32 {offsets = [0, 96], sizes = [16, 32], strides = [1, 1]} : vector<16x128xf32> to vector<16x32xf32>
    %110 = arith.truncf %109 : vector<16x32xf32> to vector<16x32xbf16>
    %cst_31 = arith.constant dense<0.000000e+00> : vector<16x16xf32>
    %111 = tpu.matmul %106, %108, %cst_31 {dimension_numbers = #tpu.dot_dimension_numbers<[1], [1], [0], [0], [0, 0, 1, 0], [], []>} : vector<16x32xbf16>, vector<16x32xbf16>, vector<16x16xf32> -> vector<16x16xf32>
    %cst_32 = arith.constant 0.0883883461 : f32
    %112 = vector.broadcast %cst_32 : f32 to vector<16x16xf32>
    %113 = arith.mulf %111, %112 : vector<16x16xf32>
    %cst_33 = arith.constant -1.000000e+30 : f32
    %114 = vector.broadcast %cst_33 : f32 to vector<16x16xf32>
    %115 = arith.select %35, %113, %114 : vector<16x16xi1>, vector<16x16xf32>
    %cst_34 = arith.constant dense<0xFF800000> : vector<16xf32>
    %116 = vector.multi_reduction <maximumf>, %115, %cst_34 [1] : vector<16x16xf32> to vector<16xf32>
    %117 = vector.shape_cast %116 : vector<16xf32> to vector<16x1xf32>
    %118 = vector.broadcast %117 : vector<16x1xf32> to vector<16x16xf32>
    %119 = arith.subf %115, %118 : vector<16x16xf32>
    %120 = math.exp %119 : vector<16x16xf32>
    %cst_35 = arith.constant dense<0.000000e+00> : vector<16xf32>
    %121 = vector.multi_reduction <add>, %120, %cst_35 [1] : vector<16x16xf32> to vector<16xf32>
    %122 = vector.shape_cast %121 : vector<16xf32> to vector<16x1xf32>
    %123 = tpu.reciprocal %122 {approx = true} : vector<16x1xf32> -> vector<16x1xf32>
    %124 = vector.broadcast %123 : vector<16x1xf32> to vector<16x16xf32>
    %125 = arith.mulf %120, %124 : vector<16x16xf32>
    %126 = arith.truncf %125 : vector<16x16xf32> to vector<16x16xbf16>
    %cst_36 = arith.constant dense<0.000000e+00> : vector<16x32xf32>
    %127 = tpu.matmul %126, %110, %cst_36 {dimension_numbers = #tpu.dot_dimension_numbers<[1], [0], [0], [1], [0, 0, 1, 1], [], []>} : vector<16x16xbf16>, vector<16x32xbf16>, vector<16x32xf32> -> vector<16x32xf32>
    %128 = tpu.concatenate %58, %81, %104, %127 in 1 : vector<16x32xf32>, vector<16x32xf32>, vector<16x32xf32>, vector<16x32xf32> -> vector<16x128xf32>
    %129 = arith.truncf %128 : vector<16x128xf32> to vector<16x128xbf16>
    %c0_37 = arith.constant 0 : index
    %c0_38 = arith.constant 0 : index
    %130 = vector.load %arg5[%c0_37, %c0_38] : memref<128x128xbf16, #tpu.memory_space<vmem>>, vector<128x128xbf16>
    %cst_39 = arith.constant dense<0.000000e+00> : vector<16x128xf32>
    %131 = tpu.matmul %129, %130, %cst_39 {dimension_numbers = #tpu.dot_dimension_numbers<[1], [0], [0], [1], [0, 0, 1, 1], [], []>} : vector<16x128xbf16>, vector<128x128xbf16>, vector<16x128xf32> -> vector<16x128xf32>
    %c0_40 = arith.constant 0 : index
    %c0_41 = arith.constant 0 : index
    %132 = vector.load %arg6[%c0_40, %c0_41] : memref<1x128xf32, #tpu.memory_space<vmem>>, vector<1x128xf32>
    %133 = vector.broadcast %132 : vector<1x128xf32> to vector<16x128xf32>
    %134 = arith.addf %131, %133 : vector<16x128xf32>
    %135 = arith.addf %134, %2 : vector<16x128xf32>
    %136 = arith.truncf %135 : vector<16x128xf32> to vector<16x128xbf16>
    %c0_42 = arith.constant 0 : index
    %c0_43 = arith.constant 0 : index
    %c0_44 = arith.constant 0 : index
    %137 = vector.load %arg7[%c0_42, %c0_43, %c0_44] : memref<1x16x128xbf16, #tpu.memory_space<vmem>>, vector<1x16x128xbf16>
    %138 = vector.shape_cast %137 : vector<1x16x128xbf16> to vector<16x128xbf16>
    %139 = vector.shape_cast %136 : vector<16x128xbf16> to vector<1x16x128xbf16>
    tpu.vector_store %arg7[%c0_42, %c0_43, %c0_44], %139 {strides = array<i32>} : memref<1x16x128xbf16, #tpu.memory_space<vmem>>, vector<1x16x128xbf16>,
    return
  }
  func.func @transform_0(%arg0: i32) -> (i32, i32, i32) {
    %c0_i32 = arith.constant 0 : i32
    %c0_i32_0 = arith.constant 0 : i32
    %c0_i32_1 = arith.constant 0 : i32
    return %arg0, %c0_i32, %c0_i32_0 : i32, i32, i32
  }
  func.func @transform_1(%arg0: i32) -> (i32, i32) {
    %c0_i32 = arith.constant 0 : i32
    %c0_i32_0 = arith.constant 0 : i32
    %c0_i32_1 = arith.constant 0 : i32
    return %c0_i32, %c0_i32_0 : i32, i32
  }
  func.func @transform_2(%arg0: i32) -> (i32, i32) {
    %c0_i32 = arith.constant 0 : i32
    %c0_i32_0 = arith.constant 0 : i32
    %c0_i32_1 = arith.constant 0 : i32
    return %c0_i32, %c0_i32_0 : i32, i32
  }
  func.func @transform_3(%arg0: i32) -> (i32, i32) {
    %c0_i32 = arith.constant 0 : i32
    %c0_i32_0 = arith.constant 0 : i32
    %c0_i32_1 = arith.constant 0 : i32
    return %c0_i32, %c0_i32_0 : i32, i32
  }
  func.func @transform_4(%arg0: i32) -> (i32, i32) {
    %c0_i32 = arith.constant 0 : i32
    %c0_i32_0 = arith.constant 0 : i32
    %c0_i32_1 = arith.constant 0 : i32
    return %c0_i32, %c0_i32_0 : i32, i32
  }
  func.func @transform_5(%arg0: i32) -> (i32, i32) {
    %c0_i32 = arith.constant 0 : i32
    %c0_i32_0 = arith.constant 0 : i32
    %c0_i32_1 = arith.constant 0 : i32
    return %c0_i32, %c0_i32_0 : i32, i32
  }
  func.func @transform_6(%arg0: i32) -> (i32, i32, i32) {
    %c0_i32 = arith.constant 0 : i32
    %c0_i32_0 = arith.constant 0 : i32
    %c0_i32_1 = arith.constant 0 : i32
    return %arg0, %c0_i32, %c0_i32_0 : i32, i32, i32
  }
}

module attributes {stable_mosaic.version = 11 : i64} {
  func.func @_ff_block_kernel(%arg0: i32, %arg1: memref<32x128xbf16, #tpu.memory_space<vmem>>, %arg2: memref<1x128xf32, #tpu.memory_space<vmem>>, %arg3: memref<1x128xf32, #tpu.memory_space<vmem>>, %arg4: memref<128x128xbf16, #tpu.memory_space<vmem>>, %arg5: memref<1x128xf32, #tpu.memory_space<vmem>>, %arg6: memref<128x128xbf16, #tpu.memory_space<vmem>>, %arg7: memref<1x128xf32, #tpu.memory_space<vmem>>, %arg8: memref<32x128xbf16, #tpu.memory_space<vmem>>) attributes {dimension_semantics = [#tpu.dimension_semantics<parallel>], iteration_bounds = array<i64: 1>, scalar_prefetch = 0 : i64, scratch_operands = 0 : i64, tpu.core_type = #tpu.core_type<tc>, window_params = [{transform_indices = @transform_0, window_bounds = array<i64: 32, 128>}, {pipeline_mode = #tpu.pipeline_mode<synchronous>, transform_indices = @transform_1, window_bounds = array<i64: 1, 128>}, {pipeline_mode = #tpu.pipeline_mode<synchronous>, transform_indices = @transform_2, window_bounds = array<i64: 1, 128>}, {pipeline_mode = #tpu.pipeline_mode<synchronous>, transform_indices = @transform_3, window_bounds = array<i64: 128, 128>}, {pipeline_mode = #tpu.pipeline_mode<synchronous>, transform_indices = @transform_4, window_bounds = array<i64: 1, 128>}, {pipeline_mode = #tpu.pipeline_mode<synchronous>, transform_indices = @transform_5, window_bounds = array<i64: 128, 128>}, {pipeline_mode = #tpu.pipeline_mode<synchronous>, transform_indices = @transform_6, window_bounds = array<i64: 1, 128>}, {transform_indices = @transform_7, window_bounds = array<i64: 32, 128>}]} {
    %c0 = arith.constant 0 : index
    %c0_0 = arith.constant 0 : index
    %0 = vector.load %arg1[%c0, %c0_0] : memref<32x128xbf16, #tpu.memory_space<vmem>>, vector<32x128xbf16>
    %1 = arith.extf %0 : vector<32x128xbf16> to vector<32x128xf32>
    %c0_1 = arith.constant 0 : index
    %c0_2 = arith.constant 0 : index
    %2 = vector.load %arg2[%c0_1, %c0_2] : memref<1x128xf32, #tpu.memory_space<vmem>>, vector<1x128xf32>
    %c0_3 = arith.constant 0 : index
    %c0_4 = arith.constant 0 : index
    %3 = vector.load %arg3[%c0_3, %c0_4] : memref<1x128xf32, #tpu.memory_space<vmem>>, vector<1x128xf32>
    %cst = arith.constant dense<0.000000e+00> : vector<32xf32>
    %4 = vector.multi_reduction <add>, %1, %cst [1] : vector<32x128xf32> to vector<32xf32>
    %5 = vector.shape_cast %4 : vector<32xf32> to vector<32x1xf32>
    %cst_5 = arith.constant 1.280000e+02 : f32
    %6 = vector.broadcast %cst_5 : f32 to vector<32x1xf32>
    %7 = arith.divf %5, %6 : vector<32x1xf32>
    %8 = vector.broadcast %7 : vector<32x1xf32> to vector<32x128xf32>
    %9 = arith.subf %1, %8 : vector<32x128xf32>
    %10 = arith.mulf %9, %9 : vector<32x128xf32>
    %cst_6 = arith.constant dense<0.000000e+00> : vector<32xf32>
    %11 = vector.multi_reduction <add>, %10, %cst_6 [1] : vector<32x128xf32> to vector<32xf32>
    %12 = vector.shape_cast %11 : vector<32xf32> to vector<32x1xf32>
    %cst_7 = arith.constant 1.280000e+02 : f32
    %13 = vector.broadcast %cst_7 : f32 to vector<32x1xf32>
    %14 = arith.divf %12, %13 : vector<32x1xf32>
    %15 = vector.broadcast %7 : vector<32x1xf32> to vector<32x128xf32>
    %16 = arith.subf %1, %15 : vector<32x128xf32>
    %cst_8 = arith.constant 9.99999974E-6 : f32
    %17 = vector.broadcast %cst_8 : f32 to vector<32x1xf32>
    %18 = arith.addf %14, %17 : vector<32x1xf32>
    %19 = math.rsqrt %18 : vector<32x1xf32>
    %20 = vector.broadcast %19 : vector<32x1xf32> to vector<32x128xf32>
    %21 = arith.mulf %16, %20 : vector<32x128xf32>
    %22 = vector.broadcast %2 : vector<1x128xf32> to vector<32x128xf32>
    %23 = arith.mulf %21, %22 : vector<32x128xf32>
    %24 = vector.broadcast %3 : vector<1x128xf32> to vector<32x128xf32>
    %25 = arith.addf %23, %24 : vector<32x128xf32>
    %26 = arith.truncf %25 : vector<32x128xf32> to vector<32x128xbf16>
    %c0_9 = arith.constant 0 : index
    %c0_10 = arith.constant 0 : index
    %27 = vector.load %arg4[%c0_9, %c0_10] : memref<128x128xbf16, #tpu.memory_space<vmem>>, vector<128x128xbf16>
    %cst_11 = arith.constant dense<0.000000e+00> : vector<32x128xf32>
    %28 = tpu.matmul %26, %27, %cst_11 {dimension_numbers = #tpu.dot_dimension_numbers<[1], [0], [0], [1], [0, 0, 1, 1], [], []>} : vector<32x128xbf16>, vector<128x128xbf16>, vector<32x128xf32> -> vector<32x128xf32>
    %c0_12 = arith.constant 0 : index
    %c0_13 = arith.constant 0 : index
    %29 = vector.load %arg5[%c0_12, %c0_13] : memref<1x128xf32, #tpu.memory_space<vmem>>, vector<1x128xf32>
    %30 = vector.broadcast %29 : vector<1x128xf32> to vector<32x128xf32>
    %31 = arith.addf %28, %30 : vector<32x128xf32>
    %32 = arith.mulf %31, %31 : vector<32x128xf32>
    %33 = arith.mulf %31, %32 : vector<32x128xf32>
    %cst_14 = arith.constant 4.471500e-02 : f32
    %34 = vector.broadcast %cst_14 : f32 to vector<32x128xf32>
    %35 = arith.mulf %34, %33 : vector<32x128xf32>
    %36 = arith.addf %31, %35 : vector<32x128xf32>
    %cst_15 = arith.constant 0.797884583 : f32
    %37 = vector.broadcast %cst_15 : f32 to vector<32x128xf32>
    %38 = arith.mulf %37, %36 : vector<32x128xf32>
    %39 = math.tanh %38 : vector<32x128xf32>
    %cst_16 = arith.constant 1.000000e+00 : f32
    %40 = vector.broadcast %cst_16 : f32 to vector<32x128xf32>
    %41 = arith.addf %40, %39 : vector<32x128xf32>
    %cst_17 = arith.constant 5.000000e-01 : f32
    %42 = vector.broadcast %cst_17 : f32 to vector<32x128xf32>
    %43 = arith.mulf %42, %41 : vector<32x128xf32>
    %44 = arith.mulf %31, %43 : vector<32x128xf32>
    %45 = arith.truncf %44 : vector<32x128xf32> to vector<32x128xbf16>
    %c0_18 = arith.constant 0 : index
    %c0_19 = arith.constant 0 : index
    %46 = vector.load %arg6[%c0_18, %c0_19] : memref<128x128xbf16, #tpu.memory_space<vmem>>, vector<128x128xbf16>
    %cst_20 = arith.constant dense<0.000000e+00> : vector<32x128xf32>
    %47 = tpu.matmul %45, %46, %cst_20 {dimension_numbers = #tpu.dot_dimension_numbers<[1], [0], [0], [1], [0, 0, 1, 1], [], []>} : vector<32x128xbf16>, vector<128x128xbf16>, vector<32x128xf32> -> vector<32x128xf32>
    %c0_21 = arith.constant 0 : index
    %c0_22 = arith.constant 0 : index
    %48 = vector.load %arg7[%c0_21, %c0_22] : memref<1x128xf32, #tpu.memory_space<vmem>>, vector<1x128xf32>
    %49 = vector.broadcast %48 : vector<1x128xf32> to vector<32x128xf32>
    %50 = arith.addf %47, %49 : vector<32x128xf32>
    %51 = arith.addf %50, %1 : vector<32x128xf32>
    %52 = arith.truncf %51 : vector<32x128xf32> to vector<32x128xbf16>
    %c0_23 = arith.constant 0 : index
    %c0_24 = arith.constant 0 : index
    %53 = vector.load %arg8[%c0_23, %c0_24] : memref<32x128xbf16, #tpu.memory_space<vmem>>, vector<32x128xbf16>
    tpu.vector_store %arg8[%c0_23, %c0_24], %52 {strides = array<i32>} : memref<32x128xbf16, #tpu.memory_space<vmem>>, vector<32x128xbf16>,
    return
  }
  func.func @transform_0(%arg0: i32) -> (i32, i32) {
    %c0_i32 = arith.constant 0 : i32
    %c0_i32_0 = arith.constant 0 : i32
    return %arg0, %c0_i32 : i32, i32
  }
  func.func @transform_1(%arg0: i32) -> (i32, i32) {
    %c0_i32 = arith.constant 0 : i32
    %c0_i32_0 = arith.constant 0 : i32
    %c0_i32_1 = arith.constant 0 : i32
    return %c0_i32, %c0_i32_0 : i32, i32
  }
  func.func @transform_2(%arg0: i32) -> (i32, i32) {
    %c0_i32 = arith.constant 0 : i32
    %c0_i32_0 = arith.constant 0 : i32
    %c0_i32_1 = arith.constant 0 : i32
    return %c0_i32, %c0_i32_0 : i32, i32
  }
  func.func @transform_3(%arg0: i32) -> (i32, i32) {
    %c0_i32 = arith.constant 0 : i32
    %c0_i32_0 = arith.constant 0 : i32
    %c0_i32_1 = arith.constant 0 : i32
    return %c0_i32, %c0_i32_0 : i32, i32
  }
  func.func @transform_4(%arg0: i32) -> (i32, i32) {
    %c0_i32 = arith.constant 0 : i32
    %c0_i32_0 = arith.constant 0 : i32
    %c0_i32_1 = arith.constant 0 : i32
    return %c0_i32, %c0_i32_0 : i32, i32
  }
  func.func @transform_5(%arg0: i32) -> (i32, i32) {
    %c0_i32 = arith.constant 0 : i32
    %c0_i32_0 = arith.constant 0 : i32
    %c0_i32_1 = arith.constant 0 : i32
    return %c0_i32, %c0_i32_0 : i32, i32
  }
  func.func @transform_6(%arg0: i32) -> (i32, i32) {
    %c0_i32 = arith.constant 0 : i32
    %c0_i32_0 = arith.constant 0 : i32
    %c0_i32_1 = arith.constant 0 : i32
    return %c0_i32, %c0_i32_0 : i32, i32
  }
  func.func @transform_7(%arg0: i32) -> (i32, i32) {
    %c0_i32 = arith.constant 0 : i32
    %c0_i32_0 = arith.constant 0 : i32
    return %arg0, %c0_i32 : i32, i32
  }
}

module attributes {stable_mosaic.version = 11 : i64} {
  func.func @_attn_block_kernel(%arg0: i32, %arg1: memref<1x16x128xbf16, #tpu.memory_space<vmem>>, %arg2: memref<1x128xf32, #tpu.memory_space<vmem>>, %arg3: memref<1x128xf32, #tpu.memory_space<vmem>>, %arg4: memref<128x384xbf16, #tpu.memory_space<vmem>>, %arg5: memref<128x128xbf16, #tpu.memory_space<vmem>>, %arg6: memref<1x128xf32, #tpu.memory_space<vmem>>, %arg7: memref<1x16x128xbf16, #tpu.memory_space<vmem>>) attributes {dimension_semantics = [#tpu.dimension_semantics<parallel>], iteration_bounds = array<i64: 2>, scalar_prefetch = 0 : i64, scratch_operands = 0 : i64, tpu.core_type = #tpu.core_type<tc>, window_params = [{transform_indices = @transform_0, window_bounds = array<i64: 1, 16, 128>}, {pipeline_mode = #tpu.pipeline_mode<synchronous>, transform_indices = @transform_1, window_bounds = array<i64: 1, 128>}, {pipeline_mode = #tpu.pipeline_mode<synchronous>, transform_indices = @transform_2, window_bounds = array<i64: 1, 128>}, {pipeline_mode = #tpu.pipeline_mode<synchronous>, transform_indices = @transform_3, window_bounds = array<i64: 128, 384>}, {pipeline_mode = #tpu.pipeline_mode<synchronous>, transform_indices = @transform_4, window_bounds = array<i64: 128, 128>}, {pipeline_mode = #tpu.pipeline_mode<synchronous>, transform_indices = @transform_5, window_bounds = array<i64: 1, 128>}, {transform_indices = @transform_6, window_bounds = array<i64: 1, 16, 128>}]} {
    %c0 = arith.constant 0 : index
    %c0_0 = arith.constant 0 : index
    %c0_1 = arith.constant 0 : index
    %0 = vector.load %arg1[%c0, %c0_0, %c0_1] : memref<1x16x128xbf16, #tpu.memory_space<vmem>>, vector<1x16x128xbf16>
    %1 = vector.shape_cast %0 : vector<1x16x128xbf16> to vector<16x128xbf16>
    %2 = arith.extf %1 : vector<16x128xbf16> to vector<16x128xf32>
    %c0_2 = arith.constant 0 : index
    %c0_3 = arith.constant 0 : index
    %3 = vector.load %arg2[%c0_2, %c0_3] : memref<1x128xf32, #tpu.memory_space<vmem>>, vector<1x128xf32>
    %c0_4 = arith.constant 0 : index
    %c0_5 = arith.constant 0 : index
    %4 = vector.load %arg3[%c0_4, %c0_5] : memref<1x128xf32, #tpu.memory_space<vmem>>, vector<1x128xf32>
    %cst = arith.constant dense<0.000000e+00> : vector<16xf32>
    %5 = vector.multi_reduction <add>, %2, %cst [1] : vector<16x128xf32> to vector<16xf32>
    %6 = vector.shape_cast %5 : vector<16xf32> to vector<16x1xf32>
    %cst_6 = arith.constant 1.280000e+02 : f32
    %7 = vector.broadcast %cst_6 : f32 to vector<16x1xf32>
    %8 = arith.divf %6, %7 : vector<16x1xf32>
    %9 = vector.broadcast %8 : vector<16x1xf32> to vector<16x128xf32>
    %10 = arith.subf %2, %9 : vector<16x128xf32>
    %11 = arith.mulf %10, %10 : vector<16x128xf32>
    %cst_7 = arith.constant dense<0.000000e+00> : vector<16xf32>
    %12 = vector.multi_reduction <add>, %11, %cst_7 [1] : vector<16x128xf32> to vector<16xf32>
    %13 = vector.shape_cast %12 : vector<16xf32> to vector<16x1xf32>
    %cst_8 = arith.constant 1.280000e+02 : f32
    %14 = vector.broadcast %cst_8 : f32 to vector<16x1xf32>
    %15 = arith.divf %13, %14 : vector<16x1xf32>
    %16 = vector.broadcast %8 : vector<16x1xf32> to vector<16x128xf32>
    %17 = arith.subf %2, %16 : vector<16x128xf32>
    %cst_9 = arith.constant 9.99999974E-6 : f32
    %18 = vector.broadcast %cst_9 : f32 to vector<16x1xf32>
    %19 = arith.addf %15, %18 : vector<16x1xf32>
    %20 = math.rsqrt %19 : vector<16x1xf32>
    %21 = vector.broadcast %20 : vector<16x1xf32> to vector<16x128xf32>
    %22 = arith.mulf %17, %21 : vector<16x128xf32>
    %23 = vector.broadcast %3 : vector<1x128xf32> to vector<16x128xf32>
    %24 = arith.mulf %22, %23 : vector<16x128xf32>
    %25 = vector.broadcast %4 : vector<1x128xf32> to vector<16x128xf32>
    %26 = arith.addf %24, %25 : vector<16x128xf32>
    %27 = arith.truncf %26 : vector<16x128xf32> to vector<16x128xbf16>
    %c0_10 = arith.constant 0 : index
    %c0_11 = arith.constant 0 : index
    %28 = vector.load %arg4[%c0_10, %c0_11] : memref<128x384xbf16, #tpu.memory_space<vmem>>, vector<128x384xbf16>
    %cst_12 = arith.constant dense<0.000000e+00> : vector<16x384xf32>
    %29 = tpu.matmul %27, %28, %cst_12 {dimension_numbers = #tpu.dot_dimension_numbers<[1], [0], [0], [1], [0, 0, 1, 1], [], []>} : vector<16x128xbf16>, vector<128x384xbf16>, vector<16x384xf32> -> vector<16x384xf32>
    %30 = vector.extract_strided_slice %29 {offsets = [0, 0], sizes = [16, 128], strides = [1, 1]} : vector<16x384xf32> to vector<16x128xf32>
    %31 = vector.extract_strided_slice %29 {offsets = [0, 128], sizes = [16, 128], strides = [1, 1]} : vector<16x384xf32> to vector<16x128xf32>
    %32 = vector.extract_strided_slice %29 {offsets = [0, 256], sizes = [16, 128], strides = [1, 1]} : vector<16x384xf32> to vector<16x128xf32>
    %33 = tpu.iota {dimensions = array<i32: 1>} : vector<16x16xi32>
    %c9_i32 = arith.constant 9 : i32
    %34 = vector.broadcast %c9_i32 : i32 to vector<16x16xi32>
    %35 = arith.cmpi slt, %33, %34 : vector<16x16xi32>
    %36 = vector.extract_strided_slice %30 {offsets = [0, 0], sizes = [16, 32], strides = [1, 1]} : vector<16x128xf32> to vector<16x32xf32>
    %37 = arith.truncf %36 : vector<16x32xf32> to vector<16x32xbf16>
    %38 = vector.extract_strided_slice %31 {offsets = [0, 0], sizes = [16, 32], strides = [1, 1]} : vector<16x128xf32> to vector<16x32xf32>
    %39 = arith.truncf %38 : vector<16x32xf32> to vector<16x32xbf16>
    %40 = vector.extract_strided_slice %32 {offsets = [0, 0], sizes = [16, 32], strides = [1, 1]} : vector<16x128xf32> to vector<16x32xf32>
    %41 = arith.truncf %40 : vector<16x32xf32> to vector<16x32xbf16>
    %cst_13 = arith.constant dense<0.000000e+00> : vector<16x16xf32>
    %42 = tpu.matmul %37, %39, %cst_13 {dimension_numbers = #tpu.dot_dimension_numbers<[1], [1], [0], [0], [0, 0, 1, 0], [], []>} : vector<16x32xbf16>, vector<16x32xbf16>, vector<16x16xf32> -> vector<16x16xf32>
    %cst_14 = arith.constant 0.0883883461 : f32
    %43 = vector.broadcast %cst_14 : f32 to vector<16x16xf32>
    %44 = arith.mulf %42, %43 : vector<16x16xf32>
    %cst_15 = arith.constant -1.000000e+30 : f32
    %45 = vector.broadcast %cst_15 : f32 to vector<16x16xf32>
    %46 = arith.select %35, %44, %45 : vector<16x16xi1>, vector<16x16xf32>
    %cst_16 = arith.constant dense<0xFF800000> : vector<16xf32>
    %47 = vector.multi_reduction <maximumf>, %46, %cst_16 [1] : vector<16x16xf32> to vector<16xf32>
    %48 = vector.shape_cast %47 : vector<16xf32> to vector<16x1xf32>
    %49 = vector.broadcast %48 : vector<16x1xf32> to vector<16x16xf32>
    %50 = arith.subf %46, %49 : vector<16x16xf32>
    %51 = math.exp %50 : vector<16x16xf32>
    %cst_17 = arith.constant dense<0.000000e+00> : vector<16xf32>
    %52 = vector.multi_reduction <add>, %51, %cst_17 [1] : vector<16x16xf32> to vector<16xf32>
    %53 = vector.shape_cast %52 : vector<16xf32> to vector<16x1xf32>
    %54 = tpu.reciprocal %53 {approx = true} : vector<16x1xf32> -> vector<16x1xf32>
    %55 = vector.broadcast %54 : vector<16x1xf32> to vector<16x16xf32>
    %56 = arith.mulf %51, %55 : vector<16x16xf32>
    %57 = arith.truncf %56 : vector<16x16xf32> to vector<16x16xbf16>
    %cst_18 = arith.constant dense<0.000000e+00> : vector<16x32xf32>
    %58 = tpu.matmul %57, %41, %cst_18 {dimension_numbers = #tpu.dot_dimension_numbers<[1], [0], [0], [1], [0, 0, 1, 1], [], []>} : vector<16x16xbf16>, vector<16x32xbf16>, vector<16x32xf32> -> vector<16x32xf32>
    %59 = vector.extract_strided_slice %30 {offsets = [0, 32], sizes = [16, 32], strides = [1, 1]} : vector<16x128xf32> to vector<16x32xf32>
    %60 = arith.truncf %59 : vector<16x32xf32> to vector<16x32xbf16>
    %61 = vector.extract_strided_slice %31 {offsets = [0, 32], sizes = [16, 32], strides = [1, 1]} : vector<16x128xf32> to vector<16x32xf32>
    %62 = arith.truncf %61 : vector<16x32xf32> to vector<16x32xbf16>
    %63 = vector.extract_strided_slice %32 {offsets = [0, 32], sizes = [16, 32], strides = [1, 1]} : vector<16x128xf32> to vector<16x32xf32>
    %64 = arith.truncf %63 : vector<16x32xf32> to vector<16x32xbf16>
    %cst_19 = arith.constant dense<0.000000e+00> : vector<16x16xf32>
    %65 = tpu.matmul %60, %62, %cst_19 {dimension_numbers = #tpu.dot_dimension_numbers<[1], [1], [0], [0], [0, 0, 1, 0], [], []>} : vector<16x32xbf16>, vector<16x32xbf16>, vector<16x16xf32> -> vector<16x16xf32>
    %cst_20 = arith.constant 0.0883883461 : f32
    %66 = vector.broadcast %cst_20 : f32 to vector<16x16xf32>
    %67 = arith.mulf %65, %66 : vector<16x16xf32>
    %cst_21 = arith.constant -1.000000e+30 : f32
    %68 = vector.broadcast %cst_21 : f32 to vector<16x16xf32>
    %69 = arith.select %35, %67, %68 : vector<16x16xi1>, vector<16x16xf32>
    %cst_22 = arith.constant dense<0xFF800000> : vector<16xf32>
    %70 = vector.multi_reduction <maximumf>, %69, %cst_22 [1] : vector<16x16xf32> to vector<16xf32>
    %71 = vector.shape_cast %70 : vector<16xf32> to vector<16x1xf32>
    %72 = vector.broadcast %71 : vector<16x1xf32> to vector<16x16xf32>
    %73 = arith.subf %69, %72 : vector<16x16xf32>
    %74 = math.exp %73 : vector<16x16xf32>
    %cst_23 = arith.constant dense<0.000000e+00> : vector<16xf32>
    %75 = vector.multi_reduction <add>, %74, %cst_23 [1] : vector<16x16xf32> to vector<16xf32>
    %76 = vector.shape_cast %75 : vector<16xf32> to vector<16x1xf32>
    %77 = tpu.reciprocal %76 {approx = true} : vector<16x1xf32> -> vector<16x1xf32>
    %78 = vector.broadcast %77 : vector<16x1xf32> to vector<16x16xf32>
    %79 = arith.mulf %74, %78 : vector<16x16xf32>
    %80 = arith.truncf %79 : vector<16x16xf32> to vector<16x16xbf16>
    %cst_24 = arith.constant dense<0.000000e+00> : vector<16x32xf32>
    %81 = tpu.matmul %80, %64, %cst_24 {dimension_numbers = #tpu.dot_dimension_numbers<[1], [0], [0], [1], [0, 0, 1, 1], [], []>} : vector<16x16xbf16>, vector<16x32xbf16>, vector<16x32xf32> -> vector<16x32xf32>
    %82 = vector.extract_strided_slice %30 {offsets = [0, 64], sizes = [16, 32], strides = [1, 1]} : vector<16x128xf32> to vector<16x32xf32>
    %83 = arith.truncf %82 : vector<16x32xf32> to vector<16x32xbf16>
    %84 = vector.extract_strided_slice %31 {offsets = [0, 64], sizes = [16, 32], strides = [1, 1]} : vector<16x128xf32> to vector<16x32xf32>
    %85 = arith.truncf %84 : vector<16x32xf32> to vector<16x32xbf16>
    %86 = vector.extract_strided_slice %32 {offsets = [0, 64], sizes = [16, 32], strides = [1, 1]} : vector<16x128xf32> to vector<16x32xf32>
    %87 = arith.truncf %86 : vector<16x32xf32> to vector<16x32xbf16>
    %cst_25 = arith.constant dense<0.000000e+00> : vector<16x16xf32>
    %88 = tpu.matmul %83, %85, %cst_25 {dimension_numbers = #tpu.dot_dimension_numbers<[1], [1], [0], [0], [0, 0, 1, 0], [], []>} : vector<16x32xbf16>, vector<16x32xbf16>, vector<16x16xf32> -> vector<16x16xf32>
    %cst_26 = arith.constant 0.0883883461 : f32
    %89 = vector.broadcast %cst_26 : f32 to vector<16x16xf32>
    %90 = arith.mulf %88, %89 : vector<16x16xf32>
    %cst_27 = arith.constant -1.000000e+30 : f32
    %91 = vector.broadcast %cst_27 : f32 to vector<16x16xf32>
    %92 = arith.select %35, %90, %91 : vector<16x16xi1>, vector<16x16xf32>
    %cst_28 = arith.constant dense<0xFF800000> : vector<16xf32>
    %93 = vector.multi_reduction <maximumf>, %92, %cst_28 [1] : vector<16x16xf32> to vector<16xf32>
    %94 = vector.shape_cast %93 : vector<16xf32> to vector<16x1xf32>
    %95 = vector.broadcast %94 : vector<16x1xf32> to vector<16x16xf32>
    %96 = arith.subf %92, %95 : vector<16x16xf32>
    %97 = math.exp %96 : vector<16x16xf32>
    %cst_29 = arith.constant dense<0.000000e+00> : vector<16xf32>
    %98 = vector.multi_reduction <add>, %97, %cst_29 [1] : vector<16x16xf32> to vector<16xf32>
    %99 = vector.shape_cast %98 : vector<16xf32> to vector<16x1xf32>
    %100 = tpu.reciprocal %99 {approx = true} : vector<16x1xf32> -> vector<16x1xf32>
    %101 = vector.broadcast %100 : vector<16x1xf32> to vector<16x16xf32>
    %102 = arith.mulf %97, %101 : vector<16x16xf32>
    %103 = arith.truncf %102 : vector<16x16xf32> to vector<16x16xbf16>
    %cst_30 = arith.constant dense<0.000000e+00> : vector<16x32xf32>
    %104 = tpu.matmul %103, %87, %cst_30 {dimension_numbers = #tpu.dot_dimension_numbers<[1], [0], [0], [1], [0, 0, 1, 1], [], []>} : vector<16x16xbf16>, vector<16x32xbf16>, vector<16x32xf32> -> vector<16x32xf32>
    %105 = vector.extract_strided_slice %30 {offsets = [0, 96], sizes = [16, 32], strides = [1, 1]} : vector<16x128xf32> to vector<16x32xf32>
    %106 = arith.truncf %105 : vector<16x32xf32> to vector<16x32xbf16>
    %107 = vector.extract_strided_slice %31 {offsets = [0, 96], sizes = [16, 32], strides = [1, 1]} : vector<16x128xf32> to vector<16x32xf32>
    %108 = arith.truncf %107 : vector<16x32xf32> to vector<16x32xbf16>
    %109 = vector.extract_strided_slice %32 {offsets = [0, 96], sizes = [16, 32], strides = [1, 1]} : vector<16x128xf32> to vector<16x32xf32>
    %110 = arith.truncf %109 : vector<16x32xf32> to vector<16x32xbf16>
    %cst_31 = arith.constant dense<0.000000e+00> : vector<16x16xf32>
    %111 = tpu.matmul %106, %108, %cst_31 {dimension_numbers = #tpu.dot_dimension_numbers<[1], [1], [0], [0], [0, 0, 1, 0], [], []>} : vector<16x32xbf16>, vector<16x32xbf16>, vector<16x16xf32> -> vector<16x16xf32>
    %cst_32 = arith.constant 0.0883883461 : f32
    %112 = vector.broadcast %cst_32 : f32 to vector<16x16xf32>
    %113 = arith.mulf %111, %112 : vector<16x16xf32>
    %cst_33 = arith.constant -1.000000e+30 : f32
    %114 = vector.broadcast %cst_33 : f32 to vector<16x16xf32>
    %115 = arith.select %35, %113, %114 : vector<16x16xi1>, vector<16x16xf32>
    %cst_34 = arith.constant dense<0xFF800000> : vector<16xf32>
    %116 = vector.multi_reduction <maximumf>, %115, %cst_34 [1] : vector<16x16xf32> to vector<16xf32>
    %117 = vector.shape_cast %116 : vector<16xf32> to vector<16x1xf32>
    %118 = vector.broadcast %117 : vector<16x1xf32> to vector<16x16xf32>
    %119 = arith.subf %115, %118 : vector<16x16xf32>
    %120 = math.exp %119 : vector<16x16xf32>
    %cst_35 = arith.constant dense<0.000000e+00> : vector<16xf32>
    %121 = vector.multi_reduction <add>, %120, %cst_35 [1] : vector<16x16xf32> to vector<16xf32>
    %122 = vector.shape_cast %121 : vector<16xf32> to vector<16x1xf32>
    %123 = tpu.reciprocal %122 {approx = true} : vector<16x1xf32> -> vector<16x1xf32>
    %124 = vector.broadcast %123 : vector<16x1xf32> to vector<16x16xf32>
    %125 = arith.mulf %120, %124 : vector<16x16xf32>
    %126 = arith.truncf %125 : vector<16x16xf32> to vector<16x16xbf16>
    %cst_36 = arith.constant dense<0.000000e+00> : vector<16x32xf32>
    %127 = tpu.matmul %126, %110, %cst_36 {dimension_numbers = #tpu.dot_dimension_numbers<[1], [0], [0], [1], [0, 0, 1, 1], [], []>} : vector<16x16xbf16>, vector<16x32xbf16>, vector<16x32xf32> -> vector<16x32xf32>
    %128 = tpu.concatenate %58, %81, %104, %127 in 1 : vector<16x32xf32>, vector<16x32xf32>, vector<16x32xf32>, vector<16x32xf32> -> vector<16x128xf32>
    %129 = arith.truncf %128 : vector<16x128xf32> to vector<16x128xbf16>
    %c0_37 = arith.constant 0 : index
    %c0_38 = arith.constant 0 : index
    %130 = vector.load %arg5[%c0_37, %c0_38] : memref<128x128xbf16, #tpu.memory_space<vmem>>, vector<128x128xbf16>
    %cst_39 = arith.constant dense<0.000000e+00> : vector<16x128xf32>
    %131 = tpu.matmul %129, %130, %cst_39 {dimension_numbers = #tpu.dot_dimension_numbers<[1], [0], [0], [1], [0, 0, 1, 1], [], []>} : vector<16x128xbf16>, vector<128x128xbf16>, vector<16x128xf32> -> vector<16x128xf32>
    %c0_40 = arith.constant 0 : index
    %c0_41 = arith.constant 0 : index
    %132 = vector.load %arg6[%c0_40, %c0_41] : memref<1x128xf32, #tpu.memory_space<vmem>>, vector<1x128xf32>
    %133 = vector.broadcast %132 : vector<1x128xf32> to vector<16x128xf32>
    %134 = arith.addf %131, %133 : vector<16x128xf32>
    %135 = arith.addf %134, %2 : vector<16x128xf32>
    %136 = arith.truncf %135 : vector<16x128xf32> to vector<16x128xbf16>
    %c0_42 = arith.constant 0 : index
    %c0_43 = arith.constant 0 : index
    %c0_44 = arith.constant 0 : index
    %137 = vector.load %arg7[%c0_42, %c0_43, %c0_44] : memref<1x16x128xbf16, #tpu.memory_space<vmem>>, vector<1x16x128xbf16>
    %138 = vector.shape_cast %137 : vector<1x16x128xbf16> to vector<16x128xbf16>
    %139 = vector.shape_cast %136 : vector<16x128xbf16> to vector<1x16x128xbf16>
    tpu.vector_store %arg7[%c0_42, %c0_43, %c0_44], %139 {strides = array<i32>} : memref<1x16x128xbf16, #tpu.memory_space<vmem>>, vector<1x16x128xbf16>,
    return
  }
  func.func @transform_0(%arg0: i32) -> (i32, i32, i32) {
    %c0_i32 = arith.constant 0 : i32
    %c0_i32_0 = arith.constant 0 : i32
    %c0_i32_1 = arith.constant 0 : i32
    return %arg0, %c0_i32, %c0_i32_0 : i32, i32, i32
  }
  func.func @transform_1(%arg0: i32) -> (i32, i32) {
    %c0_i32 = arith.constant 0 : i32
    %c0_i32_0 = arith.constant 0 : i32
    %c0_i32_1 = arith.constant 0 : i32
    return %c0_i32, %c0_i32_0 : i32, i32
  }
  func.func @transform_2(%arg0: i32) -> (i32, i32) {
    %c0_i32 = arith.constant 0 : i32
    %c0_i32_0 = arith.constant 0 : i32
    %c0_i32_1 = arith.constant 0 : i32
    return %c0_i32, %c0_i32_0 : i32, i32
  }
  func.func @transform_3(%arg0: i32) -> (i32, i32) {
    %c0_i32 = arith.constant 0 : i32
    %c0_i32_0 = arith.constant 0 : i32
    %c0_i32_1 = arith.constant 0 : i32
    return %c0_i32, %c0_i32_0 : i32, i32
  }
  func.func @transform_4(%arg0: i32) -> (i32, i32) {
    %c0_i32 = arith.constant 0 : i32
    %c0_i32_0 = arith.constant 0 : i32
    %c0_i32_1 = arith.constant 0 : i32
    return %c0_i32, %c0_i32_0 : i32, i32
  }
  func.func @transform_5(%arg0: i32) -> (i32, i32) {
    %c0_i32 = arith.constant 0 : i32
    %c0_i32_0 = arith.constant 0 : i32
    %c0_i32_1 = arith.constant 0 : i32
    return %c0_i32, %c0_i32_0 : i32, i32
  }
  func.func @transform_6(%arg0: i32) -> (i32, i32, i32) {
    %c0_i32 = arith.constant 0 : i32
    %c0_i32_0 = arith.constant 0 : i32
    %c0_i32_1 = arith.constant 0 : i32
    return %arg0, %c0_i32, %c0_i32_0 : i32, i32, i32
  }
}

module attributes {stable_mosaic.version = 11 : i64} {
  func.func @_ff_block_kernel(%arg0: i32, %arg1: memref<32x128xbf16, #tpu.memory_space<vmem>>, %arg2: memref<1x128xf32, #tpu.memory_space<vmem>>, %arg3: memref<1x128xf32, #tpu.memory_space<vmem>>, %arg4: memref<128x128xbf16, #tpu.memory_space<vmem>>, %arg5: memref<1x128xf32, #tpu.memory_space<vmem>>, %arg6: memref<128x128xbf16, #tpu.memory_space<vmem>>, %arg7: memref<1x128xf32, #tpu.memory_space<vmem>>, %arg8: memref<32x128xbf16, #tpu.memory_space<vmem>>) attributes {dimension_semantics = [#tpu.dimension_semantics<parallel>], iteration_bounds = array<i64: 1>, scalar_prefetch = 0 : i64, scratch_operands = 0 : i64, tpu.core_type = #tpu.core_type<tc>, window_params = [{transform_indices = @transform_0, window_bounds = array<i64: 32, 128>}, {pipeline_mode = #tpu.pipeline_mode<synchronous>, transform_indices = @transform_1, window_bounds = array<i64: 1, 128>}, {pipeline_mode = #tpu.pipeline_mode<synchronous>, transform_indices = @transform_2, window_bounds = array<i64: 1, 128>}, {pipeline_mode = #tpu.pipeline_mode<synchronous>, transform_indices = @transform_3, window_bounds = array<i64: 128, 128>}, {pipeline_mode = #tpu.pipeline_mode<synchronous>, transform_indices = @transform_4, window_bounds = array<i64: 1, 128>}, {pipeline_mode = #tpu.pipeline_mode<synchronous>, transform_indices = @transform_5, window_bounds = array<i64: 128, 128>}, {pipeline_mode = #tpu.pipeline_mode<synchronous>, transform_indices = @transform_6, window_bounds = array<i64: 1, 128>}, {transform_indices = @transform_7, window_bounds = array<i64: 32, 128>}]} {
    %c0 = arith.constant 0 : index
    %c0_0 = arith.constant 0 : index
    %0 = vector.load %arg1[%c0, %c0_0] : memref<32x128xbf16, #tpu.memory_space<vmem>>, vector<32x128xbf16>
    %1 = arith.extf %0 : vector<32x128xbf16> to vector<32x128xf32>
    %c0_1 = arith.constant 0 : index
    %c0_2 = arith.constant 0 : index
    %2 = vector.load %arg2[%c0_1, %c0_2] : memref<1x128xf32, #tpu.memory_space<vmem>>, vector<1x128xf32>
    %c0_3 = arith.constant 0 : index
    %c0_4 = arith.constant 0 : index
    %3 = vector.load %arg3[%c0_3, %c0_4] : memref<1x128xf32, #tpu.memory_space<vmem>>, vector<1x128xf32>
    %cst = arith.constant dense<0.000000e+00> : vector<32xf32>
    %4 = vector.multi_reduction <add>, %1, %cst [1] : vector<32x128xf32> to vector<32xf32>
    %5 = vector.shape_cast %4 : vector<32xf32> to vector<32x1xf32>
    %cst_5 = arith.constant 1.280000e+02 : f32
    %6 = vector.broadcast %cst_5 : f32 to vector<32x1xf32>
    %7 = arith.divf %5, %6 : vector<32x1xf32>
    %8 = vector.broadcast %7 : vector<32x1xf32> to vector<32x128xf32>
    %9 = arith.subf %1, %8 : vector<32x128xf32>
    %10 = arith.mulf %9, %9 : vector<32x128xf32>
    %cst_6 = arith.constant dense<0.000000e+00> : vector<32xf32>
    %11 = vector.multi_reduction <add>, %10, %cst_6 [1] : vector<32x128xf32> to vector<32xf32>
    %12 = vector.shape_cast %11 : vector<32xf32> to vector<32x1xf32>
    %cst_7 = arith.constant 1.280000e+02 : f32
    %13 = vector.broadcast %cst_7 : f32 to vector<32x1xf32>
    %14 = arith.divf %12, %13 : vector<32x1xf32>
    %15 = vector.broadcast %7 : vector<32x1xf32> to vector<32x128xf32>
    %16 = arith.subf %1, %15 : vector<32x128xf32>
    %cst_8 = arith.constant 9.99999974E-6 : f32
    %17 = vector.broadcast %cst_8 : f32 to vector<32x1xf32>
    %18 = arith.addf %14, %17 : vector<32x1xf32>
    %19 = math.rsqrt %18 : vector<32x1xf32>
    %20 = vector.broadcast %19 : vector<32x1xf32> to vector<32x128xf32>
    %21 = arith.mulf %16, %20 : vector<32x128xf32>
    %22 = vector.broadcast %2 : vector<1x128xf32> to vector<32x128xf32>
    %23 = arith.mulf %21, %22 : vector<32x128xf32>
    %24 = vector.broadcast %3 : vector<1x128xf32> to vector<32x128xf32>
    %25 = arith.addf %23, %24 : vector<32x128xf32>
    %26 = arith.truncf %25 : vector<32x128xf32> to vector<32x128xbf16>
    %c0_9 = arith.constant 0 : index
    %c0_10 = arith.constant 0 : index
    %27 = vector.load %arg4[%c0_9, %c0_10] : memref<128x128xbf16, #tpu.memory_space<vmem>>, vector<128x128xbf16>
    %cst_11 = arith.constant dense<0.000000e+00> : vector<32x128xf32>
    %28 = tpu.matmul %26, %27, %cst_11 {dimension_numbers = #tpu.dot_dimension_numbers<[1], [0], [0], [1], [0, 0, 1, 1], [], []>} : vector<32x128xbf16>, vector<128x128xbf16>, vector<32x128xf32> -> vector<32x128xf32>
    %c0_12 = arith.constant 0 : index
    %c0_13 = arith.constant 0 : index
    %29 = vector.load %arg5[%c0_12, %c0_13] : memref<1x128xf32, #tpu.memory_space<vmem>>, vector<1x128xf32>
    %30 = vector.broadcast %29 : vector<1x128xf32> to vector<32x128xf32>
    %31 = arith.addf %28, %30 : vector<32x128xf32>
    %32 = arith.mulf %31, %31 : vector<32x128xf32>
    %33 = arith.mulf %31, %32 : vector<32x128xf32>
    %cst_14 = arith.constant 4.471500e-02 : f32
    %34 = vector.broadcast %cst_14 : f32 to vector<32x128xf32>
    %35 = arith.mulf %34, %33 : vector<32x128xf32>
    %36 = arith.addf %31, %35 : vector<32x128xf32>
    %cst_15 = arith.constant 0.797884583 : f32
    %37 = vector.broadcast %cst_15 : f32 to vector<32x128xf32>
    %38 = arith.mulf %37, %36 : vector<32x128xf32>
    %39 = math.tanh %38 : vector<32x128xf32>
    %cst_16 = arith.constant 1.000000e+00 : f32
    %40 = vector.broadcast %cst_16 : f32 to vector<32x128xf32>
    %41 = arith.addf %40, %39 : vector<32x128xf32>
    %cst_17 = arith.constant 5.000000e-01 : f32
    %42 = vector.broadcast %cst_17 : f32 to vector<32x128xf32>
    %43 = arith.mulf %42, %41 : vector<32x128xf32>
    %44 = arith.mulf %31, %43 : vector<32x128xf32>
    %45 = arith.truncf %44 : vector<32x128xf32> to vector<32x128xbf16>
    %c0_18 = arith.constant 0 : index
    %c0_19 = arith.constant 0 : index
    %46 = vector.load %arg6[%c0_18, %c0_19] : memref<128x128xbf16, #tpu.memory_space<vmem>>, vector<128x128xbf16>
    %cst_20 = arith.constant dense<0.000000e+00> : vector<32x128xf32>
    %47 = tpu.matmul %45, %46, %cst_20 {dimension_numbers = #tpu.dot_dimension_numbers<[1], [0], [0], [1], [0, 0, 1, 1], [], []>} : vector<32x128xbf16>, vector<128x128xbf16>, vector<32x128xf32> -> vector<32x128xf32>
    %c0_21 = arith.constant 0 : index
    %c0_22 = arith.constant 0 : index
    %48 = vector.load %arg7[%c0_21, %c0_22] : memref<1x128xf32, #tpu.memory_space<vmem>>, vector<1x128xf32>
    %49 = vector.broadcast %48 : vector<1x128xf32> to vector<32x128xf32>
    %50 = arith.addf %47, %49 : vector<32x128xf32>
    %51 = arith.addf %50, %1 : vector<32x128xf32>
    %52 = arith.truncf %51 : vector<32x128xf32> to vector<32x128xbf16>
    %c0_23 = arith.constant 0 : index
    %c0_24 = arith.constant 0 : index
    %53 = vector.load %arg8[%c0_23, %c0_24] : memref<32x128xbf16, #tpu.memory_space<vmem>>, vector<32x128xbf16>
    tpu.vector_store %arg8[%c0_23, %c0_24], %52 {strides = array<i32>} : memref<32x128xbf16, #tpu.memory_space<vmem>>, vector<32x128xbf16>,
    return
  }
  func.func @transform_0(%arg0: i32) -> (i32, i32) {
    %c0_i32 = arith.constant 0 : i32
    %c0_i32_0 = arith.constant 0 : i32
    return %arg0, %c0_i32 : i32, i32
  }
  func.func @transform_1(%arg0: i32) -> (i32, i32) {
    %c0_i32 = arith.constant 0 : i32
    %c0_i32_0 = arith.constant 0 : i32
    %c0_i32_1 = arith.constant 0 : i32
    return %c0_i32, %c0_i32_0 : i32, i32
  }
  func.func @transform_2(%arg0: i32) -> (i32, i32) {
    %c0_i32 = arith.constant 0 : i32
    %c0_i32_0 = arith.constant 0 : i32
    %c0_i32_1 = arith.constant 0 : i32
    return %c0_i32, %c0_i32_0 : i32, i32
  }
  func.func @transform_3(%arg0: i32) -> (i32, i32) {
    %c0_i32 = arith.constant 0 : i32
    %c0_i32_0 = arith.constant 0 : i32
    %c0_i32_1 = arith.constant 0 : i32
    return %c0_i32, %c0_i32_0 : i32, i32
  }
  func.func @transform_4(%arg0: i32) -> (i32, i32) {
    %c0_i32 = arith.constant 0 : i32
    %c0_i32_0 = arith.constant 0 : i32
    %c0_i32_1 = arith.constant 0 : i32
    return %c0_i32, %c0_i32_0 : i32, i32
  }
  func.func @transform_5(%arg0: i32) -> (i32, i32) {
    %c0_i32 = arith.constant 0 : i32
    %c0_i32_0 = arith.constant 0 : i32
    %c0_i32_1 = arith.constant 0 : i32
    return %c0_i32, %c0_i32_0 : i32, i32
  }
  func.func @transform_6(%arg0: i32) -> (i32, i32) {
    %c0_i32 = arith.constant 0 : i32
    %c0_i32_0 = arith.constant 0 : i32
    %c0_i32_1 = arith.constant 0 : i32
    return %c0_i32, %c0_i32_0 : i32, i32
  }
  func.func @transform_7(%arg0: i32) -> (i32, i32) {
    %c0_i32 = arith.constant 0 : i32
    %c0_i32_0 = arith.constant 0 : i32
    return %arg0, %c0_i32 : i32, i32
  }
}

</mosaic_0001>

<bundles_post_ra>
// kernel: transformer_forward.9
= control target key start
LH: loop header
LB: loop body
LE: loop exit
PB: predicated region body
PF: predicated region fallthrough
CT: control target
= control target key end

     0   :  { %8 = vsyncpa [#allocation4], 0  ;;  %s314_s12 = smov [#allocation3]   ;;  %s383_s0 = inlined_call_operand.vmem [shape: bf16[32,128], index: 0, kind: input, shape index: {}]   ;;  %s384_s1 = inlined_call_operand.vmem [shape: bf16[128,128], index: 1, kind: input, shape index: {}]   ;;  %s385_s2 = inlined_call_operand.hbm [shape: f32[1,128], index: 2, kind: input, shape index: {}]   ;;  %s386_s3 = inlined_call_operand.vmem [shape: bf16[32,128], index: 3, kind: output, shape index: {}]  }
   0x1   :  { %s19_s13 = sshll.u32 %s314_s12, 4  ;;  %s290_s16 = scalar_lea.hbm %s385_s2, 16  ;;  %s20_s13 = int_to_ptr.vmem [resolvable:$true] %s19_s13 }
   0x2   :  { %p291_p0 = scmp.ne.s32.totalorder %s385_s2, %s290_s16  ;;  %p294_p1 = scmp.lt.u32.totalorder %s290_s16, %s385_s2 }
   0x4   :  { %p296_p2 = pnand %p294_p1, %p291_p0 }
   0x6   :  { %299 = shalt.err (!%p296_p2)
}
   0x7   :  { %s300_s21 = scalar_lea.vmem %s20_s13, 16  ;;  %s304_s22 = scalar_lea.vmem %s20_s13, 32 }
   0x8   :  { %p301_p3 = scmp.ne.s32.totalorder %s20_s13, %s300_s21  ;;  %p305_p4 = scmp.lt.s32.totalorder %s20_s13, %s20_s13 }
   0x9   :  { %p306_p5 = scmp.lt.s32.totalorder %s304_s22, %s300_s21 }
   0xb   :  { %p307_p6 = por %p306_p5, %p305_p4 }
   0xd   :  { %p308_p7 = pnand %p307_p6, %p301_p3 }
   0xf   :  { %311 = shalt.err (!%p308_p7)
}
  0x10   :  { %22 = dma.hbm_to_vmem [thread:$0]  %s385_s2, 16, %s20_s13, [#allocation4]  }
  0x11   :  { %312 = dma.done.wait [#allocation4], 16  }
  0x12   :  { %313 = vsyncadd [#allocation4], 4294967280  ;;  %v280_v0 = vld [vmem:[%s384_s1] sm:$0xff]   ;;  %v281_v1 = vld [vmem:[%s384_s1 + $0x8] sm:$0xff]  }
  0x13   :  { %259 = vmatprep.subr.bf16.mxu0 %v280_v0  ;;  %v282_v2 = vld [vmem:[%s384_s1 + $0x10] sm:$0xff]   ;;  %v283_v3 = vld [vmem:[%s384_s1 + $0x18] sm:$0xff]   ;;  %v288_v4 = vld [vmem:[%s383_s0] sm:$0xff]  }
  0x14   :  { %260 = vmatpush3.bf16.msra.mxu0 %v280_v0  ;;  %275 = vmatprep.mubr.bf16.mxu0 %v288_v4  ;;  %v284_v5 = vld [vmem:[%s384_s1 + $0x20] sm:$0xff]   ;;  %v285_v6 = vld [vmem:[%s384_s1 + $0x28] sm:$0xff]   ;;  %v286_v7 = vld [vmem:[%s384_s1 + $0x30] sm:$0xff]  }
  0x15   :  { %261 = vmatprep.subr.bf16.mxu0 %v281_v1  ;;  %v287_v8 = vld [vmem:[%s384_s1 + $0x38] sm:$0xff]   ;;  %v289_v9 = vld [vmem:[%s383_s0 + $0x8] sm:$0xff]   ;;  %v229_v11 = vld [vmem:[#allocation3] ss:$0 sm:$0xff] }
  0x18   :  { %262 = vmatpush3.bf16.msra.mxu0 %v281_v1 }
  0x19   :  { %263 = vmatprep.subr.bf16.mxu0 %v282_v2 }
  0x1c   :  { %264 = vmatpush3.bf16.msra.mxu0 %v282_v2 }
  0x1d   :  { %265 = vmatprep.subr.bf16.mxu0 %v283_v3 }
  0x20   :  { %266 = vmatpush3.bf16.msra.mxu0 %v283_v3 }
  0x21   :  { %267 = vmatprep.subr.bf16.mxu0 %v284_v5 }
  0x24   :  { %268 = vmatpush3.bf16.msra.mxu0 %v284_v5 }
  0x25   :  { %269 = vmatprep.subr.bf16.mxu0 %v285_v6 }
  0x28   :  { %270 = vmatpush3.bf16.msra.mxu0 %v285_v6 }
  0x29   :  { %271 = vmatprep.subr.bf16.mxu0 %v286_v7 }
  0x2c   :  { %272 = vmatpush3.bf16.msra.mxu0 %v286_v7 }
  0x2d   :  { %273 = vmatprep.subr.bf16.mxu0 %v287_v8 }
  0x30   :  { %274 = vmatpush3.bf16.msra.mxu0 %v287_v8 }
  0x33   :  { %276 = vmatmul.mubr.bf16.vlgmr.msra.gmra.mrb[0].mxu0 %v289_v9 }
 0x106   :  { %v277_v10 = vpop.f32.mrb[0].mxu0 }
 0x107   :  { %v153_v12 = vpop.f32.mrb[1].mxu0  ;;  %v192_v14 = vadd.f32 %v277_v10, %v229_v11 }
 0x108   :  { %v278_v13 = vpop.f32.mrb[2].mxu0  ;;  %v190_v17 = vadd.f32 %v229_v11, %v153_v12 }
 0x109   :  { %v193_v15 = vadd.f32 %v278_v13, %v229_v11  ;;  %v156_v16 = vpop.f32.mrb[3].mxu0 }
 0x10a   :  { %v191_v18 = vadd.f32 %v229_v11, %v156_v16 }
 0x10b   :  { %v246_v19 = vpack.c.bf16 %v193_v15, %v192_v14 }
 0x10c   :  { %v241_v20 = vpack.c.bf16 %v191_v18, %v190_v17 }
 0x10d   :  { %248 = vst [vmem:[%s386_s3 + $0x8] sm:$0xff] %v246_v19  }
 0x10e   :  { %242 = vst [vmem:[%s386_s3] sm:$0xff] %v241_v20  }
 0x10f   :  { %218 = vsyncpa [#allocation4], 1 }

// kernel: transformer_forward.11
= control target key start
LH: loop header
LB: loop body
LE: loop exit
PB: predicated region body
PF: predicated region fallthrough
CT: control target
= control target key end

     0   :  { %12 = vsyncpa [#allocation3], 0  ;;  %s592_s24 = smov [#allocation2]   ;;  %s715_s0 = inlined_call_operand.vmem [shape: bf16[32,128], index: 0, kind: input, shape index: {}]   ;;  %s716_s1 = inlined_call_operand.vmem [shape: f32[1,128], index: 1, kind: input, shape index: {}]   ;;  %s717_s2 = inlined_call_operand.vmem [shape: f32[1,128], index: 2, kind: input, shape index: {}]   ;;  %s718_s3 = inlined_call_operand.vmem [shape: bf16[128,128], index: 3, kind: input, shape index: {}]   ;;  %s719_s4 = inlined_call_operand.vmem [shape: f32[1,128], index: 4, kind: input, shape index: {}]   ;;  %s720_s5 = inlined_call_operand.hbm [shape: bf16[128,128], index: 5, kind: input, shape index: {}]   ;;  %s721_s6 = inlined_call_operand.vmem [shape: f32[1,128], index: 6, kind: input, shape index: {}]   ;;  %s722_s7 = inlined_call_operand.vmem [shape: bf16[32,128], index: 7, kind: output, shape index: {}]  }
   0x1   :  { %s28_s25 = sshll.u32 %s592_s24, 4  ;;  %s568_s28 = scalar_lea.hbm %s720_s5, 1024  ;;  %s29_s25 = int_to_ptr.vmem [resolvable:$true] %s28_s25 }
   0x2   :  { %p569_p0 = scmp.ne.s32.totalorder %s720_s5, %s568_s28  ;;  %p572_p1 = scmp.lt.u32.totalorder %s568_s28, %s720_s5 }
   0x4   :  { %p574_p2 = pnand %p572_p1, %p569_p0 }
   0x6   :  { %577 = shalt.err (!%p574_p2)
}
   0x7   :  { %s578_s10 = scalar_lea.vmem %s29_s25, 1024  ;;  %p583_p4 = scmp.lt.s32.totalorder %s29_s25, %s29_s25 }
   0x8   :  { %p579_p3 = scmp.ne.s32.totalorder %s29_s25, %s578_s10  ;;  %p584_p5 = scmp.lt.s32.totalorder %s578_s10, %s578_s10 }
   0xa   :  { %p585_p6 = por %p584_p5, %p583_p4 }
   0xc   :  { %p586_p7 = pnand %p585_p6, %p579_p3 }
   0xe   :  { %589 = shalt.err (!%p586_p7)
}
   0xf   :  { %s593_s11 = smov 64   ;;  %s594_s12 = smov 4  }
  0x10   :  { %34 = dma.hbm_to_vmem [thread:$0]  %s720_s5, 1024, %s29_s25, [#allocation3], %s593_s11, %s593_s11, %s594_s12  }
  0x11   :  { %590 = dma.done.wait [#allocation3], 1024  }
  0x12   :  { %591 = vsyncadd [#allocation3], 4294966272  ;;  %v454_v0 = vld [vmem:[%s715_s0] sm:$0xff]   ;;  %v471_v1 = vld [vmem:[%s715_s0 + $0x8] sm:$0xff]  }
  0x13   :  { %v653_v2 = vunpack.c.l.bf16 %v454_v0  ;;  %v655_v3 = vunpack.c.l.bf16 %v471_v1  ;;  %v659_v4 = vunpack.c.h.bf16 %v454_v0  ;;  %v661_v5 = vunpack.c.h.bf16 %v471_v1  ;;  %v536_v6 = vld [vmem:[%s718_s3] sm:$0xff]   ;;  %v537_v23 = vld [vmem:[%s718_s3 + $0x8] sm:$0xff]   ;;  %v538_v24 = vld [vmem:[%s718_s3 + $0x10] sm:$0xff]  }
  0x14   :  { %493 = vmatprep.subr.bf16.mxu0 %v536_v6  ;;  %v539_v25 = vld [vmem:[%s718_s3 + $0x18] sm:$0xff]   ;;  %v540_v26 = vld [vmem:[%s718_s3 + $0x20] sm:$0xff]   ;;  %v541_v27 = vld [vmem:[%s718_s3 + $0x28] sm:$0xff]  }
  0x15   :  { %51 = vadd.xlane.f32.xlu0 %v653_v2  ;;  %55 = vadd.xlane.f32.xlu1 %v655_v3  ;;  %v542_v28 = vld [vmem:[%s718_s3 + $0x30] sm:$0xff]   ;;  %v543_v29 = vld [vmem:[%s718_s3 + $0x38] sm:$0xff]   ;;  %v425_v44 = vld [vmem:[%s716_s1] ss:$0 sm:$0xff] }
  0x16   :  { %494 = vmatpush3.bf16.msra.mxu0 %v536_v6  ;;  %v426_v49 = vld [vmem:[%s717_s2] ss:$0 sm:$0xff]  ;;  %v545_v63 = vld [vmem:[#allocation2 + $0x8] sm:$0xff]   ;;  %v546_v0 = vld [vmem:[#allocation2 + $0x10] sm:$0xff]  }
  0x17   :  { %495 = vmatprep.subr.bf16.mxu0 %v537_v23  ;;  %v544_v62 = vld [vmem:[#allocation2] sm:$0xff]   ;;  %v547_v1 = vld [vmem:[#allocation2 + $0x18] sm:$0xff]  }
  0x18   :  { %513 = vmatprep.subr.bf16.mxu1 %v544_v62  ;;  %v548_v6 = vld [vmem:[#allocation2 + $0x20] sm:$0xff]  }
  0x19   :  { %53 = vadd.xlane.f32.xlu0 %v659_v4  ;;  %57 = vadd.xlane.f32.xlu1 %v661_v5 }
  0x1a   :  { %496 = vmatpush3.bf16.msra.mxu0 %v537_v23  ;;  %514 = vmatpush3.bf16.msra.mxu1 %v544_v62 }
  0x1b   :  { %497 = vmatprep.subr.bf16.mxu0 %v538_v24  ;;  %515 = vmatprep.subr.bf16.mxu1 %v545_v63 }
  0x1e   :  { %498 = vmatpush3.bf16.msra.mxu0 %v538_v24  ;;  %516 = vmatpush3.bf16.msra.mxu1 %v545_v63 }
  0x1f   :  { %499 = vmatprep.subr.bf16.mxu0 %v539_v25  ;;  %517 = vmatprep.subr.bf16.mxu1 %v546_v0 }
  0x22   :  { %500 = vmatpush3.bf16.msra.mxu0 %v539_v25  ;;  %518 = vmatpush3.bf16.msra.mxu1 %v546_v0 }
  0x23   :  { %501 = vmatprep.subr.bf16.mxu0 %v540_v26  ;;  %519 = vmatprep.subr.bf16.mxu1 %v547_v1 }
  0x26   :  { %502 = vmatpush3.bf16.msra.mxu0 %v540_v26  ;;  %520 = vmatpush3.bf16.msra.mxu1 %v547_v1 }
  0x27   :  { %503 = vmatprep.subr.bf16.mxu0 %v541_v27  ;;  %521 = vmatprep.subr.bf16.mxu1 %v548_v6 }
  0x2a   :  { %504 = vmatpush3.bf16.msra.mxu0 %v541_v27  ;;  %522 = vmatpush3.bf16.msra.mxu1 %v548_v6 }
  0x2b   :  { %505 = vmatprep.subr.bf16.mxu0 %v542_v28 }
  0x2e   :  { %506 = vmatpush3.bf16.msra.mxu0 %v542_v28 }
  0x2f   :  { %507 = vmatprep.subr.bf16.mxu0 %v543_v29 }
  0x32   :  { %508 = vmatpush3.bf16.msra.mxu0 %v543_v29 }
  0xa2   :  { %v52_v7 = vpop.xlane.xlu0 %51  ;;  %v56_v8 = vpop.xlane.xlu1 %55 }
  0xa3   :  { %v60_v9 = vmul.f32 0.0078125, %v52_v7  ;;  %v62_v10 = vmul.f32 0.0078125, %v56_v8  ;;  %v549_v7 = vld [vmem:[#allocation2 + $0x28] sm:$0xff]   ;;  %v550_v8 = vld [vmem:[#allocation2 + $0x30] sm:$0xff]  }
  0xa4   :  { %523 = vmatprep.subr.bf16.mxu1 %v549_v7 }
  0xa5   :  { %v64_v11 = vsub.f32 %v653_v2, %v60_v9  ;;  %v66_v12 = vsub.f32 %v655_v3, %v62_v10  ;;  %524 = vmatpush3.bf16.msra.mxu1 %v549_v7  ;;  %v551_v9 = vld [vmem:[#allocation2 + $0x38] sm:$0xff]   ;;  %v427_v10 = vld [vmem:[%s719_s4] ss:$0 sm:$0xff] }
  0xa6   :  { %v54_v13 = vpop.xlane.xlu0 %53  ;;  %v58_v14 = vpop.xlane.xlu1 %57  ;;  %525 = vmatprep.subr.bf16.mxu1 %v550_v8 }
  0xa7   :  { %v61_v15 = vmul.f32 0.0078125, %v54_v13  ;;  %v68_v16 = vmul.f32 %v64_v11, %v64_v11  ;;  %v63_v17 = vmul.f32 0.0078125, %v58_v14  ;;  %v70_v20 = vmul.f32 %v66_v12, %v66_v12 }
  0xa9   :  { %v65_v18 = vsub.f32 %v659_v4, %v61_v15  ;;  %72 = vadd.xlane.f32.xlu0 %v68_v16  ;;  %v67_v19 = vsub.f32 %v661_v5, %v63_v17  ;;  %526 = vmatpush3.bf16.msra.mxu1 %v550_v8 }
  0xaa   :  { %527 = vmatprep.subr.bf16.mxu1 %v551_v9 }
  0xab   :  { %v69_v21 = vmul.f32 %v65_v18, %v65_v18  ;;  %v71_v22 = vmul.f32 %v67_v19, %v67_v19 }
  0xad   :  { %76 = vadd.xlane.f32.xlu0 %v70_v20  ;;  %74 = vadd.xlane.f32.xlu1 %v69_v21 }
  0xae   :  { %528 = vmatpush3.bf16.msra.mxu1 %v551_v9 }
  0xb1   :  { %78 = vadd.xlane.f32.xlu1 %v71_v22 }
 0x136   :  { %v73_v30 = vpop.xlane.xlu0 %72 }
 0x137   :  { %v80_v31 = vmul.f32 0.0078125, %v73_v30 }
 0x139   :  { %v84_v32 = vadd.f32 1e-05, %v80_v31 }
 0x13a   :  { %v75_v33 = vpop.xlane.xlu1 %74  ;;  %v77_v34 = vpop.xlane.xlu0 %76 }
 0x13b   :  { %552 = vrsqrt.f32 %v84_v32  ;;  %v81_v35 = vmul.f32 0.0078125, %v75_v33  ;;  %v82_v36 = vmul.f32 0.0078125, %v77_v34 }
 0x13d   :  { %v85_v37 = vadd.f32 1e-05, %v81_v35  ;;  %v86_v38 = vadd.f32 1e-05, %v82_v36 }
 0x13e   :  { %v79_v39 = vpop.xlane.xlu1 %78 }
 0x13f   :  { %554 = vrsqrt.f32 %v85_v37  ;;  %v83_v40 = vmul.f32 0.0078125, %v79_v39 }
 0x140   :  { %556 = vrsqrt.f32 %v86_v38 }
 0x141   :  { %v87_v41 = vadd.f32 1e-05, %v83_v40 }
 0x143   :  { %558 = vrsqrt.f32 %v87_v41 }
 0x145   :  { %v553_v42 = vpop.eup %552 }
 0x146   :  { %v92_v43 = vmul.f32 %v553_v42, %v64_v11 }
 0x148   :  { %v102_v48 = vmul.f32 %v425_v44, %v92_v43 }
 0x149   :  { %v555_v45 = vpop.eup %554 }
 0x14a   :  { %v557_v46 = vpop.eup %556  ;;  %v93_v47 = vmul.f32 %v555_v45, %v65_v18  ;;  %v112_v53 = vadd.f32 %v426_v49, %v102_v48 }
 0x14b   :  { %v94_v50 = vmul.f32 %v557_v46, %v66_v12 }
 0x14c   :  { %v103_v51 = vmul.f32 %v425_v44, %v93_v47 }
 0x14d   :  { %v559_v52 = vpop.eup %558  ;;  %v104_v56 = vmul.f32 %v425_v44, %v94_v50 }
 0x14e   :  { %v113_v54 = vadd.f32 %v426_v49, %v103_v51  ;;  %v95_v55 = vmul.f32 %v559_v52, %v67_v19 }
 0x14f   :  { %v114_v59 = vadd.f32 %v426_v49, %v104_v56 }
 0x150   :  { %v116_v57 = vpack.c.bf16 %v113_v54, %v112_v53  ;;  %v105_v58 = vmul.f32 %v425_v44, %v95_v55 }
 0x152   :  { %509 = vmatprep.mubr.bf16.mxu0 %v116_v57  ;;  %v115_v60 = vadd.f32 %v426_v49, %v105_v58  ;;  %v436_v57 = vld [vmem:[%s721_s6] ss:$0 sm:$0xff] }
 0x154   :  { %v117_v61 = vpack.c.bf16 %v115_v60, %v114_v59 }
 0x156   :  { %510 = vmatmul.mubr.bf16.vlgmr.msra.gmra.mrb[0].mxu0 %v117_v61 }
 0x229   :  { %v511_v11 = vpop.f32.mrb[0].mxu0 }
 0x22a   :  { %v232_v12 = vadd.f32 %v511_v11, %v427_v10  ;;  %v223_v13 = vpop.f32.mrb[1].mxu0 }
 0x22b   :  { %v224_v14 = vadd.f32 %v427_v10, %v223_v13  ;;  %v512_v15 = vpop.f32.mrb[2].mxu0 }
 0x22c   :  { %v240_v16 = vmul.f32 %v232_v12, %v232_v12  ;;  %v235_v17 = vadd.f32 %v512_v15, %v427_v10  ;;  %v226_v18 = vpop.f32.mrb[3].mxu0 }
 0x22d   :  { %v238_v19 = vmul.f32 %v224_v14, %v224_v14  ;;  %v227_v20 = vadd.f32 %v427_v10, %v226_v18 }
 0x22e   :  { %v244_v21 = vmul.f32 %v240_v16, %v232_v12  ;;  %v241_v22 = vmul.f32 %v235_v17, %v235_v17 }
 0x22f   :  { %v242_v23 = vmul.f32 %v238_v19, %v224_v14  ;;  %v239_v24 = vmul.f32 %v227_v20, %v227_v20 }
 0x230   :  { %v248_v25 = vmul.f32 0.044715, %v244_v21  ;;  %v245_v26 = vmul.f32 %v241_v22, %v235_v17 }
 0x231   :  { %v246_v27 = vmul.f32 0.044715, %v242_v23  ;;  %v243_v28 = vmul.f32 %v239_v24, %v227_v20 }
 0x232   :  { %v252_v29 = vadd.f32 %v248_v25, %v232_v12  ;;  %v249_v30 = vmul.f32 0.044715, %v245_v26 }
 0x233   :  { %v247_v31 = vmul.f32 0.044715, %v243_v28  ;;  %v250_v32 = vadd.f32 %v246_v27, %v224_v14 }
 0x234   :  { %v256_v33 = vmul.f32 0.7978846, %v252_v29  ;;  %v253_v34 = vadd.f32 %v249_v30, %v235_v17 }
 0x235   :  { %v251_v35 = vadd.f32 %v247_v31, %v227_v20  ;;  %v254_v36 = vmul.f32 0.7978846, %v250_v32 }
 0x236   :  { %560 = vtanh.f32 %v256_v33  ;;  %v257_v37 = vmul.f32 0.7978846, %v253_v34 }
 0x237   :  { %v255_v38 = vmul.f32 0.7978846, %v251_v35  ;;  %562 = vtanh.f32 %v254_v36 }
 0x238   :  { %564 = vtanh.f32 %v257_v37 }
 0x239   :  { %566 = vtanh.f32 %v255_v38 }
 0x240   :  { %v561_v39 = vpop.eup %560 }
 0x241   :  { %v563_v40 = vpop.eup %562  ;;  %v264_v41 = vadd.f32 1.0, %v561_v39 }
 0x242   :  { %v565_v42 = vpop.eup %564  ;;  %v262_v43 = vadd.f32 1.0, %v563_v40 }
 0x243   :  { %v567_v44 = vpop.eup %566  ;;  %v265_v45 = vadd.f32 1.0, %v565_v42  ;;  %v268_v46 = vmul.f32 0.5, %v264_v41 }
 0x244   :  { %v263_v47 = vadd.f32 1.0, %v567_v44  ;;  %v266_v48 = vmul.f32 0.5, %v262_v43 }
 0x245   :  { %v269_v49 = vmul.f32 0.5, %v265_v45  ;;  %v272_v51 = vmul.f32 %v268_v46, %v232_v12 }
 0x246   :  { %v267_v50 = vmul.f32 0.5, %v263_v47  ;;  %v270_v53 = vmul.f32 %v266_v48, %v224_v14 }
 0x247   :  { %v273_v52 = vmul.f32 %v269_v49, %v235_v17 }
 0x248   :  { %v271_v54 = vmul.f32 %v267_v50, %v227_v20 }
 0x249   :  { %v275_v55 = vpack.c.bf16 %v273_v52, %v272_v51 }
 0x24a   :  { %v274_v56 = vpack.c.bf16 %v271_v54, %v270_v53 }
 0x24c   :  { %529 = vmatprep.mubr.bf16.mxu1 %v274_v56 }
 0x24d   :  { %530 = vmatmul.mubr.bf16.vlgmr.msra.gmra.mrb[0].mxu1 %v275_v55 }
 0x320   :  { %v531_v58 = vpop.f32.mrb[0].mxu1 }
 0x321   :  { %v390_v59 = vadd.f32 %v531_v58, %v436_v57  ;;  %v381_v60 = vpop.f32.mrb[1].mxu1 }
 0x322   :  { %v382_v61 = vadd.f32 %v436_v57, %v381_v60  ;;  %v532_v62 = vpop.f32.mrb[2].mxu1 }
 0x323   :  { %v393_v63 = vadd.f32 %v532_v62, %v436_v57  ;;  %v384_v0 = vpop.f32.mrb[3].mxu1  ;;  %v398_v6 = vadd.f32 %v655_v3, %v390_v59 }
 0x324   :  { %v385_v1 = vadd.f32 %v436_v57, %v384_v0  ;;  %v396_v8 = vadd.f32 %v653_v2, %v382_v61 }
 0x325   :  { %v399_v7 = vadd.f32 %v661_v5, %v393_v63 }
 0x326   :  { %v397_v9 = vadd.f32 %v659_v4, %v385_v1 }
 0x327   :  { %v469_v10 = vpack.c.bf16 %v399_v7, %v398_v6 }
 0x328   :  { %v464_v11 = vpack.c.bf16 %v397_v9, %v396_v8 }
 0x329   :  { %472 = vst [vmem:[%s722_s7 + $0x8] sm:$0xff] %v469_v10  }
 0x32a   :  { %465 = vst [vmem:[%s722_s7] sm:$0xff] %v464_v11  }
 0x32b   :  { %424 = vsyncpa [#allocation3], 1 }

// kernel: transformer_forward.10
= control target key start
LH: loop header
LB: loop body
LE: loop exit
PB: predicated region body
PF: predicated region fallthrough
CT: control target
= control target key end

     0   :  { %11 = vsyncpa [#allocation3], 0  ;;  %s2065_s0 = inlined_call_operand.vmem [shape: bf16[2,16,128], index: 0, kind: input, shape index: {}]   ;;  %s2066_s1 = inlined_call_operand.vmem [shape: f32[1,128], index: 1, kind: input, shape index: {}]   ;;  %s2067_s2 = inlined_call_operand.vmem [shape: f32[1,128], index: 2, kind: input, shape index: {}]   ;;  %s2068_s3 = inlined_call_operand.vmem [shape: bf16[128,384], index: 3, kind: input, shape index: {}]   ;;  %s2069_s4 = inlined_call_operand.hbm [shape: bf16[128,128], index: 4, kind: input, shape index: {}]   ;;  %s2070_s5 = inlined_call_operand.hbm [shape: f32[1,128], index: 5, kind: input, shape index: {}]   ;;  %s2071_s6 = inlined_call_operand.vmem [shape: bf16[2,16,128], index: 6, kind: output, shape index: {}]  }
   0x1   :  { %12 = vsyncpa [#allocation5], 0  ;;  %s1749_s21 = smov 0  }
   0x2 LB: > { %s1755_s22 = sadd.s32 4294967295, %s1702_s21   ;;  %p1311_p0 = scmp.ge.s32.totalorder %s1702_s21, 1  ;;  %s1702_s21 = sphi %s1749_s21, %s18_s21  }
   0x3   : > { %p180_p1 = scmp.lt.s32.totalorder %s1702_s21, 3  ;;  %s1704_s23 = smov [#allocation2]  }
   0x4   : > { %s201_s24 = sshll.u32 %s1704_s23, 4  ;;  %p2072_p3 = scmp.eq.s32.totalorder %s1755_s22, 0  ;;  %s202_s24 = int_to_ptr.vmem [resolvable:$true] %s201_s24 }
   0x5   : > { %p1759_p2 = pnand %p1311_p0, %p180_p1  ;;  %s1705_s26 = smov [#allocation4]  }
   0x6   : > { %s215_s27 = sshll.u32 %s1705_s26, 4  ;;  %s1632_s7 = scalar_lea.hbm %s2069_s4, 1024  ;;  %s1772_s27 = int_to_ptr.vmem [resolvable:$true] %s215_s27 }
   0x7   : > { %s2074_s25 = scalar_select %p1759_p2, 1, 0 }
   0x8   : > { %p1512_p4 = pneg %p1759_p2  ;;  %p1633_p6 = scmp.ne.s32.totalorder %s2069_s4, %s1632_s7 }
   0x9   : > { %p1639_p10 = scmp.lt.u32.totalorder %s1632_s7, %s2069_s4 }
   0xa   : > { %p1768_p5 = pnand %p2072_p3, %p1512_p4 }
   0xc   : > { %p1634_p7 = pneg %p1768_p5 }
   0xe   : > { %p1635_p8 = pnand %p1634_p7, %p1633_p6 }
  0x10   : > { %p1636_p9 = pneg %p1635_p8 }
  0x12   : > { %p1641_p11 = pnand %p1639_p10, %p1636_p9 }
  0x14   : > { %1644 = shalt.err (!%p1641_p11)
}
  0x15   : > { %s1645_s12 = scalar_lea.vmem %s202_s24, 1024  ;;  %p1653_p1 = scmp.lt.s32.totalorder %s202_s24, %s202_s24 }
  0x16   : > { %p1646_p12 = scmp.ne.s32.totalorder %s202_s24, %s1645_s12  ;;  %p1654_p4 = scmp.lt.s32.totalorder %s1645_s12, %s1645_s12 }
  0x18   : > { %p1648_p13 = pnand %p1646_p12, %p1634_p7  ;;  %p1655_p3 = por %p1654_p4, %p1653_p1 }
  0x1a   : > { %p1649_p0 = pneg %p1648_p13 }
  0x1c   : > { %p1656_p2 = pnand %p1655_p3, %p1649_p0 }
  0x1e   : > { %1659 = shalt.err (!%p1656_p2)
}
  0x1f   : > { %s1706_s13 = smov 64   ;;  %s1707_s14 = smov 4  }
  0x20   : > { %1515 = dma.hbm_to_vmem [thread:$0]  (!%p1768_p5), %s2069_s4, 1024, %s202_s24, [#allocation3], %s1706_s13, %s1706_s13, %s1707_s14  }
  0x21   : > { %s1660_s19 = scalar_lea.hbm %s2070_s5, 16 }
  0x22   : > { %p1661_p6 = scmp.ne.s32.totalorder %s2070_s5, %s1660_s19  ;;  %p1667_p8 = scmp.lt.u32.totalorder %s1660_s19, %s2070_s5 }
  0x24   : > { %p1663_p2 = pnand %p1661_p6, %p1634_p7 }
  0x26   : > { %p1664_p3 = pneg %p1663_p2 }
  0x28   : > { %p1669_p9 = pnand %p1667_p8, %p1664_p3 }
  0x2a   : > { %1672 = shalt.err (!%p1669_p9)
}
  0x2b   : > { %s1673_s24 = scalar_lea.vmem %s1772_s27, 16  ;;  %s1680_s30 = scalar_lea.vmem %s1772_s27, 32 }
  0x2c   : > { %p1674_p10 = scmp.ne.s32.totalorder %s1772_s27, %s1673_s24  ;;  %p1681_p13 = scmp.lt.s32.totalorder %s1772_s27, %s1772_s27 }
  0x2d   : > { %p1682_p0 = scmp.lt.s32.totalorder %s1680_s30, %s1673_s24 }
  0x2e   : > { %p1676_p11 = pnand %p1674_p10, %p1634_p7 }
  0x2f   : > { %p1683_p1 = por %p1682_p0, %p1681_p13 }
  0x30   : > { %p1677_p12 = pneg %p1676_p11 }
  0x32   : > { %p1684_p4 = pnand %p1683_p1, %p1677_p12 }
  0x34   : > { %1687 = shalt.err (!%p1684_p4)
}
  0x35   : > { %1518 = dma.hbm_to_vmem [thread:$0]  (!%p1768_p5), %s2070_s5, 16, %s1772_s27, [#allocation5]  }
  0x36   : > { %p2076_p6 = scmp.ne.s32.totalorder %s2074_s25, 0 }
  0x37   : > { %p2077_p7 = scmp.eq.s32.totalorder (!%p2076_p6), %s1755_s22, 0 }
  0x38   : > { %236 = sbr.rel (%p2076_p6) target bundleno = 2280 (0x8e8), region = 44 }
  0x3f   : > { %1693 = dma.done.wait (%p2077_p7), [#allocation3], 1024   ;;  %p2078_p2 = pmov %p2077_p7 }
  0x41   : > { %1695 = vsyncadd (%p2078_p2), [#allocation3], 4294966272  ;;  %p2079_p3 = pmov %p2078_p2 }
  0x42   : > { %p2080_p8 = pmov %p2078_p2 }
  0x43   : > { %1697 = dma.done.wait (%p2079_p3), [#allocation5], 16  }
  0x44   : > { %1699 = vsyncadd (%p2080_p8), [#allocation5], 4294967280  ;;  %p270_p9 = scmp.lt.s32.totalorder %s1755_s22, 1  ;;  %v1556_v3 = vld [vmem:[%s2068_s3 + $0x4] ss:$12 sps:$4 sm:$0xff]   ;;  %v1708_v5 = vmov 0.0  }
  0x45   : > { %v1558_v4 = vld [vmem:[%s2068_s3] ss:$12 sps:$4 sm:$0xff]   ;;  %1416 = vmatprep.subr.bf16.mxu1 %v1708_v5  ;;  %v1559_v6 = vld [vmem:[%s2068_s3 + $0x8] ss:$12 sps:$4 sm:$0xff]   ;;  %487 = vmatprep.subr.bf16.mxu0 %v1556_v3  ;;  %v1562_v16 = vld [vmem:[%s2068_s3 + $0x18] ss:$12 sps:$4 sm:$0xff]  }
  0x46   : > { %s2082_s22 = smov (!%p270_p9, %s1755_s22), 1  ;;  %v1560_v7 = vld [vmem:[%s2068_s3 + $0x1c] ss:$12 sps:$4 sm:$0xff]   ;;  %488 = vmatpush1.bf16.msra.mxu0 %v1558_v4  ;;  %1417 = vmatpush3.bf16.msra.mxu1 %v1559_v6  ;;  %v1563_v17 = vld [vmem:[%s2068_s3 + $0x20] ss:$12 sps:$4 sm:$0xff]   ;;  %v1709_v31 = vmov 0   ;;  %v571_v4 = vlaneseq }
  0x47   : > { %s1369_s25 = sshll.u32 %s2082_s22, 3  ;;  %489 = vmatprep.subr.bf16.mxu0 %v1560_v7  ;;  %1418 = vmatprep.subr.bf16.mxu1 %v1708_v5  ;;  %v1564_v18 = vld [vmem:[%s2068_s3 + $0x34] ss:$12 sps:$4 sm:$0xff]   ;;  %v1566_v19 = vld [vmem:[%s2068_s3 + $0x30] ss:$12 sps:$4 sm:$0xff]   ;;  %vm1710_vm0 = vmmov 0  }
  0x48   : > { %s274_s9 = scalar_lea.vmem %s2065_s0, %s1369_s25  ;;  %v1567_v20 = vld [vmem:[%s2068_s3 + $0x38] ss:$12 sps:$4 sm:$0xff]   ;;  %v1570_v22 = vld [vmem:[%s2068_s3 + $0x48] ss:$12 sps:$4 sm:$0xff]   ;;  %v1571_v23 = vld [vmem:[%s2068_s3 + $0x50] ss:$12 sps:$4 sm:$0xff]   ;;  %519 = vmatprep.mubr.bf16.mxu0 %v1709_v31  ;;  %1432 = vmatprep.mubr.msk.bf16.mxu1 %vm1710_vm0, %v1708_v5  ;;  %s279_s30 = scalar_lea.vmem %s2071_s6, %s1369_s25 }
  0x49   : > { %v1374_v0 = vld [vmem:[%s274_s9] sm:$0xff]   ;;  %v1568_v21 = vld [vmem:[%s2068_s3 + $0x4c] ss:$12 sps:$4 sm:$0xff]   ;;  %v1575_v26 = vld [vmem:[%s2068_s3 + $0x68] ss:$12 sps:$4 sm:$0xff]   ;;  %vm577_vm1 = vcmask 261120  }
  0x4a   : > { %v1842_v1 = vunpack.c.l.bf16 %v1374_v0  ;;  %v1845_v2 = vunpack.c.h.bf16 %v1374_v0  ;;  %490 = vmatpush1.bf16.msra.mxu0 %v1562_v16  ;;  %1419 = vmatpush3.bf16.msra.mxu1 %v1563_v17  ;;  %v1572_v24 = vld [vmem:[%s2068_s3 + $0x64] ss:$12 sps:$4 sm:$0xff]   ;;  %v1574_v25 = vld [vmem:[%s2068_s3 + $0x60] ss:$12 sps:$4 sm:$0xff]   ;;  %v1576_v27 = vld [vmem:[%s2068_s3 + $0x7c] ss:$12 sps:$4 sm:$0xff]  }
  0x4b   : > { %1420 = vmatprep.subr.bf16.mxu1 %v1708_v5  ;;  %491 = vmatprep.subr.bf16.mxu0 %v1564_v18  ;;  %v1578_v28 = vld [vmem:[%s2068_s3 + $0x78] ss:$12 sps:$4 sm:$0xff]   ;;  %v1579_v29 = vld [vmem:[%s2068_s3 + $0x80] ss:$12 sps:$4 sm:$0xff]   ;;  %v1582_v32 = vld [vmem:[%s2068_s3 + $0x90] ss:$12 sps:$4 sm:$0xff]  }
  0x4c   : > { %287 = vadd.xlane.f32.xlu0 %v1842_v1  ;;  %v1580_v30 = vld [vmem:[%s2068_s3 + $0x94] ss:$12 sps:$4 sm:$0xff]   ;;  %v1583_v33 = vld [vmem:[%s2068_s3 + $0x98] ss:$12 sps:$4 sm:$0xff]   ;;  %v1587_v36 = vld [vmem:[%s2068_s3 + $0xb0] ss:$12 sps:$4 sm:$0xff]  }
  0x4d   : > { %v1584_v34 = vld [vmem:[%s2068_s3 + $0xac] ss:$12 sps:$4 sm:$0xff]   ;;  %v1586_v35 = vld [vmem:[%s2068_s3 + $0xa8] ss:$12 sps:$4 sm:$0xff]   ;;  %v1322_v45 = vld [vmem:[%s2066_s1] ss:$0 sm:$0xff] }
  0x4e   : > { %492 = vmatpush1.bf16.msra.mxu0 %v1566_v19  ;;  %1421 = vmatpush3.bf16.msra.mxu1 %v1567_v20  ;;  %v1323_v49 = vld [vmem:[%s2067_s2] ss:$0 sm:$0xff]  ;;  %v1963_v6 = vand.u32 127, %v571_v4  ;;  %vm629_vm3 = vcmask 130048   ;;  %s1711_s20 = smov 96   ;;  %s1712_s23 = smov 64  }
  0x4f   : > { %1422 = vmatprep.subr.bf16.mxu1 %v1708_v5  ;;  %493 = vmatprep.subr.bf16.mxu0 %v1568_v21  ;;  %s1713_s26 = smov 32   ;;  %vm1101_vm4 = vcmask 523264   ;;  %vm1104_vm5 = vcmask 785408  }
  0x50   : > { %289 = vadd.xlane.f32.xlu0 %v1845_v2  ;;  %vm573_vm2 = vcmp.lt.s32.totalorder %v1963_v6, 9 }
  0x52   : > { %494 = vmatpush1.bf16.msra.mxu0 %v1570_v22  ;;  %1423 = vmatpush3.bf16.msra.mxu1 %v1571_v23 }
  0x53   : > { %1424 = vmatprep.subr.bf16.mxu1 %v1708_v5  ;;  %495 = vmatprep.subr.bf16.mxu0 %v1572_v24 }
  0x56   : > { %496 = vmatpush1.bf16.msra.mxu0 %v1574_v25  ;;  %1425 = vmatpush3.bf16.msra.mxu1 %v1575_v26 }
  0x57   : > { %497 = vmatprep.subr.bf16.mxu0 %v1576_v27  ;;  %1426 = vmatprep.subr.bf16.mxu1 %v1708_v5 }
  0x5a   : > { %498 = vmatpush1.bf16.msra.mxu0 %v1578_v28  ;;  %1427 = vmatpush3.bf16.msra.mxu1 %v1579_v29 }
  0x5b   : > { %499 = vmatprep.subr.bf16.mxu0 %v1580_v30  ;;  %1428 = vmatprep.subr.bf16.mxu1 %v1708_v5 }
  0x5e   : > { %500 = vmatpush1.bf16.msra.mxu0 %v1582_v32  ;;  %1429 = vmatpush3.bf16.msra.mxu1 %v1583_v33 }
  0x5f   : > { %501 = vmatprep.subr.bf16.mxu0 %v1584_v34  ;;  %1430 = vmatprep.subr.bf16.mxu1 %v1708_v5 }
  0x62   : > { %502 = vmatpush1.bf16.msra.mxu0 %v1586_v35  ;;  %1431 = vmatpush3.bf16.msra.mxu1 %v1587_v36 }
  0x63   : > { %1436 = vmatprep.subr.bf16.mxu1 %v1708_v5  ;;  %1460 = vmatprep.subr.bf16.mxu0 %v1708_v5 }
  0xd9   : > { %v288_v8 = vpop.xlane.xlu0 %287 }
  0xda   : > { %v292_v9 = vmul.f32 0.0078125, %v288_v8 }
  0xdc   : > { %v1863_v10 = vsub.f32 %v1842_v1, %v292_v9 }
  0xdd   : > { %v290_v11 = vpop.xlane.xlu0 %289 }
  0xde   : > { %v293_v12 = vmul.f32 0.0078125, %v290_v11  ;;  %v296_v13 = vmul.f32 %v1863_v10, %v1863_v10 }
  0xe0   : > { %v1868_v14 = vsub.f32 %v1845_v2, %v293_v12  ;;  %298 = vadd.xlane.f32.xlu1 %v296_v13 }
  0xe2   : > { %v297_v15 = vmul.f32 %v1868_v14, %v1868_v14 }
  0xe4   : > { %300 = vadd.xlane.f32.xlu1 %v297_v15 }
 0x16d   : > { %v299_v37 = vpop.xlane.xlu1 %298 }
 0x16e   : > { %v302_v38 = vmul.f32 0.0078125, %v299_v37 }
 0x170   : > { %v304_v39 = vadd.f32 1e-05, %v302_v38 }
 0x171   : > { %v301_v40 = vpop.xlane.xlu1 %300 }
 0x172   : > { %1596 = vrsqrt.f32 %v304_v39  ;;  %v303_v41 = vmul.f32 0.0078125, %v301_v40 }
 0x174   : > { %v305_v42 = vadd.f32 1e-05, %v303_v41 }
 0x176   : > { %1598 = vrsqrt.f32 %v305_v42 }
 0x17c   : > { %v1597_v43 = vpop.eup %1596 }
 0x17d   : > { %v308_v44 = vmul.f32 %v1597_v43, %v1863_v10 }
 0x17f   : > { %v316_v48 = vmul.f32 %v1322_v45, %v308_v44 }
 0x180   : > { %v1599_v46 = vpop.eup %1598 }
 0x181   : > { %v309_v47 = vmul.f32 %v1599_v46, %v1868_v14  ;;  %v324_v51 = vadd.f32 %v1323_v49, %v316_v48 }
 0x183   : > { %v317_v50 = vmul.f32 %v1322_v45, %v309_v47 }
 0x185   : > { %v325_v52 = vadd.f32 %v1323_v49, %v317_v50 }
 0x187   : > { %v326_v53 = vpack.c.bf16 %v325_v52, %v324_v51 }
 0x189   : > { %520 = vmatmul.mubr.bf16.vlgmr.msra.gmra.mrb[0].mxu0 %v326_v53  ;;  %1433 = vmatmul.mubr.bf16.vlgmr.msra.gmra.mrb[0].mxu1 %v326_v53 }
 0x18a   : > { %1438 = vmatprep.mubr.msk.bf16.mxu1 %vm1710_vm0, %v1708_v5  ;;  %1462 = vmatprep.mubr.msk.bf16.mxu0 %vm1710_vm0, %v1708_v5 }
 0x25c   : > { %v521_v54 = vpop.f32.mrb[0].mxu0  ;;  %v564_v55 = vpop.f32.mrb[0].mxu1 }
 0x25d   : > { %v523_v56 = vpop.f32.mrb[1].mxu0  ;;  %v1434_v57 = vpop.f32.mrb[1].mxu1 }
 0x25e   : > { %v525_v58 = vpop.f32.mrb[2].mxu0  ;;  %v567_v59 = vpop.f32.mrb[2].mxu1 }
 0x25f   : > { %v574_v60 = vpack.c.bf16 %v525_v58, %v521_v54  ;;  %v1954_v61 = vpack.c.bf16 %v567_v59, %v564_v55  ;;  %v527_v62 = vpop.f32.mrb[3].mxu0  ;;  %v1435_v63 = vpop.f32.mrb[3].mxu1 }
 0x260   : > { %v575_v0 = vpack.c.bf16 %v527_v62, %v523_v56 }
 0x262   : > { %v582_v3 = vsel %vm577_vm1, %v575_v0, 0 }
 0x263   : > { %1437 = vmatpush3.bf16.xpose.msra.mxu1 %v582_v3 }
 0x264   : > { %1442 = vmatprep.subr.bf16.mxu1 %v1708_v5 }
 0x26a   : > { %1439 = vmatmul.mubr.msk.bf16.vlgmr.msra.gmra.mrb[4].mxu1 %vm577_vm1, %v574_v60 }
 0x26b   : > { %1443 = vmatpush3.bf16.msra.mxu1 %v1954_v61  ;;  %1444 = vmatprep.mubr.msk.bf16.mxu1 %vm1710_vm0, %v1708_v5 }
 0x26c   : > { %1448 = vmatprep.subr.bf16.mxu1 %v1708_v5 }
 0x33d   : > { %v618_v7 = vpop.f32.mrb[4].mxu1 }
 0x33e   : > { %v625_v8 = vmul.f32 0.088388346, %v618_v7  ;;  %v1440_v9 = vpop.f32.mrb[5].mxu1 }
 0x33f   : > { %v621_v10 = vpop.f32.mrb[6].mxu1 }
 0x340   : > { %v626_v11 = vmul.f32 0.088388346, %v621_v10  ;;  %v1441_v12 = vpop.f32.mrb[7].mxu1  ;;  %v627_v13 = vsel %vm573_vm2, %v625_v8, -1e+30 }
 0x341   : > { %v630_v14 = vsel %vm629_vm3, %v627_v13, -inf }
 0x342   : > { %631 = vmax.xlane.f32.xlu0 %v630_v14  ;;  %v628_v15 = vsel %vm573_vm2, %v626_v11, -1e+30 }
 0x343   : > { %v633_v16 = vsel %vm629_vm3, %v628_v15, -inf }
 0x344   : > { %634 = vmax.xlane.f32.xlu1 %v633_v16 }
 0x3cf   : > { %v632_v17 = vpop.xlane.xlu0 %631 }
 0x3d0   : > { %v636_v18 = vsub.f32 %v627_v13, %v632_v17 }
 0x3d1   : > { %v635_v19 = vpop.xlane.xlu1 %634 }
 0x3d2   : > { %v638_v20 = vmul.f32 1.442695, %v636_v18  ;;  %v637_v21 = vsub.f32 %v628_v15, %v635_v19 }
 0x3d4   : > { %1600 = vpow2.f32 %v638_v20  ;;  %v640_v22 = vmul.f32 1.442695, %v637_v21 }
 0x3d6   : > { %1602 = vpow2.f32 %v640_v22 }
 0x3de   : > { %v1601_v23 = vpop.eup %1600 }
 0x3df   : > { %v642_v24 = vsel %vm629_vm3, %v1601_v23, 0.0 }
 0x3e0   : > { %v1603_v25 = vpop.eup %1602  ;;  %643 = vadd.xlane.f32.xlu0 %v642_v24 }
 0x3e1   : > { %v645_v26 = vsel %vm629_vm3, %v1603_v25, 0.0 }
 0x3e2   : > { %646 = vadd.xlane.f32.xlu1 %v645_v26 }
 0x3f3   : > { %698 = vrot.lane.b32.xlu1 %v574_v60, %s1711_s20 }
 0x3f6   : > { %701 = vrot.lane.b32.xlu0 %v575_v0, %s1711_s20 }
 0x3f7   : > { %827 = vrot.lane.b32.xlu1 %v575_v0, %s1712_s23 }
 0x3fa   : > { %952 = vrot.lane.b32.xlu0 %v575_v0, %s1713_s26 }
 0x3fb   : > { %825 = vrot.lane.b32.xlu1 %v574_v60, %s1712_s23 }
 0x3ff   : > { %950 = vrot.lane.b32.xlu1 %v574_v60, %s1713_s26 }
 0x46d   : > { %v644_v27 = vpop.xlane.xlu0 %643 }
 0x46e   : > { %1604 = vrcp.f32 %v644_v27 }
 0x46f   : > { %v647_v28 = vpop.xlane.xlu1 %646 }
 0x470   : > { %1606 = vrcp.f32 %v647_v28 }
 0x471   : > { %v702_v30 = vpop.permute.xlu0 %701 }
 0x472   : > { %v707_v39 = vsel %vm577_vm1, %v702_v30, 0 }
 0x473   : > { %v699_v29 = vpop.permute.xlu1 %698 }
 0x475   : > { %v953_v37 = vpop.permute.xlu0 %952 }
 0x476   : > { %v958_v41 = vsel %vm577_vm1, %v953_v37, 0 }
 0x477   : > { %v828_v31 = vpop.permute.xlu1 %827 }
 0x478   : > { %v1605_v32 = vpop.eup %1604  ;;  %v833_v33 = vsel %vm577_vm1, %v828_v31, 0 }
 0x479   : > { %1461 = vmatpush3.bf16.xpose.msra.mxu0 %v833_v33  ;;  %v650_v35 = vmul.f32 %v1605_v32, %v1601_v23 }
 0x47a   : > { %v1607_v34 = vpop.eup %1606  ;;  %1472 = vmatprep.subr.bf16.mxu0 %v1708_v5 }
 0x47b   : > { %v651_v36 = vmul.f32 %v1607_v34, %v1603_v25  ;;  %v826_v40 = vpop.permute.xlu1 %825 }
 0x47d   : > { %v652_v38 = vpack.c.bf16 %v651_v36, %v650_v35 }
 0x47f   : > { %1445 = vmatmul.mubr.msk.bf16.vlgmr.msra.gmra.mrb[8].mxu1 %vm629_vm3, %v652_v38  ;;  %v951_v42 = vpop.permute.xlu1 %950 }
 0x480   : > { %1449 = vmatpush3.bf16.xpose.msra.mxu1 %v707_v39  ;;  %1463 = vmatmul.mubr.msk.bf16.vlgmr.msra.gmra.mrb[4].mxu0 %vm577_vm1, %v826_v40 }
 0x481   : > { %1473 = vmatpush3.bf16.xpose.msra.mxu0 %v958_v41  ;;  %1450 = vmatprep.mubr.msk.bf16.mxu1 %vm1710_vm0, %v1708_v5 }
 0x482   : > { %1474 = vmatprep.mubr.msk.bf16.mxu0 %vm1710_vm0, %v1708_v5  ;;  %1454 = vmatprep.subr.bf16.mxu1 %v1708_v5 }
 0x483   : > { %1484 = vmatprep.subr.bf16.mxu0 %v1708_v5 }
 0x487   : > { %1451 = vmatmul.mubr.msk.bf16.vlgmr.msra.gmra.mrb[12].mxu1 %vm577_vm1, %v699_v29 }
 0x488   : > { %1475 = vmatmul.mubr.msk.bf16.vlgmr.msra.gmra.mrb[8].mxu0 %vm577_vm1, %v951_v42  ;;  %1456 = vmatprep.mubr.msk.bf16.mxu1 %vm1710_vm0, %v1708_v5 }
 0x489   : > { %1500 = vmatprep.mubr.msk.bf16.mxu0 %vm1710_vm0, %v1708_v5 }
 0x552   : > { %v1998_v43 = vpop.f32.mrb[8].mxu1 }
 0x553   : > { %v1446_v44 = vpop.f32.mrb[9].mxu1  ;;  %v869_v45 = vpop.f32.mrb[4].mxu0 }
 0x554   : > { %v2000_v46 = vpop.f32.mrb[10].mxu1  ;;  %v1464_v47 = vpop.f32.mrb[5].mxu0  ;;  %v876_v52 = vmul.f32 0.088388346, %v869_v45 }
 0x555   : > { %v1447_v48 = vpop.f32.mrb[11].mxu1  ;;  %v872_v49 = vpop.f32.mrb[6].mxu0 }
 0x556   : > { %v1465_v50 = vpop.f32.mrb[7].mxu0  ;;  %v877_v4 = vmul.f32 0.088388346, %v872_v49  ;;  %v878_v8 = vsel %vm573_vm2, %v876_v52, -1e+30 }
 0x557   : > { %v880_v11 = vsel %vm629_vm3, %v878_v8, -inf }
 0x558   : > { %v879_v13 = vsel %vm573_vm2, %v877_v4, -1e+30 }
 0x559   : > { %v883_v15 = vsel %vm629_vm3, %v879_v13, -inf }
 0x55a   : > { %v743_v51 = vpop.f32.mrb[12].mxu1 }
 0x55b   : > { %v750_v53 = vmul.f32 0.088388346, %v743_v51  ;;  %v1452_v54 = vpop.f32.mrb[13].mxu1  ;;  %v994_v55 = vpop.f32.mrb[8].mxu0 }
 0x55c   : > { %v746_v56 = vpop.f32.mrb[14].mxu1  ;;  %v1476_v57 = vpop.f32.mrb[9].mxu0  ;;  %v1001_v12 = vmul.f32 0.088388346, %v994_v55 }
 0x55d   : > { %v751_v58 = vmul.f32 0.088388346, %v746_v56  ;;  %v1453_v59 = vpop.f32.mrb[15].mxu1  ;;  %v997_v60 = vpop.f32.mrb[10].mxu0  ;;  %v752_v62 = vsel %vm573_vm2, %v750_v53, -1e+30 }
 0x55e   : > { %v1002_v63 = vmul.f32 0.088388346, %v997_v60  ;;  %v1477_v0 = vpop.f32.mrb[11].mxu0  ;;  %v754_v3 = vsel %vm629_vm3, %v752_v62, -inf  ;;  %v1003_v16 = vsel %vm573_vm2, %v1001_v12, -1e+30 }
 0x55f   : > { %755 = vmax.xlane.f32.xlu0 %v754_v3  ;;  %v753_v7 = vsel %vm573_vm2, %v751_v58, -1e+30  ;;  %v1005_v17 = vsel %vm629_vm3, %v1003_v16, -inf }
 0x560   : > { %v757_v9 = vsel %vm629_vm3, %v753_v7, -inf  ;;  %v1004_v10 = vsel %vm573_vm2, %v1002_v63, -1e+30 }
 0x561   : > { %758 = vmax.xlane.f32.xlu1 %v757_v9  ;;  %v1008_v14 = vsel %vm629_vm3, %v1004_v10, -inf }
 0x563   : > { %881 = vmax.xlane.f32.xlu0 %v880_v11 }
 0x565   : > { %1009 = vmax.xlane.f32.xlu1 %v1008_v14  ;;  %v1589_v14 = vld [vmem:[#allocation2 + $0x8] sm:$0xff]  }
 0x567   : > { %884 = vmax.xlane.f32.xlu0 %v883_v15  ;;  %v1590_v15 = vld [vmem:[#allocation2 + $0x10] sm:$0xff]  }
 0x56b   : > { %1006 = vmax.xlane.f32.xlu0 %v1005_v17  ;;  %v1592_v17 = vld [vmem:[#allocation2 + $0x20] sm:$0xff]  }
 0x5ec   : > { %v756_v18 = vpop.xlane.xlu0 %755 }
 0x5ed   : > { %v760_v27 = vsub.f32 %v752_v62, %v756_v18 }
 0x5ee   : > { %v759_v19 = vpop.xlane.xlu1 %758 }
 0x5ef   : > { %v761_v28 = vsub.f32 %v753_v7, %v759_v19  ;;  %v762_v32 = vmul.f32 1.442695, %v760_v27  ;;  %v1595_v27 = vld [vmem:[#allocation2 + $0x38] sm:$0xff]  }
 0x5f0   : > { %v882_v20 = vpop.xlane.xlu0 %881 }
 0x5f1   : > { %v886_v21 = vsub.f32 %v878_v8, %v882_v20  ;;  %v764_v33 = vmul.f32 1.442695, %v761_v28  ;;  %v1593_v20 = vld [vmem:[#allocation2 + $0x28] sm:$0xff]  }
 0x5f2   : > { %v1010_v22 = vpop.xlane.xlu1 %1009 }
 0x5f3   : > { %v888_v23 = vmul.f32 1.442695, %v886_v21  ;;  %v1012_v24 = vsub.f32 %v1004_v10, %v1010_v22 }
 0x5f4   : > { %v885_v25 = vpop.xlane.xlu0 %884 }
 0x5f5   : > { %1608 = vpow2.f32 %v888_v23  ;;  %v887_v26 = vsub.f32 %v879_v13, %v885_v25  ;;  %v1015_v29 = vmul.f32 1.442695, %v1012_v24  ;;  %v1588_v13 = vld [vmem:[#allocation2] sm:$0xff]   ;;  %v1594_v24 = vld [vmem:[#allocation2 + $0x30] sm:$0xff]  }
 0x5f6   : > { %1485 = vmatpush3.bf16.msra.mxu0 %v1588_v13 }
 0x5f7   : > { %v890_v30 = vmul.f32 1.442695, %v887_v26  ;;  %1486 = vmatprep.subr.bf16.mxu0 %v1708_v5 }
 0x5f8   : > { %v1007_v31 = vpop.xlane.xlu0 %1006 }
 0x5f9   : > { %1610 = vpow2.f32 %v890_v30  ;;  %v1011_v6 = vsub.f32 %v1003_v16, %v1007_v31  ;;  %v1591_v16 = vld [vmem:[#allocation2 + $0x18] sm:$0xff]  }
 0x5fa   : > { %1612 = vpow2.f32 %v1015_v29  ;;  %1487 = vmatpush3.bf16.msra.mxu0 %v1589_v14 }
 0x5fb   : > { %v1013_v34 = vmul.f32 1.442695, %v1011_v6  ;;  %1488 = vmatprep.subr.bf16.mxu0 %v1708_v5 }
 0x5fd   : > { %1614 = vpow2.f32 %v1013_v34 }
 0x5fe   : > { %1616 = vpow2.f32 %v762_v32  ;;  %1489 = vmatpush3.bf16.msra.mxu0 %v1590_v15 }
 0x5ff   : > { %v1609_v35 = vpop.eup %1608  ;;  %1618 = vpow2.f32 %v764_v33  ;;  %1490 = vmatprep.subr.bf16.mxu0 %v1708_v5 }
 0x600   : > { %v892_v36 = vsel %vm629_vm3, %v1609_v35, 0.0 }
 0x601   : > { %893 = vadd.xlane.f32.xlu0 %v892_v36 }
 0x602   : > { %1491 = vmatpush3.bf16.msra.mxu0 %v1591_v16 }
 0x603   : > { %v1611_v37 = vpop.eup %1610  ;;  %1492 = vmatprep.subr.bf16.mxu0 %v1708_v5 }
 0x604   : > { %v895_v38 = vsel %vm629_vm3, %v1611_v37, 0.0  ;;  %v1613_v39 = vpop.eup %1612 }
 0x605   : > { %896 = vadd.xlane.f32.xlu1 %v895_v38  ;;  %v1020_v44 = vsel %vm629_vm3, %v1613_v39, 0.0 }
 0x606   : > { %1493 = vmatpush3.bf16.msra.mxu0 %v1592_v17 }
 0x607   : > { %v1615_v40 = vpop.eup %1614  ;;  %1494 = vmatprep.subr.bf16.mxu0 %v1708_v5 }
 0x608   : > { %v1617_v41 = vpop.eup %1616  ;;  %v1017_v42 = vsel %vm629_vm3, %v1615_v40, 0.0 }
 0x609   : > { %v1619_v45 = vpop.eup %1618  ;;  %1018 = vadd.xlane.f32.xlu0 %v1017_v42  ;;  %1021 = vadd.xlane.f32.xlu1 %v1020_v44  ;;  %v766_v47 = vsel %vm629_vm3, %v1617_v41, 0.0 }
 0x60a   : > { %v769_v48 = vsel %vm629_vm3, %v1619_v45, 0.0  ;;  %1495 = vmatpush3.bf16.msra.mxu0 %v1593_v20 }
 0x60b   : > { %1496 = vmatprep.subr.bf16.mxu0 %v1708_v5 }
 0x60d   : > { %767 = vadd.xlane.f32.xlu0 %v766_v47  ;;  %770 = vadd.xlane.f32.xlu1 %v769_v48 }
 0x60e   : > { %1497 = vmatpush3.bf16.msra.mxu0 %v1594_v24 }
 0x60f   : > { %1498 = vmatprep.subr.bf16.mxu0 %v1708_v5 }
 0x612   : > { %1499 = vmatpush3.bf16.msra.mxu0 %v1595_v27 }
 0x61e   : > { %903 = vrot.lane.b32.xlu1 %v1954_v61, %s1712_s23 }
 0x622   : > { %1028 = vrot.lane.b32.xlu1 %v1954_v61, %s1713_s26 }
 0x623   : > { %778 = vrot.lane.b32.xlu0 %v1954_v61, %s1711_s20 }
 0x68e   : > { %v894_v49 = vpop.xlane.xlu0 %893 }
 0x692   : > { %v897_v50 = vpop.xlane.xlu1 %896 }
 0x696   : > { %v1019_v51 = vpop.xlane.xlu0 %1018  ;;  %v1022_v52 = vpop.xlane.xlu1 %1021 }
 0x69a   : > { %v768_v53 = vpop.xlane.xlu0 %767  ;;  %v771_v54 = vpop.xlane.xlu1 %770 }
 0x69b   : > { %1620 = vrcp.f32 %v768_v53 }
 0x69c   : > { %1622 = vrcp.f32 %v771_v54 }
 0x69d   : > { %1624 = vrcp.f32 %v897_v50 }
 0x69e   : > { %v779_v55 = vpop.permute.xlu0 %778  ;;  %1626 = vrcp.f32 %v894_v49  ;;  %v904_v62 = vpop.permute.xlu1 %903 }
 0x69f   : > { %1455 = vmatpush3.bf16.msra.mxu1 %v779_v55  ;;  %1628 = vrcp.f32 %v1019_v51 }
 0x6a0   : > { %1466 = vmatprep.subr.bf16.mxu1 %v1708_v5  ;;  %1630 = vrcp.f32 %v1022_v52  ;;  %v1356_v52 = vld [vmem:[#allocation4] ss:$0 sm:$0xff] }
 0x6a2   : > { %v1029_v9 = vpop.permute.xlu1 %1028 }
 0x6a5   : > { %v1621_v56 = vpop.eup %1620 }
 0x6a6   : > { %v1623_v57 = vpop.eup %1622  ;;  %v774_v58 = vmul.f32 %v1621_v56, %v1617_v41 }
 0x6a7   : > { %v775_v59 = vmul.f32 %v1623_v57, %v1619_v45  ;;  %v1625_v60 = vpop.eup %1624 }
 0x6a8   : > { %v1627_v63 = vpop.eup %1626  ;;  %v901_v0 = vmul.f32 %v1625_v60, %v1611_v37 }
 0x6a9   : > { %v776_v61 = vpack.c.bf16 %v775_v59, %v774_v58  ;;  %v900_v3 = vmul.f32 %v1627_v63, %v1609_v35  ;;  %v1629_v4 = vpop.eup %1628 }
 0x6aa   : > { %v1631_v8 = vpop.eup %1630  ;;  %v1025_v10 = vmul.f32 %v1629_v4, %v1615_v40 }
 0x6ab   : > { %1457 = vmatmul.mubr.msk.bf16.vlgmr.msra.gmra.mrb[16].mxu1 %vm629_vm3, %v776_v61  ;;  %v902_v7 = vpack.c.bf16 %v901_v0, %v900_v3  ;;  %v1026_v11 = vmul.f32 %v1631_v8, %v1613_v39 }
 0x6ac   : > { %1467 = vmatpush3.bf16.msra.mxu1 %v904_v62  ;;  %1468 = vmatprep.mubr.msk.bf16.mxu1 %vm1710_vm0, %v1708_v5 }
 0x6ad   : > { %1478 = vmatprep.subr.bf16.mxu1 %v1708_v5  ;;  %v1027_v12 = vpack.c.bf16 %v1026_v11, %v1025_v10 }
 0x6b3   : > { %1469 = vmatmul.mubr.msk.bf16.vlgmr.msra.gmra.mrb[20].mxu1 %vm629_vm3, %v902_v7 }
 0x6b4   : > { %1479 = vmatpush3.bf16.msra.mxu1 %v1029_v9  ;;  %1480 = vmatprep.mubr.msk.bf16.mxu1 %vm1710_vm0, %v1708_v5 }
 0x6bb   : > { %1481 = vmatmul.mubr.msk.bf16.vlgmr.msra.gmra.mrb[24].mxu1 %vm629_vm3, %v1027_v12 }
 0x77e   : > { %v818_v18 = vpop.f32.mrb[16].mxu1 }
 0x77f   : > { %v1458_v19 = vpop.f32.mrb[17].mxu1 }
 0x780   : > { %v821_v21 = vpop.f32.mrb[18].mxu1 }
 0x781   : > { %v1541_v22 = vpack.i.bf16 %v821_v21, %v818_v18  ;;  %v1459_v23 = vpop.f32.mrb[19].mxu1 }
 0x783   : > { %1542 = vrot.lane.b32.xlu1 %v1541_v22, %s1713_s26 }
 0x786   : > { %v943_v25 = vpop.f32.mrb[20].mxu1 }
 0x787   : > { %v1470_v26 = vpop.f32.mrb[21].mxu1 }
 0x788   : > { %v946_v28 = vpop.f32.mrb[22].mxu1 }
 0x789   : > { %v1546_v29 = vpack.i.bf16 %v946_v28, %v943_v25  ;;  %v1471_v30 = vpop.f32.mrb[23].mxu1 }
 0x78b   : > { %1547 = vrot.lane.b32.xlu0 %v1546_v29, %s1712_s23 }
 0x78e   : > { %v1068_v31 = vpop.f32.mrb[24].mxu1 }
 0x78f   : > { %v1482_v6 = vpop.f32.mrb[25].mxu1 }
 0x790   : > { %v1071_v32 = vpop.f32.mrb[26].mxu1 }
 0x791   : > { %v1551_v33 = vpack.i.bf16 %v1071_v32, %v1068_v31  ;;  %v1483_v34 = vpop.f32.mrb[27].mxu1 }
 0x793   : > { %1552 = vrot.lane.b32.xlu1 %v1551_v33, %s1711_s20 }
 0x7f5   : > { %v1543_v35 = vpop.permute.xlu1 %1542 }
 0x7f6   : > { %v1545_v37 = vunpack.i.h.bf16 %v1543_v35  ;;  %v1544_v38 = vunpack.i.l.bf16 %v1543_v35 }
 0x7f8   : > { %v1100_v41 = vsel %vm577_vm1, %v2000_v46, %v1545_v37  ;;  %v1099_v42 = vsel %vm577_vm1, %v1998_v43, %v1544_v38 }
 0x7fd   : > { %v1548_v36 = vpop.permute.xlu0 %1547 }
 0x7fe   : > { %v1550_v5 = vunpack.i.h.bf16 %v1548_v36  ;;  %v1549_v39 = vunpack.i.l.bf16 %v1548_v36 }
 0x800   : > { %v1103_v47 = vsel %vm1101_vm4, %v1100_v41, %v1550_v5  ;;  %v1102_v48 = vsel %vm1101_vm4, %v1099_v42, %v1549_v39 }
 0x805   : > { %v1553_v40 = vpop.permute.xlu1 %1552 }
 0x806   : > { %v1555_v44 = vunpack.i.h.bf16 %v1553_v40  ;;  %v1554_v45 = vunpack.i.l.bf16 %v1553_v40 }
 0x808   : > { %v1106_v49 = vsel %vm1104_vm5, %v1103_v47, %v1555_v44  ;;  %v1105_v50 = vsel %vm1104_vm5, %v1102_v48, %v1554_v45 }
 0x809   : > { %v1107_v51 = vpack.c.bf16 %v1106_v49, %v1105_v50 }
 0x80b   : > { %1501 = vmatmul.mubr.bf16.vlgmr.msra.gmra.mrb[12].mxu0 %v1107_v51 }
 0x8de   : > { %v1213_v53 = vpop.f32.mrb[12].mxu0 }
 0x8df   : > { %v1214_v54 = vadd.f32 %v1356_v52, %v1213_v53  ;;  %v1502_v55 = vpop.f32.mrb[13].mxu0 }
 0x8e0   : > { %v1216_v56 = vpop.f32.mrb[14].mxu0 }
 0x8e1   : > { %v1217_v57 = vadd.f32 %v1356_v52, %v1216_v56  ;;  %v1503_v58 = vpop.f32.mrb[15].mxu0  ;;  %v1220_v46 = vadd.f32 %v1842_v1, %v1214_v54 }
 0x8e3   : > { %v1221_v43 = vadd.f32 %v1845_v2, %v1217_v57 }
 0x8e5   : > { %v1380_v59 = vpack.c.bf16 %v1221_v43, %v1220_v46 }
 0x8e7   : > { %1381 = vst [vmem:[%s279_s30] sm:$0xff] %v1380_v59  }
 0x8e8 PF: > { %s18_s21 = sadd.s32 1, %s1702_s21  }
 0x8e9   : > { %p15_p5 = scmp.ge.s32.totalorder %s18_s21, 4  }
 0x8eb   :  { %17 = sbr.rel (!%p15_p5) target bundleno = 2 (0x2), region = 83 }
 0x8f2   :  { %1253 = vsyncpa [#allocation3], 1 }
 0x8f3   :  { %1255 = vsyncpa [#allocation3 + $0x1], 1 }
 0x8f4   :  { %1256 = vsyncpa [#allocation5], 1 }

// kernel: transformer_forward.12
= control target key start
LH: loop header
LB: loop body
LE: loop exit
PB: predicated region body
PF: predicated region fallthrough
CT: control target
= control target key end

     0   :  { %s1604_s21 = smov 0   ;;  %s1870_s0 = inlined_call_operand.vmem [shape: bf16[2,16,128], index: 0, kind: input, shape index: {}]   ;;  %s1871_s1 = inlined_call_operand.vmem [shape: f32[1,128], index: 1, kind: input, shape index: {}]   ;;  %s1872_s2 = inlined_call_operand.vmem [shape: f32[1,128], index: 2, kind: input, shape index: {}]   ;;  %s1873_s3 = inlined_call_operand.vmem [shape: bf16[128,384], index: 3, kind: input, shape index: {}]   ;;  %s1874_s4 = inlined_call_operand.vmem [shape: bf16[128,128], index: 4, kind: input, shape index: {}]   ;;  %s1875_s5 = inlined_call_operand.vmem [shape: f32[1,128], index: 5, kind: input, shape index: {}]   ;;  %s1876_s6 = inlined_call_operand.vmem [shape: bf16[2,16,128], index: 6, kind: output, shape index: {}]  }
   0x1 LB: > { %s1259_s22 = sadd.s32 4294967295, %s1561_s21   ;;  %p1263_p0 = scmp.ge.s32.totalorder %s1561_s21, 1  ;;  %s1561_s21 = sphi %s1604_s21, %s16_s21  }
   0x2   : > { %p212_p1 = scmp.lt.s32.totalorder %s1561_s21, 3 }
   0x4   : > { %p213_p2 = pnand %p1263_p0, %p212_p1 }
   0x5   : > { %p242_p3 = scmp.lt.s32.totalorder (!%p213_p2), %s1259_s22, 1  ;;  %v1479_v3 = vld [vmem:[%s1873_s3 + $0x4] ss:$12 sps:$4 sm:$0xff] (!%p213_p2)   ;;  %v1481_v4 = vld [vmem:[%s1873_s3] ss:$12 sps:$4 sm:$0xff] (!%p213_p2)   ;;  %v1563_v5 = vmov (!%p213_p2), 0.0  }
   0x6   : > { %216 = sbr.rel (%p213_p2) target bundleno = 2223 (0x8af), region = 44  ;;  %1362 = vmatprep.subr.bf16.mxu1 (!%p213_p2), %v1563_v5  ;;  %v1482_v6 = vld [vmem:[%s1873_s3 + $0x8] ss:$12 sps:$4 sm:$0xff] (!%p213_p2)   ;;  %459 = vmatprep.subr.bf16.mxu0 (!%p213_p2), %v1479_v3  ;;  %v1485_v16 = vld [vmem:[%s1873_s3 + $0x18] ss:$12 sps:$4 sm:$0xff] (!%p213_p2)   ;;  %v1564_v31 = vmov (!%p213_p2), 0  }
   0x7   : > { %v1483_v7 = vld [vmem:[%s1873_s3 + $0x1c] ss:$12 sps:$4 sm:$0xff] (!%p213_p2)   ;;  %460 = vmatpush1.bf16.msra.mxu0 (!%p213_p2), %v1481_v4  ;;  %1363 = vmatpush3.bf16.msra.mxu1 (!%p213_p2), %v1482_v6  ;;  %v1486_v17 = vld [vmem:[%s1873_s3 + $0x20] ss:$12 sps:$4 sm:$0xff] (!%p213_p2)   ;;  %v1490_v20 = vld [vmem:[%s1873_s3 + $0x38] ss:$12 sps:$4 sm:$0xff] (!%p213_p2)   ;;  %v543_v4 = vlaneseq (!%p213_p2) }
   0x8   : > { %461 = vmatprep.subr.bf16.mxu0 (!%p213_p2), %v1483_v7  ;;  %1364 = vmatprep.subr.bf16.mxu1 (!%p213_p2), %v1563_v5  ;;  %v1487_v18 = vld [vmem:[%s1873_s3 + $0x34] ss:$12 sps:$4 sm:$0xff] (!%p213_p2)   ;;  %v1489_v19 = vld [vmem:[%s1873_s3 + $0x30] ss:$12 sps:$4 sm:$0xff] (!%p213_p2)   ;;  %v1491_v21 = vld [vmem:[%s1873_s3 + $0x4c] ss:$12 sps:$4 sm:$0xff] (!%p213_p2)  }
   0x9   : > { %v1493_v22 = vld [vmem:[%s1873_s3 + $0x48] ss:$12 sps:$4 sm:$0xff] (!%p213_p2)   ;;  %v1494_v23 = vld [vmem:[%s1873_s3 + $0x50] ss:$12 sps:$4 sm:$0xff] (!%p213_p2)   ;;  %v1497_v25 = vld [vmem:[%s1873_s3 + $0x60] ss:$12 sps:$4 sm:$0xff] (!%p213_p2)   ;;  %491 = vmatprep.mubr.bf16.mxu0 (!%p213_p2), %v1564_v31 }
   0xa   : > { %v1495_v24 = vld [vmem:[%s1873_s3 + $0x64] ss:$12 sps:$4 sm:$0xff] (!%p213_p2)   ;;  %v1498_v26 = vld [vmem:[%s1873_s3 + $0x68] ss:$12 sps:$4 sm:$0xff] (!%p213_p2)   ;;  %v1502_v29 = vld [vmem:[%s1873_s3 + $0x80] ss:$12 sps:$4 sm:$0xff] (!%p213_p2)  }
   0xb   : > { %462 = vmatpush1.bf16.msra.mxu0 (!%p213_p2), %v1485_v16  ;;  %1365 = vmatpush3.bf16.msra.mxu1 (!%p213_p2), %v1486_v17  ;;  %v1499_v27 = vld [vmem:[%s1873_s3 + $0x7c] ss:$12 sps:$4 sm:$0xff] (!%p213_p2)   ;;  %v1501_v28 = vld [vmem:[%s1873_s3 + $0x78] ss:$12 sps:$4 sm:$0xff] (!%p213_p2)   ;;  %v1503_v30 = vld [vmem:[%s1873_s3 + $0x94] ss:$12 sps:$4 sm:$0xff] (!%p213_p2)  }
   0xc   : > { %1366 = vmatprep.subr.bf16.mxu1 (!%p213_p2), %v1563_v5  ;;  %463 = vmatprep.subr.bf16.mxu0 (!%p213_p2), %v1487_v18  ;;  %vm1565_vm0 = vmmov (!%p213_p2), 0   ;;  %v1505_v32 = vld [vmem:[%s1873_s3 + $0x90] ss:$12 sps:$4 sm:$0xff] (!%p213_p2)   ;;  %v1506_v33 = vld [vmem:[%s1873_s3 + $0x98] ss:$12 sps:$4 sm:$0xff] (!%p213_p2)   ;;  %vm549_vm1 = vcmask (!%p213_p2), 261120  }
   0xd   : > { %s1878_s22 = smov (!%p242_p3, %s1259_s22), 1  ;;  %1378 = vmatprep.mubr.msk.bf16.mxu1 %vm1565_vm0, %v1563_v5  ;;  %v1507_v34 = vld [vmem:[%s1873_s3 + $0xac] ss:$12 sps:$4 sm:$0xff]   ;;  %v1509_v35 = vld [vmem:[%s1873_s3 + $0xa8] ss:$12 sps:$4 sm:$0xff]   ;;  %v1741_v6 = vand.u32 127, %v543_v4 }
   0xe   : > { %s1315_s23 = sshll.u32 %s1878_s22, 3  ;;  %v1510_v36 = vld [vmem:[%s1873_s3 + $0xb0] ss:$12 sps:$4 sm:$0xff]   ;;  %v1268_v45 = vld [vmem:[%s1871_s1] ss:$0 sm:$0xff]  ;;  %vm601_vm3 = vcmask 130048  }
   0xf   : > { %s246_s26 = scalar_lea.vmem %s1870_s0, %s1315_s23  ;;  %464 = vmatpush1.bf16.msra.mxu0 %v1489_v19  ;;  %1367 = vmatpush3.bf16.msra.mxu1 %v1490_v20  ;;  %v1269_v49 = vld [vmem:[%s1872_s2] ss:$0 sm:$0xff]  ;;  %vm545_vm2 = vcmp.lt.s32.totalorder %v1741_v6, 9  ;;  %s1566_s13 = smov 96   ;;  %vm1073_vm4 = vcmask 523264   ;;  %vm1076_vm5 = vcmask 785408  }
  0x10   : > { %v1320_v0 = vld [vmem:[%s246_s26] sm:$0xff]   ;;  %1368 = vmatprep.subr.bf16.mxu1 %v1563_v5  ;;  %465 = vmatprep.subr.bf16.mxu0 %v1491_v21  ;;  %s1567_s14 = smov 64   ;;  %s1568_s15 = smov 32  }
  0x11   : > { %v1620_v1 = vunpack.c.l.bf16 %v1320_v0  ;;  %v1623_v2 = vunpack.c.h.bf16 %v1320_v0 }
  0x13   : > { %259 = vadd.xlane.f32.xlu0 %v1620_v1  ;;  %466 = vmatpush1.bf16.msra.mxu0 %v1493_v22 }
  0x14   : > { %1369 = vmatpush3.bf16.msra.mxu1 %v1494_v23  ;;  %467 = vmatprep.subr.bf16.mxu0 %v1495_v24 }
  0x15   : > { %1370 = vmatprep.subr.bf16.mxu1 %v1563_v5 }
  0x17   : > { %261 = vadd.xlane.f32.xlu0 %v1623_v2  ;;  %468 = vmatpush1.bf16.msra.mxu0 %v1497_v25 }
  0x18   : > { %1371 = vmatpush3.bf16.msra.mxu1 %v1498_v26  ;;  %469 = vmatprep.subr.bf16.mxu0 %v1499_v27 }
  0x19   : > { %1372 = vmatprep.subr.bf16.mxu1 %v1563_v5 }
  0x1b   : > { %470 = vmatpush1.bf16.msra.mxu0 %v1501_v28 }
  0x1c   : > { %1373 = vmatpush3.bf16.msra.mxu1 %v1502_v29  ;;  %471 = vmatprep.subr.bf16.mxu0 %v1503_v30 }
  0x1d   : > { %1374 = vmatprep.subr.bf16.mxu1 %v1563_v5 }
  0x1f   : > { %472 = vmatpush1.bf16.msra.mxu0 %v1505_v32 }
  0x20   : > { %1375 = vmatpush3.bf16.msra.mxu1 %v1506_v33  ;;  %473 = vmatprep.subr.bf16.mxu0 %v1507_v34 }
  0x21   : > { %1376 = vmatprep.subr.bf16.mxu1 %v1563_v5 }
  0x23   : > { %474 = vmatpush1.bf16.msra.mxu0 %v1509_v35 }
  0x24   : > { %1377 = vmatpush3.bf16.msra.mxu1 %v1510_v36  ;;  %1406 = vmatprep.subr.bf16.mxu0 %v1563_v5 }
  0x25   : > { %1382 = vmatprep.subr.bf16.mxu1 %v1563_v5 }
  0xa0   : > { %v260_v8 = vpop.xlane.xlu0 %259 }
  0xa1   : > { %v264_v9 = vmul.f32 0.0078125, %v260_v8 }
  0xa3   : > { %v1641_v10 = vsub.f32 %v1620_v1, %v264_v9 }
  0xa4   : > { %v262_v11 = vpop.xlane.xlu0 %261 }
  0xa5   : > { %v265_v12 = vmul.f32 0.0078125, %v262_v11  ;;  %v268_v13 = vmul.f32 %v1641_v10, %v1641_v10 }
  0xa7   : > { %v1646_v14 = vsub.f32 %v1623_v2, %v265_v12  ;;  %270 = vadd.xlane.f32.xlu1 %v268_v13 }
  0xa9   : > { %v269_v15 = vmul.f32 %v1646_v14, %v1646_v14 }
  0xab   : > { %272 = vadd.xlane.f32.xlu1 %v269_v15 }
 0x134   : > { %v271_v37 = vpop.xlane.xlu1 %270 }
 0x135   : > { %v274_v38 = vmul.f32 0.0078125, %v271_v37 }
 0x137   : > { %v276_v39 = vadd.f32 1e-05, %v274_v38 }
 0x138   : > { %v273_v40 = vpop.xlane.xlu1 %272 }
 0x139   : > { %1519 = vrsqrt.f32 %v276_v39  ;;  %v275_v41 = vmul.f32 0.0078125, %v273_v40 }
 0x13b   : > { %v277_v42 = vadd.f32 1e-05, %v275_v41 }
 0x13d   : > { %1521 = vrsqrt.f32 %v277_v42 }
 0x143   : > { %v1520_v43 = vpop.eup %1519 }
 0x144   : > { %v280_v44 = vmul.f32 %v1520_v43, %v1641_v10 }
 0x146   : > { %v288_v48 = vmul.f32 %v1268_v45, %v280_v44 }
 0x147   : > { %v1522_v46 = vpop.eup %1521 }
 0x148   : > { %v281_v47 = vmul.f32 %v1522_v46, %v1646_v14  ;;  %v296_v51 = vadd.f32 %v1269_v49, %v288_v48 }
 0x14a   : > { %v289_v50 = vmul.f32 %v1268_v45, %v281_v47 }
 0x14c   : > { %v297_v52 = vadd.f32 %v1269_v49, %v289_v50 }
 0x14e   : > { %v298_v53 = vpack.c.bf16 %v297_v52, %v296_v51 }
 0x150   : > { %492 = vmatmul.mubr.bf16.vlgmr.msra.gmra.mrb[0].mxu0 %v298_v53  ;;  %1379 = vmatmul.mubr.bf16.vlgmr.msra.gmra.mrb[0].mxu1 %v298_v53 }
 0x151   : > { %1384 = vmatprep.mubr.msk.bf16.mxu1 %vm1565_vm0, %v1563_v5  ;;  %1408 = vmatprep.mubr.msk.bf16.mxu0 %vm1565_vm0, %v1563_v5 }
 0x223   : > { %v493_v54 = vpop.f32.mrb[0].mxu0  ;;  %v536_v55 = vpop.f32.mrb[0].mxu1 }
 0x224   : > { %v495_v56 = vpop.f32.mrb[1].mxu0  ;;  %v1380_v57 = vpop.f32.mrb[1].mxu1 }
 0x225   : > { %v497_v58 = vpop.f32.mrb[2].mxu0  ;;  %v539_v59 = vpop.f32.mrb[2].mxu1 }
 0x226   : > { %v546_v60 = vpack.c.bf16 %v497_v58, %v493_v54  ;;  %v1732_v61 = vpack.c.bf16 %v539_v59, %v536_v55  ;;  %v499_v62 = vpop.f32.mrb[3].mxu0  ;;  %v1381_v63 = vpop.f32.mrb[3].mxu1 }
 0x227   : > { %v547_v0 = vpack.c.bf16 %v499_v62, %v495_v56 }
 0x229   : > { %v554_v3 = vsel %vm549_vm1, %v547_v0, 0 }
 0x22a   : > { %1383 = vmatpush3.bf16.xpose.msra.mxu1 %v554_v3 }
 0x22b   : > { %1388 = vmatprep.subr.bf16.mxu1 %v1563_v5 }
 0x231   : > { %1385 = vmatmul.mubr.msk.bf16.vlgmr.msra.gmra.mrb[4].mxu1 %vm549_vm1, %v546_v60 }
 0x232   : > { %1389 = vmatpush3.bf16.msra.mxu1 %v1732_v61  ;;  %1390 = vmatprep.mubr.msk.bf16.mxu1 %vm1565_vm0, %v1563_v5 }
 0x233   : > { %1394 = vmatprep.subr.bf16.mxu1 %v1563_v5 }
 0x304   : > { %v590_v7 = vpop.f32.mrb[4].mxu1 }
 0x305   : > { %v597_v8 = vmul.f32 0.088388346, %v590_v7  ;;  %v1386_v9 = vpop.f32.mrb[5].mxu1 }
 0x306   : > { %v593_v10 = vpop.f32.mrb[6].mxu1 }
 0x307   : > { %v598_v11 = vmul.f32 0.088388346, %v593_v10  ;;  %v1387_v12 = vpop.f32.mrb[7].mxu1  ;;  %v599_v13 = vsel %vm545_vm2, %v597_v8, -1e+30 }
 0x308   : > { %v602_v14 = vsel %vm601_vm3, %v599_v13, -inf }
 0x309   : > { %603 = vmax.xlane.f32.xlu0 %v602_v14  ;;  %v600_v15 = vsel %vm545_vm2, %v598_v11, -1e+30 }
 0x30a   : > { %v605_v16 = vsel %vm601_vm3, %v600_v15, -inf }
 0x30b   : > { %606 = vmax.xlane.f32.xlu1 %v605_v16 }
 0x396   : > { %v604_v17 = vpop.xlane.xlu0 %603 }
 0x397   : > { %v608_v18 = vsub.f32 %v599_v13, %v604_v17 }
 0x398   : > { %v607_v19 = vpop.xlane.xlu1 %606 }
 0x399   : > { %v610_v20 = vmul.f32 1.442695, %v608_v18  ;;  %v609_v21 = vsub.f32 %v600_v15, %v607_v19 }
 0x39b   : > { %1523 = vpow2.f32 %v610_v20  ;;  %v612_v22 = vmul.f32 1.442695, %v609_v21 }
 0x39d   : > { %1525 = vpow2.f32 %v612_v22 }
 0x3a5   : > { %v1524_v23 = vpop.eup %1523 }
 0x3a6   : > { %v614_v24 = vsel %vm601_vm3, %v1524_v23, 0.0 }
 0x3a7   : > { %v1526_v25 = vpop.eup %1525  ;;  %615 = vadd.xlane.f32.xlu0 %v614_v24 }
 0x3a8   : > { %v617_v26 = vsel %vm601_vm3, %v1526_v25, 0.0 }
 0x3a9   : > { %618 = vadd.xlane.f32.xlu1 %v617_v26 }
 0x3ba   : > { %670 = vrot.lane.b32.xlu1 %v546_v60, %s1566_s13 }
 0x3bd   : > { %673 = vrot.lane.b32.xlu0 %v547_v0, %s1566_s13 }
 0x3be   : > { %799 = vrot.lane.b32.xlu1 %v547_v0, %s1567_s14 }
 0x3c1   : > { %924 = vrot.lane.b32.xlu0 %v547_v0, %s1568_s15 }
 0x3c2   : > { %797 = vrot.lane.b32.xlu1 %v546_v60, %s1567_s14 }
 0x3c6   : > { %922 = vrot.lane.b32.xlu1 %v546_v60, %s1568_s15 }
 0x434   : > { %v616_v27 = vpop.xlane.xlu0 %615 }
 0x435   : > { %1527 = vrcp.f32 %v616_v27 }
 0x436   : > { %v619_v28 = vpop.xlane.xlu1 %618 }
 0x437   : > { %1529 = vrcp.f32 %v619_v28 }
 0x438   : > { %v674_v30 = vpop.permute.xlu0 %673 }
 0x439   : > { %v679_v39 = vsel %vm549_vm1, %v674_v30, 0 }
 0x43a   : > { %v671_v29 = vpop.permute.xlu1 %670 }
 0x43c   : > { %v925_v37 = vpop.permute.xlu0 %924 }
 0x43d   : > { %v930_v41 = vsel %vm549_vm1, %v925_v37, 0 }
 0x43e   : > { %v800_v31 = vpop.permute.xlu1 %799 }
 0x43f   : > { %v1528_v32 = vpop.eup %1527  ;;  %v805_v33 = vsel %vm549_vm1, %v800_v31, 0 }
 0x440   : > { %1407 = vmatpush3.bf16.xpose.msra.mxu0 %v805_v33  ;;  %v622_v35 = vmul.f32 %v1528_v32, %v1524_v23 }
 0x441   : > { %v1530_v34 = vpop.eup %1529  ;;  %1418 = vmatprep.subr.bf16.mxu0 %v1563_v5 }
 0x442   : > { %v623_v36 = vmul.f32 %v1530_v34, %v1526_v25  ;;  %v798_v40 = vpop.permute.xlu1 %797 }
 0x444   : > { %v624_v38 = vpack.c.bf16 %v623_v36, %v622_v35 }
 0x446   : > { %1391 = vmatmul.mubr.msk.bf16.vlgmr.msra.gmra.mrb[8].mxu1 %vm601_vm3, %v624_v38  ;;  %v923_v42 = vpop.permute.xlu1 %922 }
 0x447   : > { %1395 = vmatpush3.bf16.xpose.msra.mxu1 %v679_v39  ;;  %1409 = vmatmul.mubr.msk.bf16.vlgmr.msra.gmra.mrb[4].mxu0 %vm549_vm1, %v798_v40 }
 0x448   : > { %1419 = vmatpush3.bf16.xpose.msra.mxu0 %v930_v41  ;;  %1396 = vmatprep.mubr.msk.bf16.mxu1 %vm1565_vm0, %v1563_v5 }
 0x449   : > { %1420 = vmatprep.mubr.msk.bf16.mxu0 %vm1565_vm0, %v1563_v5  ;;  %1400 = vmatprep.subr.bf16.mxu1 %v1563_v5 }
 0x44a   : > { %1430 = vmatprep.subr.bf16.mxu0 %v1563_v5 }
 0x44e   : > { %1397 = vmatmul.mubr.msk.bf16.vlgmr.msra.gmra.mrb[12].mxu1 %vm549_vm1, %v671_v29 }
 0x44f   : > { %1421 = vmatmul.mubr.msk.bf16.vlgmr.msra.gmra.mrb[8].mxu0 %vm549_vm1, %v923_v42  ;;  %1402 = vmatprep.mubr.msk.bf16.mxu1 %vm1565_vm0, %v1563_v5 }
 0x450   : > { %1446 = vmatprep.mubr.msk.bf16.mxu0 %vm1565_vm0, %v1563_v5 }
 0x519   : > { %v1776_v43 = vpop.f32.mrb[8].mxu1 }
 0x51a   : > { %v1392_v44 = vpop.f32.mrb[9].mxu1  ;;  %v841_v45 = vpop.f32.mrb[4].mxu0 }
 0x51b   : > { %v1778_v46 = vpop.f32.mrb[10].mxu1  ;;  %v1410_v47 = vpop.f32.mrb[5].mxu0  ;;  %v848_v52 = vmul.f32 0.088388346, %v841_v45 }
 0x51c   : > { %v1393_v48 = vpop.f32.mrb[11].mxu1  ;;  %v844_v49 = vpop.f32.mrb[6].mxu0 }
 0x51d   : > { %v1411_v50 = vpop.f32.mrb[7].mxu0  ;;  %v849_v4 = vmul.f32 0.088388346, %v844_v49  ;;  %v850_v8 = vsel %vm545_vm2, %v848_v52, -1e+30 }
 0x51e   : > { %v852_v11 = vsel %vm601_vm3, %v850_v8, -inf }
 0x51f   : > { %v851_v13 = vsel %vm545_vm2, %v849_v4, -1e+30 }
 0x520   : > { %v855_v15 = vsel %vm601_vm3, %v851_v13, -inf }
 0x521   : > { %v715_v51 = vpop.f32.mrb[12].mxu1 }
 0x522   : > { %v722_v53 = vmul.f32 0.088388346, %v715_v51  ;;  %v1398_v54 = vpop.f32.mrb[13].mxu1  ;;  %v966_v55 = vpop.f32.mrb[8].mxu0 }
 0x523   : > { %v718_v56 = vpop.f32.mrb[14].mxu1  ;;  %v1422_v57 = vpop.f32.mrb[9].mxu0  ;;  %v973_v12 = vmul.f32 0.088388346, %v966_v55 }
 0x524   : > { %v723_v58 = vmul.f32 0.088388346, %v718_v56  ;;  %v1399_v59 = vpop.f32.mrb[15].mxu1  ;;  %v969_v60 = vpop.f32.mrb[10].mxu0  ;;  %v724_v62 = vsel %vm545_vm2, %v722_v53, -1e+30 }
 0x525   : > { %v974_v63 = vmul.f32 0.088388346, %v969_v60  ;;  %v1423_v0 = vpop.f32.mrb[11].mxu0  ;;  %v726_v3 = vsel %vm601_vm3, %v724_v62, -inf  ;;  %v975_v16 = vsel %vm545_vm2, %v973_v12, -1e+30 }
 0x526   : > { %727 = vmax.xlane.f32.xlu0 %v726_v3  ;;  %v725_v7 = vsel %vm545_vm2, %v723_v58, -1e+30  ;;  %v977_v17 = vsel %vm601_vm3, %v975_v16, -inf }
 0x527   : > { %v729_v9 = vsel %vm601_vm3, %v725_v7, -inf  ;;  %v976_v10 = vsel %vm545_vm2, %v974_v63, -1e+30 }
 0x528   : > { %730 = vmax.xlane.f32.xlu1 %v729_v9  ;;  %v980_v14 = vsel %vm601_vm3, %v976_v10, -inf }
 0x52a   : > { %853 = vmax.xlane.f32.xlu0 %v852_v11 }
 0x52c   : > { %981 = vmax.xlane.f32.xlu1 %v980_v14  ;;  %v1512_v14 = vld [vmem:[%s1874_s4 + $0x8] sm:$0xff]  }
 0x52e   : > { %856 = vmax.xlane.f32.xlu0 %v855_v15  ;;  %v1513_v15 = vld [vmem:[%s1874_s4 + $0x10] sm:$0xff]  }
 0x532   : > { %978 = vmax.xlane.f32.xlu0 %v977_v17  ;;  %v1515_v17 = vld [vmem:[%s1874_s4 + $0x20] sm:$0xff]  }
 0x5b3   : > { %v728_v18 = vpop.xlane.xlu0 %727 }
 0x5b4   : > { %v732_v27 = vsub.f32 %v724_v62, %v728_v18 }
 0x5b5   : > { %v731_v19 = vpop.xlane.xlu1 %730 }
 0x5b6   : > { %v733_v28 = vsub.f32 %v725_v7, %v731_v19  ;;  %v734_v32 = vmul.f32 1.442695, %v732_v27  ;;  %v1518_v27 = vld [vmem:[%s1874_s4 + $0x38] sm:$0xff]  }
 0x5b7   : > { %v854_v20 = vpop.xlane.xlu0 %853 }
 0x5b8   : > { %v858_v21 = vsub.f32 %v850_v8, %v854_v20  ;;  %v736_v33 = vmul.f32 1.442695, %v733_v28  ;;  %v1516_v20 = vld [vmem:[%s1874_s4 + $0x28] sm:$0xff]  }
 0x5b9   : > { %v982_v22 = vpop.xlane.xlu1 %981 }
 0x5ba   : > { %v860_v23 = vmul.f32 1.442695, %v858_v21  ;;  %v984_v24 = vsub.f32 %v976_v10, %v982_v22 }
 0x5bb   : > { %v857_v25 = vpop.xlane.xlu0 %856 }
 0x5bc   : > { %1531 = vpow2.f32 %v860_v23  ;;  %v859_v26 = vsub.f32 %v851_v13, %v857_v25  ;;  %v987_v29 = vmul.f32 1.442695, %v984_v24  ;;  %v1511_v13 = vld [vmem:[%s1874_s4] sm:$0xff]   ;;  %v1517_v24 = vld [vmem:[%s1874_s4 + $0x30] sm:$0xff]  }
 0x5bd   : > { %1431 = vmatpush3.bf16.msra.mxu0 %v1511_v13 }
 0x5be   : > { %v862_v30 = vmul.f32 1.442695, %v859_v26  ;;  %1432 = vmatprep.subr.bf16.mxu0 %v1563_v5 }
 0x5bf   : > { %v979_v31 = vpop.xlane.xlu0 %978 }
 0x5c0   : > { %1533 = vpow2.f32 %v862_v30  ;;  %v983_v6 = vsub.f32 %v975_v16, %v979_v31  ;;  %v1514_v16 = vld [vmem:[%s1874_s4 + $0x18] sm:$0xff]  }
 0x5c1   : > { %1535 = vpow2.f32 %v987_v29  ;;  %1433 = vmatpush3.bf16.msra.mxu0 %v1512_v14 }
 0x5c2   : > { %v985_v34 = vmul.f32 1.442695, %v983_v6  ;;  %1434 = vmatprep.subr.bf16.mxu0 %v1563_v5 }
 0x5c4   : > { %1537 = vpow2.f32 %v985_v34 }
 0x5c5   : > { %1539 = vpow2.f32 %v734_v32  ;;  %1435 = vmatpush3.bf16.msra.mxu0 %v1513_v15 }
 0x5c6   : > { %v1532_v35 = vpop.eup %1531  ;;  %1541 = vpow2.f32 %v736_v33  ;;  %1436 = vmatprep.subr.bf16.mxu0 %v1563_v5 }
 0x5c7   : > { %v864_v36 = vsel %vm601_vm3, %v1532_v35, 0.0 }
 0x5c8   : > { %865 = vadd.xlane.f32.xlu0 %v864_v36 }
 0x5c9   : > { %1437 = vmatpush3.bf16.msra.mxu0 %v1514_v16 }
 0x5ca   : > { %v1534_v37 = vpop.eup %1533  ;;  %1438 = vmatprep.subr.bf16.mxu0 %v1563_v5 }
 0x5cb   : > { %v867_v38 = vsel %vm601_vm3, %v1534_v37, 0.0  ;;  %v1536_v39 = vpop.eup %1535 }
 0x5cc   : > { %868 = vadd.xlane.f32.xlu1 %v867_v38  ;;  %v992_v44 = vsel %vm601_vm3, %v1536_v39, 0.0 }
 0x5cd   : > { %1439 = vmatpush3.bf16.msra.mxu0 %v1515_v17 }
 0x5ce   : > { %v1538_v40 = vpop.eup %1537  ;;  %1440 = vmatprep.subr.bf16.mxu0 %v1563_v5 }
 0x5cf   : > { %v1540_v41 = vpop.eup %1539  ;;  %v989_v42 = vsel %vm601_vm3, %v1538_v40, 0.0 }
 0x5d0   : > { %v1542_v45 = vpop.eup %1541  ;;  %990 = vadd.xlane.f32.xlu0 %v989_v42  ;;  %993 = vadd.xlane.f32.xlu1 %v992_v44  ;;  %v738_v47 = vsel %vm601_vm3, %v1540_v41, 0.0 }
 0x5d1   : > { %v741_v48 = vsel %vm601_vm3, %v1542_v45, 0.0  ;;  %1441 = vmatpush3.bf16.msra.mxu0 %v1516_v20 }
 0x5d2   : > { %1442 = vmatprep.subr.bf16.mxu0 %v1563_v5 }
 0x5d4   : > { %739 = vadd.xlane.f32.xlu0 %v738_v47  ;;  %742 = vadd.xlane.f32.xlu1 %v741_v48 }
 0x5d5   : > { %1443 = vmatpush3.bf16.msra.mxu0 %v1517_v24 }
 0x5d6   : > { %1444 = vmatprep.subr.bf16.mxu0 %v1563_v5 }
 0x5d9   : > { %1445 = vmatpush3.bf16.msra.mxu0 %v1518_v27 }
 0x5e5   : > { %875 = vrot.lane.b32.xlu1 %v1732_v61, %s1567_s14 }
 0x5e9   : > { %1000 = vrot.lane.b32.xlu1 %v1732_v61, %s1568_s15 }
 0x5ea   : > { %750 = vrot.lane.b32.xlu0 %v1732_v61, %s1566_s13 }
 0x655   : > { %v866_v49 = vpop.xlane.xlu0 %865 }
 0x659   : > { %v869_v50 = vpop.xlane.xlu1 %868 }
 0x65d   : > { %v991_v51 = vpop.xlane.xlu0 %990  ;;  %v994_v52 = vpop.xlane.xlu1 %993 }
 0x661   : > { %v740_v53 = vpop.xlane.xlu0 %739  ;;  %v743_v54 = vpop.xlane.xlu1 %742 }
 0x662   : > { %1543 = vrcp.f32 %v740_v53 }
 0x663   : > { %1545 = vrcp.f32 %v743_v54 }
 0x664   : > { %1547 = vrcp.f32 %v869_v50 }
 0x665   : > { %v751_v55 = vpop.permute.xlu0 %750  ;;  %1549 = vrcp.f32 %v866_v49  ;;  %v876_v62 = vpop.permute.xlu1 %875 }
 0x666   : > { %1401 = vmatpush3.bf16.msra.mxu1 %v751_v55  ;;  %1551 = vrcp.f32 %v991_v51 }
 0x667   : > { %1412 = vmatprep.subr.bf16.mxu1 %v1563_v5  ;;  %1553 = vrcp.f32 %v994_v52  ;;  %v1302_v52 = vld [vmem:[%s1875_s5] ss:$0 sm:$0xff] }
 0x669   : > { %v1001_v9 = vpop.permute.xlu1 %1000 }
 0x66c   : > { %v1544_v56 = vpop.eup %1543 }
 0x66d   : > { %v1546_v57 = vpop.eup %1545  ;;  %v746_v58 = vmul.f32 %v1544_v56, %v1540_v41 }
 0x66e   : > { %v747_v59 = vmul.f32 %v1546_v57, %v1542_v45  ;;  %v1548_v60 = vpop.eup %1547 }
 0x66f   : > { %v1550_v63 = vpop.eup %1549  ;;  %v873_v0 = vmul.f32 %v1548_v60, %v1534_v37 }
 0x670   : > { %v748_v61 = vpack.c.bf16 %v747_v59, %v746_v58  ;;  %v872_v3 = vmul.f32 %v1550_v63, %v1532_v35  ;;  %v1552_v4 = vpop.eup %1551 }
 0x671   : > { %v1554_v8 = vpop.eup %1553  ;;  %v997_v10 = vmul.f32 %v1552_v4, %v1538_v40 }
 0x672   : > { %1403 = vmatmul.mubr.msk.bf16.vlgmr.msra.gmra.mrb[16].mxu1 %vm601_vm3, %v748_v61  ;;  %v874_v7 = vpack.c.bf16 %v873_v0, %v872_v3  ;;  %v998_v11 = vmul.f32 %v1554_v8, %v1536_v39 }
 0x673   : > { %1413 = vmatpush3.bf16.msra.mxu1 %v876_v62  ;;  %1414 = vmatprep.mubr.msk.bf16.mxu1 %vm1565_vm0, %v1563_v5 }
 0x674   : > { %1424 = vmatprep.subr.bf16.mxu1 %v1563_v5  ;;  %v999_v12 = vpack.c.bf16 %v998_v11, %v997_v10 }
 0x67a   : > { %1415 = vmatmul.mubr.msk.bf16.vlgmr.msra.gmra.mrb[20].mxu1 %vm601_vm3, %v874_v7 }
 0x67b   : > { %1425 = vmatpush3.bf16.msra.mxu1 %v1001_v9  ;;  %1426 = vmatprep.mubr.msk.bf16.mxu1 %vm1565_vm0, %v1563_v5 }
 0x682   : > { %1427 = vmatmul.mubr.msk.bf16.vlgmr.msra.gmra.mrb[24].mxu1 %vm601_vm3, %v999_v12 }
 0x745   : > { %v790_v18 = vpop.f32.mrb[16].mxu1 }
 0x746   : > { %v1404_v19 = vpop.f32.mrb[17].mxu1 }
 0x747   : > { %v793_v21 = vpop.f32.mrb[18].mxu1 }
 0x748   : > { %v1464_v22 = vpack.i.bf16 %v793_v21, %v790_v18  ;;  %v1405_v23 = vpop.f32.mrb[19].mxu1 }
 0x74a   : > { %1465 = vrot.lane.b32.xlu1 %v1464_v22, %s1568_s15  ;;  %s251_s15 = scalar_lea.vmem %s1876_s6, %s1315_s23 }
 0x74d   : > { %v915_v25 = vpop.f32.mrb[20].mxu1 }
 0x74e   : > { %v1416_v26 = vpop.f32.mrb[21].mxu1 }
 0x74f   : > { %v918_v28 = vpop.f32.mrb[22].mxu1 }
 0x750   : > { %v1469_v29 = vpack.i.bf16 %v918_v28, %v915_v25  ;;  %v1417_v30 = vpop.f32.mrb[23].mxu1 }
 0x752   : > { %1470 = vrot.lane.b32.xlu0 %v1469_v29, %s1567_s14 }
 0x755   : > { %v1040_v31 = vpop.f32.mrb[24].mxu1 }
 0x756   : > { %v1428_v6 = vpop.f32.mrb[25].mxu1 }
 0x757   : > { %v1043_v32 = vpop.f32.mrb[26].mxu1 }
 0x758   : > { %v1474_v33 = vpack.i.bf16 %v1043_v32, %v1040_v31  ;;  %v1429_v34 = vpop.f32.mrb[27].mxu1 }
 0x75a   : > { %1475 = vrot.lane.b32.xlu1 %v1474_v33, %s1566_s13 }
 0x7bc   : > { %v1466_v35 = vpop.permute.xlu1 %1465 }
 0x7bd   : > { %v1468_v36 = vunpack.i.h.bf16 %v1466_v35  ;;  %v1467_v37 = vunpack.i.l.bf16 %v1466_v35 }
 0x7bf   : > { %v1072_v41 = vsel %vm549_vm1, %v1778_v46, %v1468_v36  ;;  %v1071_v42 = vsel %vm549_vm1, %v1776_v43, %v1467_v37 }
 0x7c4   : > { %v1471_v5 = vpop.permute.xlu0 %1470 }
 0x7c5   : > { %v1473_v38 = vunpack.i.h.bf16 %v1471_v5  ;;  %v1472_v39 = vunpack.i.l.bf16 %v1471_v5 }
 0x7c7   : > { %v1075_v47 = vsel %vm1073_vm4, %v1072_v41, %v1473_v38  ;;  %v1074_v48 = vsel %vm1073_vm4, %v1071_v42, %v1472_v39 }
 0x7cc   : > { %v1476_v40 = vpop.permute.xlu1 %1475 }
 0x7cd   : > { %v1478_v44 = vunpack.i.h.bf16 %v1476_v40  ;;  %v1477_v45 = vunpack.i.l.bf16 %v1476_v40 }
 0x7cf   : > { %v1078_v49 = vsel %vm1076_vm5, %v1075_v47, %v1478_v44  ;;  %v1077_v50 = vsel %vm1076_vm5, %v1074_v48, %v1477_v45 }
 0x7d0   : > { %v1079_v51 = vpack.c.bf16 %v1078_v49, %v1077_v50 }
 0x7d2   : > { %1447 = vmatmul.mubr.bf16.vlgmr.msra.gmra.mrb[12].mxu0 %v1079_v51 }
 0x8a5   : > { %v1185_v53 = vpop.f32.mrb[12].mxu0 }
 0x8a6   : > { %v1186_v54 = vadd.f32 %v1302_v52, %v1185_v53  ;;  %v1448_v55 = vpop.f32.mrb[13].mxu0 }
 0x8a7   : > { %v1188_v46 = vpop.f32.mrb[14].mxu0 }
 0x8a8   : > { %v1189_v56 = vadd.f32 %v1302_v52, %v1188_v46  ;;  %v1449_v57 = vpop.f32.mrb[15].mxu0  ;;  %v1192_v43 = vadd.f32 %v1620_v1, %v1186_v54 }
 0x8aa   : > { %v1193_v58 = vadd.f32 %v1623_v2, %v1189_v56 }
 0x8ac   : > { %v1326_v59 = vpack.c.bf16 %v1193_v58, %v1192_v43 }
 0x8ae   : > { %1327 = vst [vmem:[%s251_s15] sm:$0xff] %v1326_v59  }
 0x8af PF: > { %s16_s21 = sadd.s32 1, %s1561_s21  }
 0x8b0   : > { %p13_p4 = scmp.ge.s32.totalorder %s16_s21, 4  }
 0x8b2   :  { %15 = sbr.rel (!%p13_p4) target bundleno = 1 (0x1), region = 74 }

// kernel: transformer_forward.13
= control target key start
LH: loop header
LB: loop body
LE: loop exit
PB: predicated region body
PF: predicated region fallthrough
CT: control target
= control target key end

     0   :  { %s682_s0 = inlined_call_operand.vmem [shape: bf16[32,128], index: 0, kind: input, shape index: {}]   ;;  %s683_s3 = inlined_call_operand.vmem [shape: bf16[128,128], index: 3, kind: input, shape index: {}]   ;;  %s684_s1 = inlined_call_operand.vmem [shape: f32[1,128], index: 1, kind: input, shape index: {}]   ;;  %s685_s2 = inlined_call_operand.vmem [shape: f32[1,128], index: 2, kind: input, shape index: {}]   ;;  %s686_s5 = inlined_call_operand.vmem [shape: bf16[128,128], index: 5, kind: input, shape index: {}]   ;;  %s687_s4 = inlined_call_operand.vmem [shape: f32[1,128], index: 4, kind: input, shape index: {}]   ;;  %s688_s6 = inlined_call_operand.vmem [shape: f32[1,128], index: 6, kind: input, shape index: {}]   ;;  %s689_s7 = inlined_call_operand.vmem [shape: bf16[32,128], index: 7, kind: output, shape index: {}]  }
   0x1   :  { %v439_v0 = vld [vmem:[%s682_s0] sm:$0xff]   ;;  %v456_v1 = vld [vmem:[%s682_s0 + $0x8] sm:$0xff]   ;;  %v520_v24 = vld [vmem:[%s683_s3 + $0x10] sm:$0xff]  }
   0x2   :  { %v596_v2 = vunpack.c.l.bf16 %v439_v0  ;;  %v598_v3 = vunpack.c.l.bf16 %v456_v1  ;;  %v602_v4 = vunpack.c.h.bf16 %v439_v0  ;;  %v604_v5 = vunpack.c.h.bf16 %v456_v1  ;;  %v518_v6 = vld [vmem:[%s683_s3] sm:$0xff]   ;;  %v519_v23 = vld [vmem:[%s683_s3 + $0x8] sm:$0xff]   ;;  %v521_v25 = vld [vmem:[%s683_s3 + $0x18] sm:$0xff]  }
   0x3   :  { %478 = vmatprep.subr.bf16.mxu0 %v518_v6  ;;  %v522_v26 = vld [vmem:[%s683_s3 + $0x20] sm:$0xff]   ;;  %v523_v27 = vld [vmem:[%s683_s3 + $0x28] sm:$0xff]   ;;  %v524_v28 = vld [vmem:[%s683_s3 + $0x30] sm:$0xff]  }
   0x4   :  { %37 = vadd.xlane.f32.xlu0 %v596_v2  ;;  %41 = vadd.xlane.f32.xlu1 %v598_v3  ;;  %v525_v29 = vld [vmem:[%s683_s3 + $0x38] sm:$0xff]   ;;  %v410_v44 = vld [vmem:[%s684_s1] ss:$0 sm:$0xff]  ;;  %v527_v63 = vld [vmem:[%s686_s5 + $0x8] sm:$0xff]  }
   0x5   :  { %479 = vmatpush3.bf16.msra.mxu0 %v518_v6  ;;  %v411_v49 = vld [vmem:[%s685_s2] ss:$0 sm:$0xff]  ;;  %v528_v0 = vld [vmem:[%s686_s5 + $0x10] sm:$0xff]   ;;  %v529_v1 = vld [vmem:[%s686_s5 + $0x18] sm:$0xff]  }
   0x6   :  { %480 = vmatprep.subr.bf16.mxu0 %v519_v23  ;;  %v526_v62 = vld [vmem:[%s686_s5] sm:$0xff]  }
   0x7   :  { %498 = vmatprep.subr.bf16.mxu1 %v526_v62  ;;  %v530_v6 = vld [vmem:[%s686_s5 + $0x20] sm:$0xff]  }
   0x8   :  { %39 = vadd.xlane.f32.xlu0 %v602_v4  ;;  %43 = vadd.xlane.f32.xlu1 %v604_v5 }
   0x9   :  { %481 = vmatpush3.bf16.msra.mxu0 %v519_v23  ;;  %499 = vmatpush3.bf16.msra.mxu1 %v526_v62 }
   0xa   :  { %482 = vmatprep.subr.bf16.mxu0 %v520_v24  ;;  %500 = vmatprep.subr.bf16.mxu1 %v527_v63 }
   0xd   :  { %483 = vmatpush3.bf16.msra.mxu0 %v520_v24  ;;  %501 = vmatpush3.bf16.msra.mxu1 %v527_v63 }
   0xe   :  { %484 = vmatprep.subr.bf16.mxu0 %v521_v25  ;;  %502 = vmatprep.subr.bf16.mxu1 %v528_v0 }
  0x11   :  { %485 = vmatpush3.bf16.msra.mxu0 %v521_v25  ;;  %503 = vmatpush3.bf16.msra.mxu1 %v528_v0 }
  0x12   :  { %486 = vmatprep.subr.bf16.mxu0 %v522_v26  ;;  %504 = vmatprep.subr.bf16.mxu1 %v529_v1 }
  0x15   :  { %487 = vmatpush3.bf16.msra.mxu0 %v522_v26  ;;  %505 = vmatpush3.bf16.msra.mxu1 %v529_v1 }
  0x16   :  { %488 = vmatprep.subr.bf16.mxu0 %v523_v27  ;;  %506 = vmatprep.subr.bf16.mxu1 %v530_v6 }
  0x19   :  { %489 = vmatpush3.bf16.msra.mxu0 %v523_v27  ;;  %507 = vmatpush3.bf16.msra.mxu1 %v530_v6 }
  0x1a   :  { %490 = vmatprep.subr.bf16.mxu0 %v524_v28 }
  0x1d   :  { %491 = vmatpush3.bf16.msra.mxu0 %v524_v28 }
  0x1e   :  { %492 = vmatprep.subr.bf16.mxu0 %v525_v29 }
  0x21   :  { %493 = vmatpush3.bf16.msra.mxu0 %v525_v29 }
  0x91   :  { %v38_v7 = vpop.xlane.xlu0 %37  ;;  %v42_v8 = vpop.xlane.xlu1 %41 }
  0x92   :  { %v46_v9 = vmul.f32 0.0078125, %v38_v7  ;;  %v48_v10 = vmul.f32 0.0078125, %v42_v8  ;;  %v531_v7 = vld [vmem:[%s686_s5 + $0x28] sm:$0xff]   ;;  %v532_v8 = vld [vmem:[%s686_s5 + $0x30] sm:$0xff]  }
  0x93   :  { %508 = vmatprep.subr.bf16.mxu1 %v531_v7 }
  0x94   :  { %v50_v11 = vsub.f32 %v596_v2, %v46_v9  ;;  %v52_v12 = vsub.f32 %v598_v3, %v48_v10  ;;  %509 = vmatpush3.bf16.msra.mxu1 %v531_v7  ;;  %v533_v9 = vld [vmem:[%s686_s5 + $0x38] sm:$0xff]   ;;  %v412_v10 = vld [vmem:[%s687_s4] ss:$0 sm:$0xff] }
  0x95   :  { %v40_v13 = vpop.xlane.xlu0 %39  ;;  %v44_v14 = vpop.xlane.xlu1 %43  ;;  %510 = vmatprep.subr.bf16.mxu1 %v532_v8 }
  0x96   :  { %v47_v15 = vmul.f32 0.0078125, %v40_v13  ;;  %v54_v16 = vmul.f32 %v50_v11, %v50_v11  ;;  %v49_v17 = vmul.f32 0.0078125, %v44_v14  ;;  %v56_v20 = vmul.f32 %v52_v12, %v52_v12 }
  0x98   :  { %v51_v18 = vsub.f32 %v602_v4, %v47_v15  ;;  %58 = vadd.xlane.f32.xlu0 %v54_v16  ;;  %v53_v19 = vsub.f32 %v604_v5, %v49_v17  ;;  %511 = vmatpush3.bf16.msra.mxu1 %v532_v8 }
  0x99   :  { %512 = vmatprep.subr.bf16.mxu1 %v533_v9 }
  0x9a   :  { %v55_v21 = vmul.f32 %v51_v18, %v51_v18  ;;  %v57_v22 = vmul.f32 %v53_v19, %v53_v19 }
  0x9c   :  { %62 = vadd.xlane.f32.xlu0 %v56_v20  ;;  %60 = vadd.xlane.f32.xlu1 %v55_v21 }
  0x9d   :  { %513 = vmatpush3.bf16.msra.mxu1 %v533_v9 }
  0xa0   :  { %64 = vadd.xlane.f32.xlu1 %v57_v22 }
 0x125   :  { %v59_v30 = vpop.xlane.xlu0 %58 }
 0x126   :  { %v66_v31 = vmul.f32 0.0078125, %v59_v30 }
 0x128   :  { %v70_v32 = vadd.f32 1e-05, %v66_v31 }
 0x129   :  { %v61_v33 = vpop.xlane.xlu1 %60  ;;  %v63_v34 = vpop.xlane.xlu0 %62 }
 0x12a   :  { %534 = vrsqrt.f32 %v70_v32  ;;  %v67_v35 = vmul.f32 0.0078125, %v61_v33  ;;  %v68_v36 = vmul.f32 0.0078125, %v63_v34 }
 0x12c   :  { %v71_v37 = vadd.f32 1e-05, %v67_v35  ;;  %v72_v38 = vadd.f32 1e-05, %v68_v36 }
 0x12d   :  { %v65_v39 = vpop.xlane.xlu1 %64 }
 0x12e   :  { %536 = vrsqrt.f32 %v71_v37  ;;  %v69_v40 = vmul.f32 0.0078125, %v65_v39 }
 0x12f   :  { %538 = vrsqrt.f32 %v72_v38 }
 0x130   :  { %v73_v41 = vadd.f32 1e-05, %v69_v40 }
 0x132   :  { %540 = vrsqrt.f32 %v73_v41 }
 0x134   :  { %v535_v42 = vpop.eup %534 }
 0x135   :  { %v78_v43 = vmul.f32 %v535_v42, %v50_v11 }
 0x137   :  { %v88_v48 = vmul.f32 %v410_v44, %v78_v43 }
 0x138   :  { %v537_v45 = vpop.eup %536 }
 0x139   :  { %v539_v46 = vpop.eup %538  ;;  %v79_v47 = vmul.f32 %v537_v45, %v51_v18  ;;  %v98_v53 = vadd.f32 %v411_v49, %v88_v48 }
 0x13a   :  { %v80_v50 = vmul.f32 %v539_v46, %v52_v12 }
 0x13b   :  { %v89_v51 = vmul.f32 %v410_v44, %v79_v47 }
 0x13c   :  { %v541_v52 = vpop.eup %540  ;;  %v90_v56 = vmul.f32 %v410_v44, %v80_v50 }
 0x13d   :  { %v99_v54 = vadd.f32 %v411_v49, %v89_v51  ;;  %v81_v55 = vmul.f32 %v541_v52, %v53_v19 }
 0x13e   :  { %v100_v59 = vadd.f32 %v411_v49, %v90_v56 }
 0x13f   :  { %v102_v57 = vpack.c.bf16 %v99_v54, %v98_v53  ;;  %v91_v58 = vmul.f32 %v410_v44, %v81_v55 }
 0x141   :  { %494 = vmatprep.mubr.bf16.mxu0 %v102_v57  ;;  %v101_v60 = vadd.f32 %v411_v49, %v91_v58  ;;  %v421_v57 = vld [vmem:[%s688_s6] ss:$0 sm:$0xff] }
 0x143   :  { %v103_v61 = vpack.c.bf16 %v101_v60, %v100_v59 }
 0x145   :  { %495 = vmatmul.mubr.bf16.vlgmr.msra.gmra.mrb[0].mxu0 %v103_v61 }
 0x218   :  { %v496_v11 = vpop.f32.mrb[0].mxu0 }
 0x219   :  { %v218_v12 = vadd.f32 %v496_v11, %v412_v10  ;;  %v209_v13 = vpop.f32.mrb[1].mxu0 }
 0x21a   :  { %v210_v14 = vadd.f32 %v412_v10, %v209_v13  ;;  %v497_v15 = vpop.f32.mrb[2].mxu0 }
 0x21b   :  { %v226_v16 = vmul.f32 %v218_v12, %v218_v12  ;;  %v221_v17 = vadd.f32 %v497_v15, %v412_v10  ;;  %v212_v18 = vpop.f32.mrb[3].mxu0 }
 0x21c   :  { %v224_v19 = vmul.f32 %v210_v14, %v210_v14  ;;  %v213_v20 = vadd.f32 %v412_v10, %v212_v18 }
 0x21d   :  { %v230_v21 = vmul.f32 %v226_v16, %v218_v12  ;;  %v227_v22 = vmul.f32 %v221_v17, %v221_v17 }
 0x21e   :  { %v228_v23 = vmul.f32 %v224_v19, %v210_v14  ;;  %v225_v24 = vmul.f32 %v213_v20, %v213_v20 }
 0x21f   :  { %v234_v25 = vmul.f32 0.044715, %v230_v21  ;;  %v231_v26 = vmul.f32 %v227_v22, %v221_v17 }
 0x220   :  { %v232_v27 = vmul.f32 0.044715, %v228_v23  ;;  %v229_v28 = vmul.f32 %v225_v24, %v213_v20 }
 0x221   :  { %v238_v29 = vadd.f32 %v234_v25, %v218_v12  ;;  %v235_v30 = vmul.f32 0.044715, %v231_v26 }
 0x222   :  { %v233_v31 = vmul.f32 0.044715, %v229_v28  ;;  %v236_v32 = vadd.f32 %v232_v27, %v210_v14 }
 0x223   :  { %v242_v33 = vmul.f32 0.7978846, %v238_v29  ;;  %v239_v34 = vadd.f32 %v235_v30, %v221_v17 }
 0x224   :  { %v237_v35 = vadd.f32 %v233_v31, %v213_v20  ;;  %v240_v36 = vmul.f32 0.7978846, %v236_v32 }
 0x225   :  { %542 = vtanh.f32 %v242_v33  ;;  %v243_v37 = vmul.f32 0.7978846, %v239_v34 }
 0x226   :  { %v241_v38 = vmul.f32 0.7978846, %v237_v35  ;;  %544 = vtanh.f32 %v240_v36 }
 0x227   :  { %546 = vtanh.f32 %v243_v37 }
 0x228   :  { %548 = vtanh.f32 %v241_v38 }
 0x22f   :  { %v543_v39 = vpop.eup %542 }
 0x230   :  { %v545_v40 = vpop.eup %544  ;;  %v250_v41 = vadd.f32 1.0, %v543_v39 }
 0x231   :  { %v547_v42 = vpop.eup %546  ;;  %v248_v43 = vadd.f32 1.0, %v545_v40 }
 0x232   :  { %v549_v44 = vpop.eup %548  ;;  %v251_v45 = vadd.f32 1.0, %v547_v42  ;;  %v254_v46 = vmul.f32 0.5, %v250_v41 }
 0x233   :  { %v249_v47 = vadd.f32 1.0, %v549_v44  ;;  %v252_v48 = vmul.f32 0.5, %v248_v43 }
 0x234   :  { %v255_v49 = vmul.f32 0.5, %v251_v45  ;;  %v258_v51 = vmul.f32 %v254_v46, %v218_v12 }
 0x235   :  { %v253_v50 = vmul.f32 0.5, %v249_v47  ;;  %v256_v53 = vmul.f32 %v252_v48, %v210_v14 }
 0x236   :  { %v259_v52 = vmul.f32 %v255_v49, %v221_v17 }
 0x237   :  { %v257_v54 = vmul.f32 %v253_v50, %v213_v20 }
 0x238   :  { %v261_v55 = vpack.c.bf16 %v259_v52, %v258_v51 }
 0x239   :  { %v260_v56 = vpack.c.bf16 %v257_v54, %v256_v53 }
 0x23b   :  { %514 = vmatprep.mubr.bf16.mxu1 %v260_v56 }
 0x23c   :  { %515 = vmatmul.mubr.bf16.vlgmr.msra.gmra.mrb[0].mxu1 %v261_v55 }
 0x30f   :  { %v516_v58 = vpop.f32.mrb[0].mxu1 }
 0x310   :  { %v376_v59 = vadd.f32 %v516_v58, %v421_v57  ;;  %v367_v60 = vpop.f32.mrb[1].mxu1 }
 0x311   :  { %v368_v61 = vadd.f32 %v421_v57, %v367_v60  ;;  %v517_v62 = vpop.f32.mrb[2].mxu1 }
 0x312   :  { %v379_v63 = vadd.f32 %v517_v62, %v421_v57  ;;  %v370_v0 = vpop.f32.mrb[3].mxu1  ;;  %v384_v6 = vadd.f32 %v598_v3, %v376_v59 }
 0x313   :  { %v371_v1 = vadd.f32 %v421_v57, %v370_v0  ;;  %v382_v8 = vadd.f32 %v596_v2, %v368_v61 }
 0x314   :  { %v385_v7 = vadd.f32 %v604_v5, %v379_v63 }
 0x315   :  { %v383_v9 = vadd.f32 %v602_v4, %v371_v1 }
 0x316   :  { %v454_v10 = vpack.c.bf16 %v385_v7, %v384_v6 }
 0x317   :  { %v449_v11 = vpack.c.bf16 %v383_v9, %v382_v8 }
 0x318   :  { %457 = vst [vmem:[%s689_s7 + $0x8] sm:$0xff] %v454_v10  }
 0x319   :  { %450 = vst [vmem:[%s689_s7] sm:$0xff] %v449_v11  }

</bundles_post_ra>
